<compile_context>
chip_gen: v7x
topology: tpu7x:2x2x1
jax: 0.10.0
libtpu: 0.0.40
codegen_flags: <defaults>
</compile_context>

<pallas_src>
import numpy as np
import jax
import jax.numpy as jnp
from jax.experimental import pallas as pl
from jax.experimental.pallas import tpu as pltpu

NEG_SLOPE = 0.01   # nn.LeakyReLU() default negative_slope
BN_EPS = 1e-5      # nn.BatchNorm default eps


def _leaky_relu(x):
    return jnp.where(x >= 0, x, NEG_SLOPE * x)


# ---------------------------------------------------------------------------
# The single fused kernel.
# ---------------------------------------------------------------------------

def _fused_kernel(slab1_ref, band1_ref, bias1_ref, scale1_ref, shift1_ref,
                  q2_ref, band2_ref, bias2_ref, scale2_ref, shift2_ref,
                  q3_ref, band3_ref, bias3_ref, scale3_ref, shift3_ref,
                  pool_ref, fw1_ref, fb1_ref, fs_ref, ft_ref, fw2_ref, fb2_ref,
                  o_ref):

    def pool_bias_bn(acc, bias_ref, scale_ref, shift_ref, out_dtype):
        """acc: (4*M, 2*NW) conv outputs.  Rows = 4 stacked (dd,dh) pooling
        parities, column halves = the 2 dw parities -> the 2x2x2 max-pool is a
        plain elementwise max.  Then bias + LeakyReLU + inference BN3d."""
        m = acc.shape[0] // 4
        nw = acc.shape[1] // 2
        a = jnp.maximum(jnp.maximum(acc[0 * m:1 * m], acc[1 * m:2 * m]),
                        jnp.maximum(acc[2 * m:3 * m], acc[3 * m:4 * m]))
        a = jnp.maximum(a[:, :nw], a[:, nw:])
        # Shared bias + monotone LeakyReLU commute with the max:
        # max(lrelu(x_i + b)) == lrelu(max(x_i) + b).
        y = _leaky_relu(a + bias_ref[...]) * scale_ref[...] + shift_ref[...]
        return y.astype(out_dtype)

    # ---- block 1: all 9 (kd,kh) taps folded into a single banded GEMM ----
    acc1 = jnp.dot(slab1_ref[...], band1_ref[...],
                   preferred_element_type=jnp.float32)           # (4*M1, 2*NW1)
    y1 = pool_bias_bn(acc1, bias1_ref, scale1_ref, shift1_ref, jnp.bfloat16)

    # ---- blocks 2 & 3: in-kernel re-slab (0/1 selection GEMM) + banded conv
    #      GEMM, accumulated over the 9 taps (first tap writes, no zero-init) --
    def conv_block(y_in, q_ref, band_ref, bias_ref, scale_ref, shift_ref,
                   out_dtype):
        acc = None
        for t in range(9):
            slab = jnp.dot(q_ref[t], y_in, preferred_element_type=jnp.float32)
            slab = slab.astype(jnp.bfloat16)   # exact: 0/1 selection of bf16 values
            c = jnp.dot(slab, band_ref[t], preferred_element_type=jnp.float32)
            acc = c if acc is None else acc + c
        return pool_bias_bn(acc, bias_ref, scale_ref, shift_ref, out_dtype)

    y2 = conv_block(y1, q2_ref, band2_ref, bias2_ref, scale2_ref, shift2_ref,
                    jnp.bfloat16)                                 # (N*16, 128)
    y3 = conv_block(y2, q3_ref, band3_ref, bias3_ref, scale3_ref, shift3_ref,
                    jnp.float32)                                  # (N*4, 128)

    # ---- head: AdaptiveAvgPool3d((1,1,1)) + fc1 + LeakyReLU + BN1d + fc2 ----
    cout = fw1_ref.shape[0]                        # 64
    zc = y3[:, :cout] + y3[:, cout:2 * cout]       # sum over the 2 wo columns
    feat = jnp.dot(pool_ref[...], zc,
                   preferred_element_type=jnp.float32)            # (N, 64), avg of 8
    h = jnp.dot(feat, fw1_ref[...], preferred_element_type=jnp.float32) + fb1_ref[...]
    h = _leaky_relu(h)
    h = h * fs_ref[...] + ft_ref[...]              # inference BN1d
    # TODO(synk): nn.Dropout(p=0.3) is identity in eval mode; training-mode RNG masking not implemented.
    o_ref[...] = jnp.dot(h, fw2_ref[...], preferred_element_type=jnp.float32) + fb2_ref[...]


def _const_spec(a):
    return pl.BlockSpec(a.shape, lambda i, nd=a.ndim: (0,) * nd)


# ---------------------------------------------------------------------------
# Thin JAX/XLA glue: block-1 slab layout (built once per call from the raw
# input) and host-side parameter preparation (banded weights, selection
# matrices, per-channel rows).
# ---------------------------------------------------------------------------

def build_block1_slabs(x):
    """x: (N, D, H, W, C) -> (4*N*(D//2)*(H//2), 9*W*C) bf16.

    Rows are (dd, dh, n, do, ho): the 4 d/h pooling parities stacked along M.
    Columns are (tap t=kd*3+kh, w, c): all 9 (kd,kh) taps folded into the
    contraction.  Only d/h zero-padding is needed (w padding lives in the
    banded weights)."""
    N, D, H, W, C = x.shape
    Do, Ho = D // 2, H // 2
    xp = jnp.pad(x, ((0, 0), (1, 1), (1, 1), (0, 0), (0, 0)))
    xp = xp.reshape(N, D + 2, H + 2, W * C)
    taps = []
    for kd in range(3):
        for kh in range(3):
            parts = []
            for dd in range(2):
                for dh in range(2):
                    sl = xp[:, kd + dd: kd + dd + 2 * Do: 2,
                            kh + dh: kh + dh + 2 * Ho: 2, :]       # (N, Do, Ho, W*C)
                    parts.append(sl.reshape(N * Do * Ho, W * C))
            taps.append(jnp.concatenate(parts, axis=0))            # (4*M, W*C)
    return jnp.concatenate(taps, axis=1).astype(jnp.bfloat16)      # (4*M, 9*W*C)


def banded_weights(w, W):
    """Conv weight (3,3,3,Cin,Cout) -> (9, W*Cin, 2*(W//2)*Cout) bf16.

    For tap t=(kd,kh) the slice is a banded matrix applying the 1-D conv along
    unpadded W plus the Cin contraction.  The two w-pooling parities are merged
    along columns (p-major), so output columns are (p, wo, cout) = 256 lanes."""
    Cin, Cout = w.shape[3], w.shape[4]
    Wo = W // 2
    wu = np.arange(W)[:, None]
    wo = np.arange(Wo)[None, :]
    mats = []
    for kd in range(3):
        for kh in range(3):
            halves = []
            for p in range(2):
                kw = wu - (2 * wo + p) + 1                 # (W, Wo)
                valid = (kw >= 0) & (kw <= 2)
                kw_idx = jnp.asarray(np.where(valid, kw, 0))
                g = w[kd, kh][kw_idx]                      # (W, Wo, Cin, Cout)
                g = g * jnp.asarray(valid, w.dtype)[:, :, None, None]
                g = g.transpose(0, 2, 1, 3).reshape(W * Cin, Wo * Cout)
                halves.append(g)
            mats.append(jnp.concatenate(halves, axis=1))   # (W*Cin, 2*Wo*Cout)
    return jnp.stack(mats).astype(jnp.bfloat16)            # (9, K, 2*NW)


def selection_matrices(n_batch, S):
    """0/1 re-slab matrices: (9, 4*M, R) bf16 with M = N*(S//2)^2, R = N*S*S.

    Row (dd*2+dh, n, do, ho) of tap (kd,kh) selects input row (n, d, h) with
    d = 2*do+dd+kd-1, h = 2*ho+dh+kh-1 (all-zero row at the zero-pad border)."""
    So = S // 2
    M = n_batch * So * So
    R = n_batch * S * S
    q = np.zeros((9, 4 * M, R), np.float32)
    for kd in range(3):
        for kh in range(3):
            t = kd * 3 + kh
            for dd in range(2):
                for dh in range(2):
                    j = dd * 2 + dh
                    for n in range(n_batch):
                        for do in range(So):
                            for ho in range(So):
                                d = 2 * do + dd + kd - 1
                                h = 2 * ho + dh + kh - 1
                                if 0 <= d < S and 0 <= h < S:
                                    row = j * M + (n * So + do) * So + ho
                                    col = (n * S + d) * S + h
                                    q[t, row, col] = 1.0
    return jnp.asarray(q, jnp.bfloat16)


def prepare_params(p, n_batch):
    """Host-side prep (once, outside the hot path): banded conv weights,
    selection matrices, per-channel rows tiled to the (wo, cout) lane layout,
    and the head's averaging matrix."""
    prep = {}
    spatial = {1: 16, 2: 8, 3: 4}            # cube edge seen by each conv block
    for i in (1, 2, 3):
        W = spatial[i]
        Wo = W // 2
        band = banded_weights(p[f"w{i}"], W)                 # (9, K, 2*NW)
        if i == 1:
            band = band.reshape(9 * band.shape[1], band.shape[2])   # fold taps into K
        prep[f"band{i}"] = band
        prep[f"bias{i}"] = jnp.tile(p[f"b{i}"], Wo).reshape(1, -1)
        prep[f"scale{i}"] = jnp.tile(p[f"s{i}"], Wo).reshape(1, -1)
        prep[f"shift{i}"] = jnp.tile(p[f"t{i}"], Wo).reshape(1, -1)
    prep["q2"] = selection_matrices(n_batch, 8)              # (9, 128, 128)
    prep["q3"] = selection_matrices(n_batch, 4)              # (9, 32, 32)
    # Global-average-pool matrix over block 3's (n, do, ho) rows: 1/8 per tap.
    pm = np.zeros((n_batch, 4 * n_batch), np.float32)
    for n in range(n_batch):
        pm[n, 4 * n:4 * (n + 1)] = 0.125
    prep["pool"] = jnp.asarray(pm)
    prep["fc1_w"] = p["fw1"]
    prep["fc1_b"] = p["fb1"].reshape(1, -1)
    prep["fc1_s"] = p["fs"].reshape(1, -1)
    prep["fc1_t"] = p["ft"].reshape(1, -1)
    prep["fc2_w"] = p["fw2"]
    prep["fc2_b"] = p["fb2"].reshape(1, 1)
    return prep


def forward(x, prep):
    n = x.shape[0]
    slab1 = build_block1_slabs(x)
    args = (slab1,
            prep["band1"], prep["bias1"], prep["scale1"], prep["shift1"],
            prep["q2"], prep["band2"], prep["bias2"], prep["scale2"], prep["shift2"],
            prep["q3"], prep["band3"], prep["bias3"], prep["scale3"], prep["shift3"],
            prep["pool"], prep["fc1_w"], prep["fc1_b"], prep["fc1_s"], prep["fc1_t"],
            prep["fc2_w"], prep["fc2_b"])
    return pl.pallas_call(
        _fused_kernel,
        out_shape=jax.ShapeDtypeStruct((n, 1), jnp.float32),
        grid=(1,),
        in_specs=[_const_spec(a) for a in args],
        out_specs=pl.BlockSpec((n, 1), lambda i: (0, 0)),
        compiler_params=pltpu.CompilerParams(
            dimension_semantics=("arbitrary",),
            vmem_limit_bytes=32 * 1024 * 1024),
    )(*args)


# ---------------------------------------------------------------------------
# Parameters and pure-JAX reference (eval-mode semantics) for the sanity check.
# ---------------------------------------------------------------------------

def init_params(key):
    ks = iter(jax.random.split(key, 32))

    def conv_p(cin, cout):
        bound = 1.0 / np.sqrt(cin * 27)
        w = jax.random.uniform(next(ks), (3, 3, 3, cin, cout), jnp.float32, -bound, bound)
        b = jax.random.uniform(next(ks), (cout,), jnp.float32, -bound, bound)
        return w, b

    def bn_p(c):
        gamma = 1.0 + 0.1 * jax.random.normal(next(ks), (c,), jnp.float32)
        beta = 0.1 * jax.random.normal(next(ks), (c,), jnp.float32)
        mean = 0.05 * jax.random.normal(next(ks), (c,), jnp.float32)
        var = 1.0 + 0.1 * jnp.abs(jax.random.normal(next(ks), (c,), jnp.float32))
        scale = gamma / jnp.sqrt(var + BN_EPS)     # inference BN folded to scale/shift
        shift = beta - mean * scale
        return scale, shift

    def lin_p(fin, fout):
        bound = 1.0 / np.sqrt(fin)
        w = jax.random.uniform(next(ks), (fin, fout), jnp.float32, -bound, bound)
        b = jax.random.uniform(next(ks), (fout,), jnp.float32, -bound, bound)
        return w, b

    p = {}
    p["w1"], p["b1"] = conv_p(2, 16)
    p["s1"], p["t1"] = bn_p(16)
    p["w2"], p["b2"] = conv_p(16, 32)
    p["s2"], p["t2"] = bn_p(32)
    p["w3"], p["b3"] = conv_p(32, 64)
    p["s3"], p["t3"] = bn_p(64)
    p["fw1"], p["fb1"] = lin_p(64, 128)
    p["fs"], p["ft"] = bn_p(128)
    p["fw2"], p["fb2"] = lin_p(128, 1)
    return p


def reference_forward(x, p):
    hp = jax.lax.Precision.HIGHEST

    def block(x, w, b, s, t):
        y = jax.lax.conv_general_dilated(
            x, w, window_strides=(1, 1, 1), padding="SAME",
            dimension_numbers=("NDHWC", "DHWIO", "NDHWC"), precision=hp) + b
        y = jnp.where(y >= 0, y, NEG_SLOPE * y)
        y = jax.lax.reduce_window(y, -np.inf, jax.lax.max,
                                  (1, 2, 2, 2, 1), (1, 2, 2, 2, 1), "VALID")
        return y * s + t

    x = block(x, p["w1"], p["b1"], p["s1"], p["t1"])
    x = block(x, p["w2"], p["b2"], p["s2"], p["t2"])
    x = block(x, p["w3"], p["b3"], p["s3"], p["t3"])
    feat = jnp.mean(x, axis=(1, 2, 3))                      # AdaptiveAvgPool3d + flatten
    h = jnp.dot(feat, p["fw1"], precision=hp) + p["fb1"]
    h = jnp.where(h >= 0, h, NEG_SLOPE * h)
    h = h * p["fs"] + p["ft"]
    return jnp.dot(h, p["fw2"], precision=hp) + p["fb2"]


if __name__ == "__main__":
    key = jax.random.PRNGKey(0)
    kx, kp = jax.random.split(key)
    N, Cin, D, H, W = 2, 2, 16, 16, 16
    # NDHWC input; equivalent PyTorch NCDHW shape is (2, 2, 16, 16, 16).
    x = jax.random.normal(kx, (N, D, H, W, Cin), jnp.float32)
    params = init_params(kp)
    prep = prepare_params(params, N)

    out = jax.jit(forward)(x, prep)
    out = jax.block_until_ready(out)
    assert out.shape == (N, 1)

    ref = reference_forward(x, params)
    np.testing.assert_allclose(np.asarray(out), np.asarray(ref), rtol=5e-2, atol=5e-2)
    print("KERNEL_OK")
</pallas_src>

<mosaic_0001>
module attributes {stable_mosaic.version = 11 : i64} {
  func.func @_fused_kernel(%arg0: i32, %arg1: memref<512x288xbf16, #tpu.memory_space<vmem>>, %arg2: memref<288x256xbf16, #tpu.memory_space<vmem>>, %arg3: memref<1x128xf32, #tpu.memory_space<vmem>>, %arg4: memref<1x128xf32, #tpu.memory_space<vmem>>, %arg5: memref<1x128xf32, #tpu.memory_space<vmem>>, %arg6: memref<9x128x128xbf16, #tpu.memory_space<vmem>>, %arg7: memref<9x128x256xbf16, #tpu.memory_space<vmem>>, %arg8: memref<1x128xf32, #tpu.memory_space<vmem>>, %arg9: memref<1x128xf32, #tpu.memory_space<vmem>>, %arg10: memref<1x128xf32, #tpu.memory_space<vmem>>, %arg11: memref<9x32x32xbf16, #tpu.memory_space<vmem>>, %arg12: memref<9x128x256xbf16, #tpu.memory_space<vmem>>, %arg13: memref<1x128xf32, #tpu.memory_space<vmem>>, %arg14: memref<1x128xf32, #tpu.memory_space<vmem>>, %arg15: memref<1x128xf32, #tpu.memory_space<vmem>>, %arg16: memref<2x8xf32, #tpu.memory_space<vmem>>, %arg17: memref<64x128xf32, #tpu.memory_space<vmem>>, %arg18: memref<1x128xf32, #tpu.memory_space<vmem>>, %arg19: memref<1x128xf32, #tpu.memory_space<vmem>>, %arg20: memref<1x128xf32, #tpu.memory_space<vmem>>, %arg21: memref<128x1xf32, #tpu.memory_space<vmem>>, %arg22: memref<1x1xf32, #tpu.memory_space<vmem>>, %arg23: memref<2x1xf32, #tpu.memory_space<vmem>>) attributes {dimension_semantics = [#tpu.dimension_semantics<arbitrary>], iteration_bounds = array<i64: 1>, scalar_prefetch = 0 : i64, scratch_operands = 0 : i64, tpu.core_type = #tpu.core_type<tc>, window_params = [{pipeline_mode = #tpu.pipeline_mode<synchronous>, transform_indices = @transform_0, window_bounds = array<i64: 512, 288>}, {pipeline_mode = #tpu.pipeline_mode<synchronous>, transform_indices = @transform_1, window_bounds = array<i64: 288, 256>}, {pipeline_mode = #tpu.pipeline_mode<synchronous>, transform_indices = @transform_2, window_bounds = array<i64: 1, 128>}, {pipeline_mode = #tpu.pipeline_mode<synchronous>, transform_indices = @transform_3, window_bounds = array<i64: 1, 128>}, {pipeline_mode = #tpu.pipeline_mode<synchronous>, transform_indices = @transform_4, window_bounds = array<i64: 1, 128>}, {pipeline_mode = #tpu.pipeline_mode<synchronous>, transform_indices = @transform_5, window_bounds = array<i64: 9, 128, 128>}, {pipeline_mode = #tpu.pipeline_mode<synchronous>, transform_indices = @transform_6, window_bounds = array<i64: 9, 128, 256>}, {pipeline_mode = #tpu.pipeline_mode<synchronous>, transform_indices = @transform_7, window_bounds = array<i64: 1, 128>}, {pipeline_mode = #tpu.pipeline_mode<synchronous>, transform_indices = @transform_8, window_bounds = array<i64: 1, 128>}, {pipeline_mode = #tpu.pipeline_mode<synchronous>, transform_indices = @transform_9, window_bounds = array<i64: 1, 128>}, {pipeline_mode = #tpu.pipeline_mode<synchronous>, transform_indices = @transform_10, window_bounds = array<i64: 9, 32, 32>}, {pipeline_mode = #tpu.pipeline_mode<synchronous>, transform_indices = @transform_11, window_bounds = array<i64: 9, 128, 256>}, {pipeline_mode = #tpu.pipeline_mode<synchronous>, transform_indices = @transform_12, window_bounds = array<i64: 1, 128>}, {pipeline_mode = #tpu.pipeline_mode<synchronous>, transform_indices = @transform_13, window_bounds = array<i64: 1, 128>}, {pipeline_mode = #tpu.pipeline_mode<synchronous>, transform_indices = @transform_14, window_bounds = array<i64: 1, 128>}, {pipeline_mode = #tpu.pipeline_mode<synchronous>, transform_indices = @transform_15, window_bounds = array<i64: 2, 8>}, {pipeline_mode = #tpu.pipeline_mode<synchronous>, transform_indices = @transform_16, window_bounds = array<i64: 64, 128>}, {pipeline_mode = #tpu.pipeline_mode<synchronous>, transform_indices = @transform_17, window_bounds = array<i64: 1, 128>}, {pipeline_mode = #tpu.pipeline_mode<synchronous>, transform_indices = @transform_18, window_bounds = array<i64: 1, 128>}, {pipeline_mode = #tpu.pipeline_mode<synchronous>, transform_indices = @transform_19, window_bounds = array<i64: 1, 128>}, {pipeline_mode = #tpu.pipeline_mode<synchronous>, transform_indices = @transform_20, window_bounds = array<i64: 128, 1>}, {pipeline_mode = #tpu.pipeline_mode<synchronous>, transform_indices = @transform_21, window_bounds = array<i64: 1, 1>}, {pipeline_mode = #tpu.pipeline_mode<synchronous>, transform_indices = @transform_22, window_bounds = array<i64: 2, 1>}]} {
    %c0 = arith.constant 0 : index
    %c0_0 = arith.constant 0 : index
    %0 = vector.load %arg1[%c0, %c0_0] : memref<512x288xbf16, #tpu.memory_space<vmem>>, vector<512x288xbf16>
    %c0_1 = arith.constant 0 : index
    %c0_2 = arith.constant 0 : index
    %1 = vector.load %arg2[%c0_1, %c0_2] : memref<288x256xbf16, #tpu.memory_space<vmem>>, vector<288x256xbf16>
    %cst = arith.constant dense<0.000000e+00> : vector<512x256xf32>
    %2 = tpu.matmul %0, %1, %cst {dimension_numbers = #tpu.dot_dimension_numbers<[1], [0], [0], [1], [0, 0, 1, 1], [], []>} : vector<512x288xbf16>, vector<288x256xbf16>, vector<512x256xf32> -> vector<512x256xf32>
    %3 = vector.extract_strided_slice %2 {offsets = [0, 0], sizes = [128, 256], strides = [1, 1]} : vector<512x256xf32> to vector<128x256xf32>
    %4 = vector.extract_strided_slice %2 {offsets = [128, 0], sizes = [128, 256], strides = [1, 1]} : vector<512x256xf32> to vector<128x256xf32>
    %5 = arith.maximumf %3, %4 : vector<128x256xf32>
    %6 = vector.extract_strided_slice %2 {offsets = [256, 0], sizes = [128, 256], strides = [1, 1]} : vector<512x256xf32> to vector<128x256xf32>
    %7 = vector.extract_strided_slice %2 {offsets = [384, 0], sizes = [128, 256], strides = [1, 1]} : vector<512x256xf32> to vector<128x256xf32>
    %8 = arith.maximumf %6, %7 : vector<128x256xf32>
    %9 = arith.maximumf %5, %8 : vector<128x256xf32>
    %10 = vector.extract_strided_slice %9 {offsets = [0, 0], sizes = [128, 128], strides = [1, 1]} : vector<128x256xf32> to vector<128x128xf32>
    %11 = vector.extract_strided_slice %9 {offsets = [0, 128], sizes = [128, 128], strides = [1, 1]} : vector<128x256xf32> to vector<128x128xf32>
    %12 = arith.maximumf %10, %11 : vector<128x128xf32>
    %c0_3 = arith.constant 0 : index
    %c0_4 = arith.constant 0 : index
    %13 = vector.load %arg3[%c0_3, %c0_4] : memref<1x128xf32, #tpu.memory_space<vmem>>, vector<1x128xf32>
    %14 = vector.broadcast %13 : vector<1x128xf32> to vector<128x128xf32>
    %15 = arith.addf %12, %14 : vector<128x128xf32>
    %cst_5 = arith.constant 0.000000e+00 : f32
    %16 = vector.broadcast %cst_5 : f32 to vector<128x128xf32>
    %17 = arith.cmpf oge, %15, %16 : vector<128x128xf32>
    %cst_6 = arith.constant 0.00999999977 : f32
    %18 = vector.broadcast %cst_6 : f32 to vector<128x128xf32>
    %19 = arith.mulf %18, %15 : vector<128x128xf32>
    %20 = arith.select %17, %15, %19 : vector<128x128xi1>, vector<128x128xf32>
    %c0_7 = arith.constant 0 : index
    %c0_8 = arith.constant 0 : index
    %21 = vector.load %arg4[%c0_7, %c0_8] : memref<1x128xf32, #tpu.memory_space<vmem>>, vector<1x128xf32>
    %22 = vector.broadcast %21 : vector<1x128xf32> to vector<128x128xf32>
    %23 = arith.mulf %20, %22 : vector<128x128xf32>
    %c0_9 = arith.constant 0 : index
    %c0_10 = arith.constant 0 : index
    %24 = vector.load %arg5[%c0_9, %c0_10] : memref<1x128xf32, #tpu.memory_space<vmem>>, vector<1x128xf32>
    %25 = vector.broadcast %24 : vector<1x128xf32> to vector<128x128xf32>
    %26 = arith.addf %23, %25 : vector<128x128xf32>
    %27 = arith.truncf %26 : vector<128x128xf32> to vector<128x128xbf16>
    %c0_11 = arith.constant 0 : index
    %c0_12 = arith.constant 0 : index
    %c0_13 = arith.constant 0 : index
    %28 = vector.load %arg6[%c0_11, %c0_12, %c0_13] : memref<9x128x128xbf16, #tpu.memory_space<vmem>>, vector<1x128x128xbf16>
    %29 = vector.shape_cast %28 : vector<1x128x128xbf16> to vector<128x128xbf16>
    %cst_14 = arith.constant dense<0.000000e+00> : vector<128x128xf32>
    %30 = tpu.matmul %29, %27, %cst_14 {dimension_numbers = #tpu.dot_dimension_numbers<[1], [0], [0], [1], [0, 0, 1, 1], [], []>} : vector<128x128xbf16>, vector<128x128xbf16>, vector<128x128xf32> -> vector<128x128xf32>
    %31 = arith.truncf %30 : vector<128x128xf32> to vector<128x128xbf16>
    %c0_15 = arith.constant 0 : index
    %c0_16 = arith.constant 0 : index
    %c0_17 = arith.constant 0 : index
    %32 = vector.load %arg7[%c0_15, %c0_16, %c0_17] : memref<9x128x256xbf16, #tpu.memory_space<vmem>>, vector<1x128x256xbf16>
    %33 = vector.shape_cast %32 : vector<1x128x256xbf16> to vector<128x256xbf16>
    %cst_18 = arith.constant dense<0.000000e+00> : vector<128x256xf32>
    %34 = tpu.matmul %31, %33, %cst_18 {dimension_numbers = #tpu.dot_dimension_numbers<[1], [0], [0], [1], [0, 0, 1, 1], [], []>} : vector<128x128xbf16>, vector<128x256xbf16>, vector<128x256xf32> -> vector<128x256xf32>
    %c1 = arith.constant 1 : index
    %c0_19 = arith.constant 0 : index
    %c0_20 = arith.constant 0 : index
    %35 = vector.load %arg6[%c1, %c0_19, %c0_20] : memref<9x128x128xbf16, #tpu.memory_space<vmem>>, vector<1x128x128xbf16>
    %36 = vector.shape_cast %35 : vector<1x128x128xbf16> to vector<128x128xbf16>
    %cst_21 = arith.constant dense<0.000000e+00> : vector<128x128xf32>
    %37 = tpu.matmul %36, %27, %cst_21 {dimension_numbers = #tpu.dot_dimension_numbers<[1], [0], [0], [1], [0, 0, 1, 1], [], []>} : vector<128x128xbf16>, vector<128x128xbf16>, vector<128x128xf32> -> vector<128x128xf32>
    %38 = arith.truncf %37 : vector<128x128xf32> to vector<128x128xbf16>
    %c1_22 = arith.constant 1 : index
    %c0_23 = arith.constant 0 : index
    %c0_24 = arith.constant 0 : index
    %39 = vector.load %arg7[%c1_22, %c0_23, %c0_24] : memref<9x128x256xbf16, #tpu.memory_space<vmem>>, vector<1x128x256xbf16>
    %40 = vector.shape_cast %39 : vector<1x128x256xbf16> to vector<128x256xbf16>
    %cst_25 = arith.constant dense<0.000000e+00> : vector<128x256xf32>
    %41 = tpu.matmul %38, %40, %cst_25 {dimension_numbers = #tpu.dot_dimension_numbers<[1], [0], [0], [1], [0, 0, 1, 1], [], []>} : vector<128x128xbf16>, vector<128x256xbf16>, vector<128x256xf32> -> vector<128x256xf32>
    %42 = arith.addf %34, %41 : vector<128x256xf32>
    %c2 = arith.constant 2 : index
    %c0_26 = arith.constant 0 : index
    %c0_27 = arith.constant 0 : index
    %43 = vector.load %arg6[%c2, %c0_26, %c0_27] : memref<9x128x128xbf16, #tpu.memory_space<vmem>>, vector<1x128x128xbf16>
    %44 = vector.shape_cast %43 : vector<1x128x128xbf16> to vector<128x128xbf16>
    %cst_28 = arith.constant dense<0.000000e+00> : vector<128x128xf32>
    %45 = tpu.matmul %44, %27, %cst_28 {dimension_numbers = #tpu.dot_dimension_numbers<[1], [0], [0], [1], [0, 0, 1, 1], [], []>} : vector<128x128xbf16>, vector<128x128xbf16>, vector<128x128xf32> -> vector<128x128xf32>
    %46 = arith.truncf %45 : vector<128x128xf32> to vector<128x128xbf16>
    %c2_29 = arith.constant 2 : index
    %c0_30 = arith.constant 0 : index
    %c0_31 = arith.constant 0 : index
    %47 = vector.load %arg7[%c2_29, %c0_30, %c0_31] : memref<9x128x256xbf16, #tpu.memory_space<vmem>>, vector<1x128x256xbf16>
    %48 = vector.shape_cast %47 : vector<1x128x256xbf16> to vector<128x256xbf16>
    %cst_32 = arith.constant dense<0.000000e+00> : vector<128x256xf32>
    %49 = tpu.matmul %46, %48, %cst_32 {dimension_numbers = #tpu.dot_dimension_numbers<[1], [0], [0], [1], [0, 0, 1, 1], [], []>} : vector<128x128xbf16>, vector<128x256xbf16>, vector<128x256xf32> -> vector<128x256xf32>
    %50 = arith.addf %42, %49 : vector<128x256xf32>
    %c3 = arith.constant 3 : index
    %c0_33 = arith.constant 0 : index
    %c0_34 = arith.constant 0 : index
    %51 = vector.load %arg6[%c3, %c0_33, %c0_34] : memref<9x128x128xbf16, #tpu.memory_space<vmem>>, vector<1x128x128xbf16>
    %52 = vector.shape_cast %51 : vector<1x128x128xbf16> to vector<128x128xbf16>
    %cst_35 = arith.constant dense<0.000000e+00> : vector<128x128xf32>
    %53 = tpu.matmul %52, %27, %cst_35 {dimension_numbers = #tpu.dot_dimension_numbers<[1], [0], [0], [1], [0, 0, 1, 1], [], []>} : vector<128x128xbf16>, vector<128x128xbf16>, vector<128x128xf32> -> vector<128x128xf32>
    %54 = arith.truncf %53 : vector<128x128xf32> to vector<128x128xbf16>
    %c3_36 = arith.constant 3 : index
    %c0_37 = arith.constant 0 : index
    %c0_38 = arith.constant 0 : index
    %55 = vector.load %arg7[%c3_36, %c0_37, %c0_38] : memref<9x128x256xbf16, #tpu.memory_space<vmem>>, vector<1x128x256xbf16>
    %56 = vector.shape_cast %55 : vector<1x128x256xbf16> to vector<128x256xbf16>
    %cst_39 = arith.constant dense<0.000000e+00> : vector<128x256xf32>
    %57 = tpu.matmul %54, %56, %cst_39 {dimension_numbers = #tpu.dot_dimension_numbers<[1], [0], [0], [1], [0, 0, 1, 1], [], []>} : vector<128x128xbf16>, vector<128x256xbf16>, vector<128x256xf32> -> vector<128x256xf32>
    %58 = arith.addf %50, %57 : vector<128x256xf32>
    %c4 = arith.constant 4 : index
    %c0_40 = arith.constant 0 : index
    %c0_41 = arith.constant 0 : index
    %59 = vector.load %arg6[%c4, %c0_40, %c0_41] : memref<9x128x128xbf16, #tpu.memory_space<vmem>>, vector<1x128x128xbf16>
    %60 = vector.shape_cast %59 : vector<1x128x128xbf16> to vector<128x128xbf16>
    %cst_42 = arith.constant dense<0.000000e+00> : vector<128x128xf32>
    %61 = tpu.matmul %60, %27, %cst_42 {dimension_numbers = #tpu.dot_dimension_numbers<[1], [0], [0], [1], [0, 0, 1, 1], [], []>} : vector<128x128xbf16>, vector<128x128xbf16>, vector<128x128xf32> -> vector<128x128xf32>
    %62 = arith.truncf %61 : vector<128x128xf32> to vector<128x128xbf16>
    %c4_43 = arith.constant 4 : index
    %c0_44 = arith.constant 0 : index
    %c0_45 = arith.constant 0 : index
    %63 = vector.load %arg7[%c4_43, %c0_44, %c0_45] : memref<9x128x256xbf16, #tpu.memory_space<vmem>>, vector<1x128x256xbf16>
    %64 = vector.shape_cast %63 : vector<1x128x256xbf16> to vector<128x256xbf16>
    %cst_46 = arith.constant dense<0.000000e+00> : vector<128x256xf32>
    %65 = tpu.matmul %62, %64, %cst_46 {dimension_numbers = #tpu.dot_dimension_numbers<[1], [0], [0], [1], [0, 0, 1, 1], [], []>} : vector<128x128xbf16>, vector<128x256xbf16>, vector<128x256xf32> -> vector<128x256xf32>
    %66 = arith.addf %58, %65 : vector<128x256xf32>
    %c5 = arith.constant 5 : index
    %c0_47 = arith.constant 0 : index
    %c0_48 = arith.constant 0 : index
    %67 = vector.load %arg6[%c5, %c0_47, %c0_48] : memref<9x128x128xbf16, #tpu.memory_space<vmem>>, vector<1x128x128xbf16>
    %68 = vector.shape_cast %67 : vector<1x128x128xbf16> to vector<128x128xbf16>
    %cst_49 = arith.constant dense<0.000000e+00> : vector<128x128xf32>
    %69 = tpu.matmul %68, %27, %cst_49 {dimension_numbers = #tpu.dot_dimension_numbers<[1], [0], [0], [1], [0, 0, 1, 1], [], []>} : vector<128x128xbf16>, vector<128x128xbf16>, vector<128x128xf32> -> vector<128x128xf32>
    %70 = arith.truncf %69 : vector<128x128xf32> to vector<128x128xbf16>
    %c5_50 = arith.constant 5 : index
    %c0_51 = arith.constant 0 : index
    %c0_52 = arith.constant 0 : index
    %71 = vector.load %arg7[%c5_50, %c0_51, %c0_52] : memref<9x128x256xbf16, #tpu.memory_space<vmem>>, vector<1x128x256xbf16>
    %72 = vector.shape_cast %71 : vector<1x128x256xbf16> to vector<128x256xbf16>
    %cst_53 = arith.constant dense<0.000000e+00> : vector<128x256xf32>
    %73 = tpu.matmul %70, %72, %cst_53 {dimension_numbers = #tpu.dot_dimension_numbers<[1], [0], [0], [1], [0, 0, 1, 1], [], []>} : vector<128x128xbf16>, vector<128x256xbf16>, vector<128x256xf32> -> vector<128x256xf32>
    %74 = arith.addf %66, %73 : vector<128x256xf32>
    %c6 = arith.constant 6 : index
    %c0_54 = arith.constant 0 : index
    %c0_55 = arith.constant 0 : index
    %75 = vector.load %arg6[%c6, %c0_54, %c0_55] : memref<9x128x128xbf16, #tpu.memory_space<vmem>>, vector<1x128x128xbf16>
    %76 = vector.shape_cast %75 : vector<1x128x128xbf16> to vector<128x128xbf16>
    %cst_56 = arith.constant dense<0.000000e+00> : vector<128x128xf32>
    %77 = tpu.matmul %76, %27, %cst_56 {dimension_numbers = #tpu.dot_dimension_numbers<[1], [0], [0], [1], [0, 0, 1, 1], [], []>} : vector<128x128xbf16>, vector<128x128xbf16>, vector<128x128xf32> -> vector<128x128xf32>
    %78 = arith.truncf %77 : vector<128x128xf32> to vector<128x128xbf16>
    %c6_57 = arith.constant 6 : index
    %c0_58 = arith.constant 0 : index
    %c0_59 = arith.constant 0 : index
    %79 = vector.load %arg7[%c6_57, %c0_58, %c0_59] : memref<9x128x256xbf16, #tpu.memory_space<vmem>>, vector<1x128x256xbf16>
    %80 = vector.shape_cast %79 : vector<1x128x256xbf16> to vector<128x256xbf16>
    %cst_60 = arith.constant dense<0.000000e+00> : vector<128x256xf32>
    %81 = tpu.matmul %78, %80, %cst_60 {dimension_numbers = #tpu.dot_dimension_numbers<[1], [0], [0], [1], [0, 0, 1, 1], [], []>} : vector<128x128xbf16>, vector<128x256xbf16>, vector<128x256xf32> -> vector<128x256xf32>
    %82 = arith.addf %74, %81 : vector<128x256xf32>
    %c7 = arith.constant 7 : index
    %c0_61 = arith.constant 0 : index
    %c0_62 = arith.constant 0 : index
    %83 = vector.load %arg6[%c7, %c0_61, %c0_62] : memref<9x128x128xbf16, #tpu.memory_space<vmem>>, vector<1x128x128xbf16>
    %84 = vector.shape_cast %83 : vector<1x128x128xbf16> to vector<128x128xbf16>
    %cst_63 = arith.constant dense<0.000000e+00> : vector<128x128xf32>
    %85 = tpu.matmul %84, %27, %cst_63 {dimension_numbers = #tpu.dot_dimension_numbers<[1], [0], [0], [1], [0, 0, 1, 1], [], []>} : vector<128x128xbf16>, vector<128x128xbf16>, vector<128x128xf32> -> vector<128x128xf32>
    %86 = arith.truncf %85 : vector<128x128xf32> to vector<128x128xbf16>
    %c7_64 = arith.constant 7 : index
    %c0_65 = arith.constant 0 : index
    %c0_66 = arith.constant 0 : index
    %87 = vector.load %arg7[%c7_64, %c0_65, %c0_66] : memref<9x128x256xbf16, #tpu.memory_space<vmem>>, vector<1x128x256xbf16>
    %88 = vector.shape_cast %87 : vector<1x128x256xbf16> to vector<128x256xbf16>
    %cst_67 = arith.constant dense<0.000000e+00> : vector<128x256xf32>
    %89 = tpu.matmul %86, %88, %cst_67 {dimension_numbers = #tpu.dot_dimension_numbers<[1], [0], [0], [1], [0, 0, 1, 1], [], []>} : vector<128x128xbf16>, vector<128x256xbf16>, vector<128x256xf32> -> vector<128x256xf32>
    %90 = arith.addf %82, %89 : vector<128x256xf32>
    %c8 = arith.constant 8 : index
    %c0_68 = arith.constant 0 : index
    %c0_69 = arith.constant 0 : index
    %91 = vector.load %arg6[%c8, %c0_68, %c0_69] : memref<9x128x128xbf16, #tpu.memory_space<vmem>>, vector<1x128x128xbf16>
    %92 = vector.shape_cast %91 : vector<1x128x128xbf16> to vector<128x128xbf16>
    %cst_70 = arith.constant dense<0.000000e+00> : vector<128x128xf32>
    %93 = tpu.matmul %92, %27, %cst_70 {dimension_numbers = #tpu.dot_dimension_numbers<[1], [0], [0], [1], [0, 0, 1, 1], [], []>} : vector<128x128xbf16>, vector<128x128xbf16>, vector<128x128xf32> -> vector<128x128xf32>
    %94 = arith.truncf %93 : vector<128x128xf32> to vector<128x128xbf16>
    %c8_71 = arith.constant 8 : index
    %c0_72 = arith.constant 0 : index
    %c0_73 = arith.constant 0 : index
    %95 = vector.load %arg7[%c8_71, %c0_72, %c0_73] : memref<9x128x256xbf16, #tpu.memory_space<vmem>>, vector<1x128x256xbf16>
    %96 = vector.shape_cast %95 : vector<1x128x256xbf16> to vector<128x256xbf16>
    %cst_74 = arith.constant dense<0.000000e+00> : vector<128x256xf32>
    %97 = tpu.matmul %94, %96, %cst_74 {dimension_numbers = #tpu.dot_dimension_numbers<[1], [0], [0], [1], [0, 0, 1, 1], [], []>} : vector<128x128xbf16>, vector<128x256xbf16>, vector<128x256xf32> -> vector<128x256xf32>
    %98 = arith.addf %90, %97 : vector<128x256xf32>
    %99 = vector.extract_strided_slice %98 {offsets = [0, 0], sizes = [32, 256], strides = [1, 1]} : vector<128x256xf32> to vector<32x256xf32>
    %100 = vector.extract_strided_slice %98 {offsets = [32, 0], sizes = [32, 256], strides = [1, 1]} : vector<128x256xf32> to vector<32x256xf32>
    %101 = arith.maximumf %99, %100 : vector<32x256xf32>
    %102 = vector.extract_strided_slice %98 {offsets = [64, 0], sizes = [32, 256], strides = [1, 1]} : vector<128x256xf32> to vector<32x256xf32>
    %103 = vector.extract_strided_slice %98 {offsets = [96, 0], sizes = [32, 256], strides = [1, 1]} : vector<128x256xf32> to vector<32x256xf32>
    %104 = arith.maximumf %102, %103 : vector<32x256xf32>
    %105 = arith.maximumf %101, %104 : vector<32x256xf32>
    %106 = vector.extract_strided_slice %105 {offsets = [0, 0], sizes = [32, 128], strides = [1, 1]} : vector<32x256xf32> to vector<32x128xf32>
    %107 = vector.extract_strided_slice %105 {offsets = [0, 128], sizes = [32, 128], strides = [1, 1]} : vector<32x256xf32> to vector<32x128xf32>
    %108 = arith.maximumf %106, %107 : vector<32x128xf32>
    %c0_75 = arith.constant 0 : index
    %c0_76 = arith.constant 0 : index
    %109 = vector.load %arg8[%c0_75, %c0_76] : memref<1x128xf32, #tpu.memory_space<vmem>>, vector<1x128xf32>
    %110 = vector.broadcast %109 : vector<1x128xf32> to vector<32x128xf32>
    %111 = arith.addf %108, %110 : vector<32x128xf32>
    %cst_77 = arith.constant 0.000000e+00 : f32
    %112 = vector.broadcast %cst_77 : f32 to vector<32x128xf32>
    %113 = arith.cmpf oge, %111, %112 : vector<32x128xf32>
    %cst_78 = arith.constant 0.00999999977 : f32
    %114 = vector.broadcast %cst_78 : f32 to vector<32x128xf32>
    %115 = arith.mulf %114, %111 : vector<32x128xf32>
    %116 = arith.select %113, %111, %115 : vector<32x128xi1>, vector<32x128xf32>
    %c0_79 = arith.constant 0 : index
    %c0_80 = arith.constant 0 : index
    %117 = vector.load %arg9[%c0_79, %c0_80] : memref<1x128xf32, #tpu.memory_space<vmem>>, vector<1x128xf32>
    %118 = vector.broadcast %117 : vector<1x128xf32> to vector<32x128xf32>
    %119 = arith.mulf %116, %118 : vector<32x128xf32>
    %c0_81 = arith.constant 0 : index
    %c0_82 = arith.constant 0 : index
    %120 = vector.load %arg10[%c0_81, %c0_82] : memref<1x128xf32, #tpu.memory_space<vmem>>, vector<1x128xf32>
    %121 = vector.broadcast %120 : vector<1x128xf32> to vector<32x128xf32>
    %122 = arith.addf %119, %121 : vector<32x128xf32>
    %123 = arith.truncf %122 : vector<32x128xf32> to vector<32x128xbf16>
    %c0_83 = arith.constant 0 : index
    %c0_84 = arith.constant 0 : index
    %c0_85 = arith.constant 0 : index
    %124 = vector.load %arg11[%c0_83, %c0_84, %c0_85] : memref<9x32x32xbf16, #tpu.memory_space<vmem>>, vector<1x32x32xbf16>
    %125 = vector.shape_cast %124 : vector<1x32x32xbf16> to vector<32x32xbf16>
    %cst_86 = arith.constant dense<0.000000e+00> : vector<32x128xf32>
    %126 = tpu.matmul %125, %123, %cst_86 {dimension_numbers = #tpu.dot_dimension_numbers<[1], [0], [0], [1], [0, 0, 1, 1], [], []>} : vector<32x32xbf16>, vector<32x128xbf16>, vector<32x128xf32> -> vector<32x128xf32>
    %127 = arith.truncf %126 : vector<32x128xf32> to vector<32x128xbf16>
    %c0_87 = arith.constant 0 : index
    %c0_88 = arith.constant 0 : index
    %c0_89 = arith.constant 0 : index
    %128 = vector.load %arg12[%c0_87, %c0_88, %c0_89] : memref<9x128x256xbf16, #tpu.memory_space<vmem>>, vector<1x128x256xbf16>
    %129 = vector.shape_cast %128 : vector<1x128x256xbf16> to vector<128x256xbf16>
    %cst_90 = arith.constant dense<0.000000e+00> : vector<32x256xf32>
    %130 = tpu.matmul %127, %129, %cst_90 {dimension_numbers = #tpu.dot_dimension_numbers<[1], [0], [0], [1], [0, 0, 1, 1], [], []>} : vector<32x128xbf16>, vector<128x256xbf16>, vector<32x256xf32> -> vector<32x256xf32>
    %c1_91 = arith.constant 1 : index
    %c0_92 = arith.constant 0 : index
    %c0_93 = arith.constant 0 : index
    %131 = vector.load %arg11[%c1_91, %c0_92, %c0_93] : memref<9x32x32xbf16, #tpu.memory_space<vmem>>, vector<1x32x32xbf16>
    %132 = vector.shape_cast %131 : vector<1x32x32xbf16> to vector<32x32xbf16>
    %cst_94 = arith.constant dense<0.000000e+00> : vector<32x128xf32>
    %133 = tpu.matmul %132, %123, %cst_94 {dimension_numbers = #tpu.dot_dimension_numbers<[1], [0], [0], [1], [0, 0, 1, 1], [], []>} : vector<32x32xbf16>, vector<32x128xbf16>, vector<32x128xf32> -> vector<32x128xf32>
    %134 = arith.truncf %133 : vector<32x128xf32> to vector<32x128xbf16>
    %c1_95 = arith.constant 1 : index
    %c0_96 = arith.constant 0 : index
    %c0_97 = arith.constant 0 : index
    %135 = vector.load %arg12[%c1_95, %c0_96, %c0_97] : memref<9x128x256xbf16, #tpu.memory_space<vmem>>, vector<1x128x256xbf16>
    %136 = vector.shape_cast %135 : vector<1x128x256xbf16> to vector<128x256xbf16>
    %cst_98 = arith.constant dense<0.000000e+00> : vector<32x256xf32>
    %137 = tpu.matmul %134, %136, %cst_98 {dimension_numbers = #tpu.dot_dimension_numbers<[1], [0], [0], [1], [0, 0, 1, 1], [], []>} : vector<32x128xbf16>, vector<128x256xbf16>, vector<32x256xf32> -> vector<32x256xf32>
    %138 = arith.addf %130, %137 : vector<32x256xf32>
    %c2_99 = arith.constant 2 : index
    %c0_100 = arith.constant 0 : index
    %c0_101 = arith.constant 0 : index
    %139 = vector.load %arg11[%c2_99, %c0_100, %c0_101] : memref<9x32x32xbf16, #tpu.memory_space<vmem>>, vector<1x32x32xbf16>
    %140 = vector.shape_cast %139 : vector<1x32x32xbf16> to vector<32x32xbf16>
    %cst_102 = arith.constant dense<0.000000e+00> : vector<32x128xf32>
    %141 = tpu.matmul %140, %123, %cst_102 {dimension_numbers = #tpu.dot_dimension_numbers<[1], [0], [0], [1], [0, 0, 1, 1], [], []>} : vector<32x32xbf16>, vector<32x128xbf16>, vector<32x128xf32> -> vector<32x128xf32>
    %142 = arith.truncf %141 : vector<32x128xf32> to vector<32x128xbf16>
    %c2_103 = arith.constant 2 : index
    %c0_104 = arith.constant 0 : index
    %c0_105 = arith.constant 0 : index
    %143 = vector.load %arg12[%c2_103, %c0_104, %c0_105] : memref<9x128x256xbf16, #tpu.memory_space<vmem>>, vector<1x128x256xbf16>
    %144 = vector.shape_cast %143 : vector<1x128x256xbf16> to vector<128x256xbf16>
    %cst_106 = arith.constant dense<0.000000e+00> : vector<32x256xf32>
    %145 = tpu.matmul %142, %144, %cst_106 {dimension_numbers = #tpu.dot_dimension_numbers<[1], [0], [0], [1], [0, 0, 1, 1], [], []>} : vector<32x128xbf16>, vector<128x256xbf16>, vector<32x256xf32> -> vector<32x256xf32>
    %146 = arith.addf %138, %145 : vector<32x256xf32>
    %c3_107 = arith.constant 3 : index
    %c0_108 = arith.constant 0 : index
    %c0_109 = arith.constant 0 : index
    %147 = vector.load %arg11[%c3_107, %c0_108, %c0_109] : memref<9x32x32xbf16, #tpu.memory_space<vmem>>, vector<1x32x32xbf16>
    %148 = vector.shape_cast %147 : vector<1x32x32xbf16> to vector<32x32xbf16>
    %cst_110 = arith.constant dense<0.000000e+00> : vector<32x128xf32>
    %149 = tpu.matmul %148, %123, %cst_110 {dimension_numbers = #tpu.dot_dimension_numbers<[1], [0], [0], [1], [0, 0, 1, 1], [], []>} : vector<32x32xbf16>, vector<32x128xbf16>, vector<32x128xf32> -> vector<32x128xf32>
    %150 = arith.truncf %149 : vector<32x128xf32> to vector<32x128xbf16>
    %c3_111 = arith.constant 3 : index
    %c0_112 = arith.constant 0 : index
    %c0_113 = arith.constant 0 : index
    %151 = vector.load %arg12[%c3_111, %c0_112, %c0_113] : memref<9x128x256xbf16, #tpu.memory_space<vmem>>, vector<1x128x256xbf16>
    %152 = vector.shape_cast %151 : vector<1x128x256xbf16> to vector<128x256xbf16>
    %cst_114 = arith.constant dense<0.000000e+00> : vector<32x256xf32>
    %153 = tpu.matmul %150, %152, %cst_114 {dimension_numbers = #tpu.dot_dimension_numbers<[1], [0], [0], [1], [0, 0, 1, 1], [], []>} : vector<32x128xbf16>, vector<128x256xbf16>, vector<32x256xf32> -> vector<32x256xf32>
    %154 = arith.addf %146, %153 : vector<32x256xf32>
    %c4_115 = arith.constant 4 : index
    %c0_116 = arith.constant 0 : index
    %c0_117 = arith.constant 0 : index
    %155 = vector.load %arg11[%c4_115, %c0_116, %c0_117] : memref<9x32x32xbf16, #tpu.memory_space<vmem>>, vector<1x32x32xbf16>
    %156 = vector.shape_cast %155 : vector<1x32x32xbf16> to vector<32x32xbf16>
    %cst_118 = arith.constant dense<0.000000e+00> : vector<32x128xf32>
    %157 = tpu.matmul %156, %123, %cst_118 {dimension_numbers = #tpu.dot_dimension_numbers<[1], [0], [0], [1], [0, 0, 1, 1], [], []>} : vector<32x32xbf16>, vector<32x128xbf16>, vector<32x128xf32> -> vector<32x128xf32>
    %158 = arith.truncf %157 : vector<32x128xf32> to vector<32x128xbf16>
    %c4_119 = arith.constant 4 : index
    %c0_120 = arith.constant 0 : index
    %c0_121 = arith.constant 0 : index
    %159 = vector.load %arg12[%c4_119, %c0_120, %c0_121] : memref<9x128x256xbf16, #tpu.memory_space<vmem>>, vector<1x128x256xbf16>
    %160 = vector.shape_cast %159 : vector<1x128x256xbf16> to vector<128x256xbf16>
    %cst_122 = arith.constant dense<0.000000e+00> : vector<32x256xf32>
    %161 = tpu.matmul %158, %160, %cst_122 {dimension_numbers = #tpu.dot_dimension_numbers<[1], [0], [0], [1], [0, 0, 1, 1], [], []>} : vector<32x128xbf16>, vector<128x256xbf16>, vector<32x256xf32> -> vector<32x256xf32>
    %162 = arith.addf %154, %161 : vector<32x256xf32>
    %c5_123 = arith.constant 5 : index
    %c0_124 = arith.constant 0 : index
    %c0_125 = arith.constant 0 : index
    %163 = vector.load %arg11[%c5_123, %c0_124, %c0_125] : memref<9x32x32xbf16, #tpu.memory_space<vmem>>, vector<1x32x32xbf16>
    %164 = vector.shape_cast %163 : vector<1x32x32xbf16> to vector<32x32xbf16>
    %cst_126 = arith.constant dense<0.000000e+00> : vector<32x128xf32>
    %165 = tpu.matmul %164, %123, %cst_126 {dimension_numbers = #tpu.dot_dimension_numbers<[1], [0], [0], [1], [0, 0, 1, 1], [], []>} : vector<32x32xbf16>, vector<32x128xbf16>, vector<32x128xf32> -> vector<32x128xf32>
    %166 = arith.truncf %165 : vector<32x128xf32> to vector<32x128xbf16>
    %c5_127 = arith.constant 5 : index
    %c0_128 = arith.constant 0 : index
    %c0_129 = arith.constant 0 : index
    %167 = vector.load %arg12[%c5_127, %c0_128, %c0_129] : memref<9x128x256xbf16, #tpu.memory_space<vmem>>, vector<1x128x256xbf16>
    %168 = vector.shape_cast %167 : vector<1x128x256xbf16> to vector<128x256xbf16>
    %cst_130 = arith.constant dense<0.000000e+00> : vector<32x256xf32>
    %169 = tpu.matmul %166, %168, %cst_130 {dimension_numbers = #tpu.dot_dimension_numbers<[1], [0], [0], [1], [0, 0, 1, 1], [], []>} : vector<32x128xbf16>, vector<128x256xbf16>, vector<32x256xf32> -> vector<32x256xf32>
    %170 = arith.addf %162, %169 : vector<32x256xf32>
    %c6_131 = arith.constant 6 : index
    %c0_132 = arith.constant 0 : index
    %c0_133 = arith.constant 0 : index
    %171 = vector.load %arg11[%c6_131, %c0_132, %c0_133] : memref<9x32x32xbf16, #tpu.memory_space<vmem>>, vector<1x32x32xbf16>
    %172 = vector.shape_cast %171 : vector<1x32x32xbf16> to vector<32x32xbf16>
    %cst_134 = arith.constant dense<0.000000e+00> : vector<32x128xf32>
    %173 = tpu.matmul %172, %123, %cst_134 {dimension_numbers = #tpu.dot_dimension_numbers<[1], [0], [0], [1], [0, 0, 1, 1], [], []>} : vector<32x32xbf16>, vector<32x128xbf16>, vector<32x128xf32> -> vector<32x128xf32>
    %174 = arith.truncf %173 : vector<32x128xf32> to vector<32x128xbf16>
    %c6_135 = arith.constant 6 : index
    %c0_136 = arith.constant 0 : index
    %c0_137 = arith.constant 0 : index
    %175 = vector.load %arg12[%c6_135, %c0_136, %c0_137] : memref<9x128x256xbf16, #tpu.memory_space<vmem>>, vector<1x128x256xbf16>
    %176 = vector.shape_cast %175 : vector<1x128x256xbf16> to vector<128x256xbf16>
    %cst_138 = arith.constant dense<0.000000e+00> : vector<32x256xf32>
    %177 = tpu.matmul %174, %176, %cst_138 {dimension_numbers = #tpu.dot_dimension_numbers<[1], [0], [0], [1], [0, 0, 1, 1], [], []>} : vector<32x128xbf16>, vector<128x256xbf16>, vector<32x256xf32> -> vector<32x256xf32>
    %178 = arith.addf %170, %177 : vector<32x256xf32>
    %c7_139 = arith.constant 7 : index
    %c0_140 = arith.constant 0 : index
    %c0_141 = arith.constant 0 : index
    %179 = vector.load %arg11[%c7_139, %c0_140, %c0_141] : memref<9x32x32xbf16, #tpu.memory_space<vmem>>, vector<1x32x32xbf16>
    %180 = vector.shape_cast %179 : vector<1x32x32xbf16> to vector<32x32xbf16>
    %cst_142 = arith.constant dense<0.000000e+00> : vector<32x128xf32>
    %181 = tpu.matmul %180, %123, %cst_142 {dimension_numbers = #tpu.dot_dimension_numbers<[1], [0], [0], [1], [0, 0, 1, 1], [], []>} : vector<32x32xbf16>, vector<32x128xbf16>, vector<32x128xf32> -> vector<32x128xf32>
    %182 = arith.truncf %181 : vector<32x128xf32> to vector<32x128xbf16>
    %c7_143 = arith.constant 7 : index
    %c0_144 = arith.constant 0 : index
    %c0_145 = arith.constant 0 : index
    %183 = vector.load %arg12[%c7_143, %c0_144, %c0_145] : memref<9x128x256xbf16, #tpu.memory_space<vmem>>, vector<1x128x256xbf16>
    %184 = vector.shape_cast %183 : vector<1x128x256xbf16> to vector<128x256xbf16>
    %cst_146 = arith.constant dense<0.000000e+00> : vector<32x256xf32>
    %185 = tpu.matmul %182, %184, %cst_146 {dimension_numbers = #tpu.dot_dimension_numbers<[1], [0], [0], [1], [0, 0, 1, 1], [], []>} : vector<32x128xbf16>, vector<128x256xbf16>, vector<32x256xf32> -> vector<32x256xf32>
    %186 = arith.addf %178, %185 : vector<32x256xf32>
    %c8_147 = arith.constant 8 : index
    %c0_148 = arith.constant 0 : index
    %c0_149 = arith.constant 0 : index
    %187 = vector.load %arg11[%c8_147, %c0_148, %c0_149] : memref<9x32x32xbf16, #tpu.memory_space<vmem>>, vector<1x32x32xbf16>
    %188 = vector.shape_cast %187 : vector<1x32x32xbf16> to vector<32x32xbf16>
    %cst_150 = arith.constant dense<0.000000e+00> : vector<32x128xf32>
    %189 = tpu.matmul %188, %123, %cst_150 {dimension_numbers = #tpu.dot_dimension_numbers<[1], [0], [0], [1], [0, 0, 1, 1], [], []>} : vector<32x32xbf16>, vector<32x128xbf16>, vector<32x128xf32> -> vector<32x128xf32>
    %190 = arith.truncf %189 : vector<32x128xf32> to vector<32x128xbf16>
    %c8_151 = arith.constant 8 : index
    %c0_152 = arith.constant 0 : index
    %c0_153 = arith.constant 0 : index
    %191 = vector.load %arg12[%c8_151, %c0_152, %c0_153] : memref<9x128x256xbf16, #tpu.memory_space<vmem>>, vector<1x128x256xbf16>
    %192 = vector.shape_cast %191 : vector<1x128x256xbf16> to vector<128x256xbf16>
    %cst_154 = arith.constant dense<0.000000e+00> : vector<32x256xf32>
    %193 = tpu.matmul %190, %192, %cst_154 {dimension_numbers = #tpu.dot_dimension_numbers<[1], [0], [0], [1], [0, 0, 1, 1], [], []>} : vector<32x128xbf16>, vector<128x256xbf16>, vector<32x256xf32> -> vector<32x256xf32>
    %194 = arith.addf %186, %193 : vector<32x256xf32>
    %195 = vector.extract_strided_slice %194 {offsets = [0, 0], sizes = [8, 256], strides = [1, 1]} : vector<32x256xf32> to vector<8x256xf32>
    %196 = vector.extract_strided_slice %194 {offsets = [8, 0], sizes = [8, 256], strides = [1, 1]} : vector<32x256xf32> to vector<8x256xf32>
    %197 = arith.maximumf %195, %196 : vector<8x256xf32>
    %198 = vector.extract_strided_slice %194 {offsets = [16, 0], sizes = [8, 256], strides = [1, 1]} : vector<32x256xf32> to vector<8x256xf32>
    %199 = vector.extract_strided_slice %194 {offsets = [24, 0], sizes = [8, 256], strides = [1, 1]} : vector<32x256xf32> to vector<8x256xf32>
    %200 = arith.maximumf %198, %199 : vector<8x256xf32>
    %201 = arith.maximumf %197, %200 : vector<8x256xf32>
    %202 = vector.extract_strided_slice %201 {offsets = [0, 0], sizes = [8, 128], strides = [1, 1]} : vector<8x256xf32> to vector<8x128xf32>
    %203 = vector.extract_strided_slice %201 {offsets = [0, 128], sizes = [8, 128], strides = [1, 1]} : vector<8x256xf32> to vector<8x128xf32>
    %204 = arith.maximumf %202, %203 : vector<8x128xf32>
    %c0_155 = arith.constant 0 : index
    %c0_156 = arith.constant 0 : index
    %205 = vector.load %arg13[%c0_155, %c0_156] : memref<1x128xf32, #tpu.memory_space<vmem>>, vector<1x128xf32>
    %206 = vector.broadcast %205 : vector<1x128xf32> to vector<8x128xf32>
    %207 = arith.addf %204, %206 : vector<8x128xf32>
    %cst_157 = arith.constant 0.000000e+00 : f32
    %208 = vector.broadcast %cst_157 : f32 to vector<8x128xf32>
    %209 = arith.cmpf oge, %207, %208 : vector<8x128xf32>
    %cst_158 = arith.constant 0.00999999977 : f32
    %210 = vector.broadcast %cst_158 : f32 to vector<8x128xf32>
    %211 = arith.mulf %210, %207 : vector<8x128xf32>
    %212 = arith.select %209, %207, %211 : vector<8x128xi1>, vector<8x128xf32>
    %c0_159 = arith.constant 0 : index
    %c0_160 = arith.constant 0 : index
    %213 = vector.load %arg14[%c0_159, %c0_160] : memref<1x128xf32, #tpu.memory_space<vmem>>, vector<1x128xf32>
    %214 = vector.broadcast %213 : vector<1x128xf32> to vector<8x128xf32>
    %215 = arith.mulf %212, %214 : vector<8x128xf32>
    %c0_161 = arith.constant 0 : index
    %c0_162 = arith.constant 0 : index
    %216 = vector.load %arg15[%c0_161, %c0_162] : memref<1x128xf32, #tpu.memory_space<vmem>>, vector<1x128xf32>
    %217 = vector.broadcast %216 : vector<1x128xf32> to vector<8x128xf32>
    %218 = arith.addf %215, %217 : vector<8x128xf32>
    %219 = vector.extract_strided_slice %218 {offsets = [0, 0], sizes = [8, 64], strides = [1, 1]} : vector<8x128xf32> to vector<8x64xf32>
    %220 = vector.extract_strided_slice %218 {offsets = [0, 64], sizes = [8, 64], strides = [1, 1]} : vector<8x128xf32> to vector<8x64xf32>
    %221 = arith.addf %219, %220 : vector<8x64xf32>
    %c0_163 = arith.constant 0 : index
    %c0_164 = arith.constant 0 : index
    %222 = vector.load %arg16[%c0_163, %c0_164] : memref<2x8xf32, #tpu.memory_space<vmem>>, vector<2x8xf32>
    %cst_165 = arith.constant dense<0.000000e+00> : vector<2x64xf32>
    %223 = tpu.matmul %222, %221, %cst_165 {dimension_numbers = #tpu.dot_dimension_numbers<[1], [0], [0], [1], [0, 0, 1, 1], [], []>} : vector<2x8xf32>, vector<8x64xf32>, vector<2x64xf32> -> vector<2x64xf32>
    %c0_166 = arith.constant 0 : index
    %c0_167 = arith.constant 0 : index
    %224 = vector.load %arg17[%c0_166, %c0_167] : memref<64x128xf32, #tpu.memory_space<vmem>>, vector<64x128xf32>
    %cst_168 = arith.constant dense<0.000000e+00> : vector<2x128xf32>
    %225 = tpu.matmul %223, %224, %cst_168 {dimension_numbers = #tpu.dot_dimension_numbers<[1], [0], [0], [1], [0, 0, 1, 1], [], []>} : vector<2x64xf32>, vector<64x128xf32>, vector<2x128xf32> -> vector<2x128xf32>
    %c0_169 = arith.constant 0 : index
    %c0_170 = arith.constant 0 : index
    %226 = vector.load %arg18[%c0_169, %c0_170] : memref<1x128xf32, #tpu.memory_space<vmem>>, vector<1x128xf32>
    %227 = vector.broadcast %226 : vector<1x128xf32> to vector<2x128xf32>
    %228 = arith.addf %225, %227 : vector<2x128xf32>
    %cst_171 = arith.constant 0.000000e+00 : f32
    %229 = vector.broadcast %cst_171 : f32 to vector<2x128xf32>
    %230 = arith.cmpf oge, %228, %229 : vector<2x128xf32>
    %cst_172 = arith.constant 0.00999999977 : f32
    %231 = vector.broadcast %cst_172 : f32 to vector<2x128xf32>
    %232 = arith.mulf %231, %228 : vector<2x128xf32>
    %233 = arith.select %230, %228, %232 : vector<2x128xi1>, vector<2x128xf32>
    %c0_173 = arith.constant 0 : index
    %c0_174 = arith.constant 0 : index
    %234 = vector.load %arg19[%c0_173, %c0_174] : memref<1x128xf32, #tpu.memory_space<vmem>>, vector<1x128xf32>
    %235 = vector.broadcast %234 : vector<1x128xf32> to vector<2x128xf32>
    %236 = arith.mulf %233, %235 : vector<2x128xf32>
    %c0_175 = arith.constant 0 : index
    %c0_176 = arith.constant 0 : index
    %237 = vector.load %arg20[%c0_175, %c0_176] : memref<1x128xf32, #tpu.memory_space<vmem>>, vector<1x128xf32>
    %238 = vector.broadcast %237 : vector<1x128xf32> to vector<2x128xf32>
    %239 = arith.addf %236, %238 : vector<2x128xf32>
    %c0_177 = arith.constant 0 : index
    %c0_178 = arith.constant 0 : index
    %240 = vector.load %arg21[%c0_177, %c0_178] : memref<128x1xf32, #tpu.memory_space<vmem>>, vector<128x1xf32>
    %cst_179 = arith.constant dense<0.000000e+00> : vector<2x1xf32>
    %241 = tpu.matmul %239, %240, %cst_179 {dimension_numbers = #tpu.dot_dimension_numbers<[1], [0], [0], [1], [0, 0, 1, 1], [], []>} : vector<2x128xf32>, vector<128x1xf32>, vector<2x1xf32> -> vector<2x1xf32>
    %c0_180 = arith.constant 0 : index
    %c0_181 = arith.constant 0 : index
    %242 = vector.load %arg22[%c0_180, %c0_181] : memref<1x1xf32, #tpu.memory_space<vmem>>, vector<1x1xf32>
    %243 = vector.broadcast %242 : vector<1x1xf32> to vector<2x1xf32>
    %244 = arith.addf %241, %243 : vector<2x1xf32>
    %c0_182 = arith.constant 0 : index
    %c0_183 = arith.constant 0 : index
    %245 = vector.load %arg23[%c0_182, %c0_183] : memref<2x1xf32, #tpu.memory_space<vmem>>, vector<2x1xf32>
    tpu.vector_store %arg23[%c0_182, %c0_183], %244 {strides = array<i32>} : memref<2x1xf32, #tpu.memory_space<vmem>>, vector<2x1xf32>,
    return
  }
  func.func @transform_0(%arg0: i32) -> (i32, i32) {
    %c0_i32 = arith.constant 0 : i32
    %c0_i32_0 = arith.constant 0 : i32
    %c0_i32_1 = arith.constant 0 : i32
    return %c0_i32, %c0_i32_0 : i32, i32
  }
  func.func @transform_1(%arg0: i32) -> (i32, i32) {
    %c0_i32 = arith.constant 0 : i32
    %c0_i32_0 = arith.constant 0 : i32
    %c0_i32_1 = arith.constant 0 : i32
    return %c0_i32, %c0_i32_0 : i32, i32
  }
  func.func @transform_2(%arg0: i32) -> (i32, i32) {
    %c0_i32 = arith.constant 0 : i32
    %c0_i32_0 = arith.constant 0 : i32
    %c0_i32_1 = arith.constant 0 : i32
    return %c0_i32, %c0_i32_0 : i32, i32
  }
  func.func @transform_3(%arg0: i32) -> (i32, i32) {
    %c0_i32 = arith.constant 0 : i32
    %c0_i32_0 = arith.constant 0 : i32
    %c0_i32_1 = arith.constant 0 : i32
    return %c0_i32, %c0_i32_0 : i32, i32
  }
  func.func @transform_4(%arg0: i32) -> (i32, i32) {
    %c0_i32 = arith.constant 0 : i32
    %c0_i32_0 = arith.constant 0 : i32
    %c0_i32_1 = arith.constant 0 : i32
    return %c0_i32, %c0_i32_0 : i32, i32
  }
  func.func @transform_5(%arg0: i32) -> (i32, i32, i32) {
    %c0_i32 = arith.constant 0 : i32
    %c0_i32_0 = arith.constant 0 : i32
    %c0_i32_1 = arith.constant 0 : i32
    %c0_i32_2 = arith.constant 0 : i32
    return %c0_i32, %c0_i32_0, %c0_i32_1 : i32, i32, i32
  }
  func.func @transform_6(%arg0: i32) -> (i32, i32, i32) {
    %c0_i32 = arith.constant 0 : i32
    %c0_i32_0 = arith.constant 0 : i32
    %c0_i32_1 = arith.constant 0 : i32
    %c0_i32_2 = arith.constant 0 : i32
    return %c0_i32, %c0_i32_0, %c0_i32_1 : i32, i32, i32
  }
  func.func @transform_7(%arg0: i32) -> (i32, i32) {
    %c0_i32 = arith.constant 0 : i32
    %c0_i32_0 = arith.constant 0 : i32
    %c0_i32_1 = arith.constant 0 : i32
    return %c0_i32, %c0_i32_0 : i32, i32
  }
  func.func @transform_8(%arg0: i32) -> (i32, i32) {
    %c0_i32 = arith.constant 0 : i32
    %c0_i32_0 = arith.constant 0 : i32
    %c0_i32_1 = arith.constant 0 : i32
    return %c0_i32, %c0_i32_0 : i32, i32
  }
  func.func @transform_9(%arg0: i32) -> (i32, i32) {
    %c0_i32 = arith.constant 0 : i32
    %c0_i32_0 = arith.constant 0 : i32
    %c0_i32_1 = arith.constant 0 : i32
    return %c0_i32, %c0_i32_0 : i32, i32
  }
  func.func @transform_10(%arg0: i32) -> (i32, i32, i32) {
    %c0_i32 = arith.constant 0 : i32
    %c0_i32_0 = arith.constant 0 : i32
    %c0_i32_1 = arith.constant 0 : i32
    %c0_i32_2 = arith.constant 0 : i32
    return %c0_i32, %c0_i32_0, %c0_i32_1 : i32, i32, i32
  }
  func.func @transform_11(%arg0: i32) -> (i32, i32, i32) {
    %c0_i32 = arith.constant 0 : i32
    %c0_i32_0 = arith.constant 0 : i32
    %c0_i32_1 = arith.constant 0 : i32
    %c0_i32_2 = arith.constant 0 : i32
    return %c0_i32, %c0_i32_0, %c0_i32_1 : i32, i32, i32
  }
  func.func @transform_12(%arg0: i32) -> (i32, i32) {
    %c0_i32 = arith.constant 0 : i32
    %c0_i32_0 = arith.constant 0 : i32
    %c0_i32_1 = arith.constant 0 : i32
    return %c0_i32, %c0_i32_0 : i32, i32
  }
  func.func @transform_13(%arg0: i32) -> (i32, i32) {
    %c0_i32 = arith.constant 0 : i32
    %c0_i32_0 = arith.constant 0 : i32
    %c0_i32_1 = arith.constant 0 : i32
    return %c0_i32, %c0_i32_0 : i32, i32
  }
  func.func @transform_14(%arg0: i32) -> (i32, i32) {
    %c0_i32 = arith.constant 0 : i32
    %c0_i32_0 = arith.constant 0 : i32
    %c0_i32_1 = arith.constant 0 : i32
    return %c0_i32, %c0_i32_0 : i32, i32
  }
  func.func @transform_15(%arg0: i32) -> (i32, i32) {
    %c0_i32 = arith.constant 0 : i32
    %c0_i32_0 = arith.constant 0 : i32
    %c0_i32_1 = arith.constant 0 : i32
    return %c0_i32, %c0_i32_0 : i32, i32
  }
  func.func @transform_16(%arg0: i32) -> (i32, i32) {
    %c0_i32 = arith.constant 0 : i32
    %c0_i32_0 = arith.constant 0 : i32
    %c0_i32_1 = arith.constant 0 : i32
    return %c0_i32, %c0_i32_0 : i32, i32
  }
  func.func @transform_17(%arg0: i32) -> (i32, i32) {
    %c0_i32 = arith.constant 0 : i32
    %c0_i32_0 = arith.constant 0 : i32
    %c0_i32_1 = arith.constant 0 : i32
    return %c0_i32, %c0_i32_0 : i32, i32
  }
  func.func @transform_18(%arg0: i32) -> (i32, i32) {
    %c0_i32 = arith.constant 0 : i32
    %c0_i32_0 = arith.constant 0 : i32
    %c0_i32_1 = arith.constant 0 : i32
    return %c0_i32, %c0_i32_0 : i32, i32
  }
  func.func @transform_19(%arg0: i32) -> (i32, i32) {
    %c0_i32 = arith.constant 0 : i32
    %c0_i32_0 = arith.constant 0 : i32
    %c0_i32_1 = arith.constant 0 : i32
    return %c0_i32, %c0_i32_0 : i32, i32
  }
  func.func @transform_20(%arg0: i32) -> (i32, i32) {
    %c0_i32 = arith.constant 0 : i32
    %c0_i32_0 = arith.constant 0 : i32
    %c0_i32_1 = arith.constant 0 : i32
    return %c0_i32, %c0_i32_0 : i32, i32
  }
  func.func @transform_21(%arg0: i32) -> (i32, i32) {
    %c0_i32 = arith.constant 0 : i32
    %c0_i32_0 = arith.constant 0 : i32
    %c0_i32_1 = arith.constant 0 : i32
    return %c0_i32, %c0_i32_0 : i32, i32
  }
  func.func @transform_22(%arg0: i32) -> (i32, i32) {
    %c0_i32 = arith.constant 0 : i32
    %c0_i32_0 = arith.constant 0 : i32
    %c0_i32_1 = arith.constant 0 : i32
    return %c0_i32, %c0_i32_0 : i32, i32
  }
}

</mosaic_0001>

<bundles_post_ra>
// kernel: forward.1
= control target key start
LH: loop header
LB: loop body
LE: loop exit
PB: predicated region body
PF: predicated region fallthrough
CT: control target
= control target key end

     0   :  { %v13933_v55 = vmov 0   ;;  %vm898_vm0 = vcmask 261120   ;;  %s13906_s1 = inlined_call_operand.vmem [shape: bf16[288,256], index: 1, kind: input, shape index: {}]   ;;  %s13907_s0 = inlined_call_operand.vmem [shape: bf16[512,288], index: 0, kind: input, shape index: {}]   ;;  %s13908_s5 = inlined_call_operand.vmem [shape: bf16[9,128,128], index: 5, kind: input, shape index: {}]   ;;  %s13909_s2 = inlined_call_operand.vmem [shape: f32[1,128], index: 2, kind: input, shape index: {}]   ;;  %s13910_s3 = inlined_call_operand.vmem [shape: f32[1,128], index: 3, kind: input, shape index: {}]   ;;  %s13911_s4 = inlined_call_operand.vmem [shape: f32[1,128], index: 4, kind: input, shape index: {}]   ;;  %s13912_s6 = inlined_call_operand.vmem [shape: bf16[9,128,256], index: 6, kind: input, shape index: {}]   ;;  %s13913_s10 = inlined_call_operand.vmem [shape: bf16[9,32,32], index: 10, kind: input, shape index: {}]   ;;  %s13914_s11 = inlined_call_operand.vmem [shape: bf16[9,128,256], index: 11, kind: input, shape index: {}]   ;;  %s13915_s7 = inlined_call_operand.vmem [shape: f32[1,128], index: 7, kind: input, shape index: {}]   ;;  %s13916_s8 = inlined_call_operand.vmem [shape: f32[1,128], index: 8, kind: input, shape index: {}]   ;;  %s13917_s9 = inlined_call_operand.vmem [shape: f32[1,128], index: 9, kind: input, shape index: {}]   ;;  %s13918_s12 = inlined_call_operand.vmem [shape: f32[1,128], index: 12, kind: input, shape index: {}]   ;;  %s13919_s13 = inlined_call_operand.vmem [shape: f32[1,128], index: 13, kind: input, shape index: {}]   ;;  %s13920_s14 = inlined_call_operand.vmem [shape: f32[1,128], index: 14, kind: input, shape index: {}]   ;;  %s13921_s16 = inlined_call_operand.vmem [shape: f32[64,128], index: 16, kind: input, shape index: {}]   ;;  %s13922_s15 = inlined_call_operand.vmem [shape: f32[2,8], index: 15, kind: input, shape index: {}]   ;;  %s13923_s20 = inlined_call_operand.vmem [shape: f32[128,1], index: 20, kind: input, shape index: {}]   ;;  %s13924_s21 = inlined_call_operand.<no memory space> [shape: f32[1,1], index: 21, kind: input, shape index: {}]   ;;  %s13925_s17 = inlined_call_operand.vmem [shape: f32[1,128], index: 17, kind: input, shape index: {}]   ;;  %s13926_s18 = inlined_call_operand.vmem [shape: f32[1,128], index: 18, kind: input, shape index: {}]   ;;  %s13927_s19 = inlined_call_operand.vmem [shape: f32[1,128], index: 19, kind: input, shape index: {}]   ;;  %s13928_s22 = inlined_call_operand.vmem [shape: f32[2,1], index: 22, kind: output, shape index: {}]  }
   0x1   :  { %13961 = sst [smem:[#allocation47_spill]] %s13906_s1  ;;  %1630 = vmatprep.mubr.bf16.mxu1 %v13933_v55 }
   0x2   :  { %13962 = sst [smem:[#allocation48_spill]] %s13907_s0  ;;  %s13968_s29 = sld [smem:[#allocation47_spill]] }
   0x3   :  { %13963 = sst [smem:[#allocation49_spill]] %s13908_s5 }
   0x4   :  { %13964 = sst [smem:[#allocation50_spill]] %s13909_s2  ;;  %s13969_s2 = sld [smem:[#allocation48_spill]] }
   0x5   :  { %13965 = sst [smem:[#allocation51_spill]] %s13910_s3  ;;  %s14007_s1 = sld [smem:[#allocation49_spill]] }
   0x6   :  { %13966 = sst [smem:[#allocation52_spill]] %s13911_s4  ;;  %s14020_s5 = sld [smem:[#allocation51_spill]] }
   0x7   :  { %13967 = sst [smem:[#allocation53_spill]] %s13912_s6  ;;  %s14017_s6 = sld [smem:[#allocation50_spill]] }
   0x8   :  { %v10139_v0 = vld [vmem:[%s13968_s29 + $0x4] ss:$8 sps:$4 sm:$0xff]   ;;  %v10141_v1 = vld [vmem:[%s13968_s29] ss:$8 sps:$4 sm:$0xff]   ;;  %v10142_v2 = vld [vmem:[%s13968_s29 + $0x14] ss:$8 sps:$4 sm:$0xff]  }
   0x9   :  { %995 = vmatprep.subr.bf16.mxu0 %v10139_v0  ;;  %v10144_v3 = vld [vmem:[%s13968_s29 + $0x10] ss:$8 sps:$4 sm:$0xff]   ;;  %v10145_v4 = vld [vmem:[%s13968_s29 + $0x24] ss:$8 sps:$4 sm:$0xff]   ;;  %v10147_v5 = vld [vmem:[%s13968_s29 + $0x20] ss:$8 sps:$4 sm:$0xff]  }
   0xa   :  { %996 = vmatpush1.bf16.msra.mxu0 %v10141_v1  ;;  %v10148_v6 = vld [vmem:[%s13968_s29 + $0x34] ss:$8 sps:$4 sm:$0xff]   ;;  %v10150_v7 = vld [vmem:[%s13968_s29 + $0x30] ss:$8 sps:$4 sm:$0xff]   ;;  %v10151_v8 = vld [vmem:[%s13968_s29 + $0x44] ss:$8 sps:$4 sm:$0xff]  }
   0xb   :  { %997 = vmatprep.subr.bf16.mxu0 %v10142_v2  ;;  %v10153_v9 = vld [vmem:[%s13968_s29 + $0x40] ss:$8 sps:$4 sm:$0xff]   ;;  %v10154_v10 = vld [vmem:[%s13968_s29 + $0x54] ss:$8 sps:$4 sm:$0xff]   ;;  %v10156_v11 = vld [vmem:[%s13968_s29 + $0x50] ss:$8 sps:$4 sm:$0xff]  }
   0xc   :  { %v10157_v12 = vld [vmem:[%s13968_s29 + $0x64] ss:$8 sps:$4 sm:$0xff]   ;;  %v10159_v14 = vld [vmem:[%s13968_s29 + $0x60] ss:$8 sps:$4 sm:$0xff]   ;;  %v10160_v15 = vld [vmem:[%s13968_s29 + $0x74] ss:$8 sps:$4 sm:$0xff]  }
   0xd   :  { %v10189_v13 = vld [vmem:[%s13969_s2 + $0x4] ss:$12 sps:$4 sm:$0xff]   ;;  %v10199_v17 = vld [vmem:[%s13968_s29 + $0x100] ss:$8 sps:$4 sm:$0xff]   ;;  %v10166_v21 = vld [vmem:[%s13968_s29 + $0x94] ss:$8 sps:$4 sm:$0xff]  }
   0xe   :  { %998 = vmatpush1.bf16.msra.mxu0 %v10144_v3  ;;  %1027 = vmatprep.mubr.bf16.mxu0 %v10189_v13  ;;  %v10162_v16 = vld [vmem:[%s13968_s29 + $0x70] ss:$8 sps:$4 sm:$0xff]   ;;  %v10201_v18 = vld [vmem:[%s13968_s29 + $0x104] ss:$8 sps:$4 sm:$0xff]   ;;  %v10165_v20 = vld [vmem:[%s13968_s29 + $0x80] ss:$8 sps:$4 sm:$0xff]  }
   0xf   :  { %999 = vmatprep.subr.bf16.mxu0 %v10145_v4  ;;  %v10163_v19 = vld [vmem:[%s13968_s29 + $0x84] ss:$8 sps:$4 sm:$0xff]   ;;  %9682 = vmatprep.subr.bf16.mxu1 %v10201_v18  ;;  %v10168_v22 = vld [vmem:[%s13968_s29 + $0x90] ss:$8 sps:$4 sm:$0xff]   ;;  %v10171_v24 = vld [vmem:[%s13968_s29 + $0xa0] ss:$8 sps:$4 sm:$0xff]  }
  0x10   :  { %9684 = vmatpush1.bf16.msra.mxu1 %v10199_v17  ;;  %v10169_v23 = vld [vmem:[%s13968_s29 + $0xa4] ss:$8 sps:$4 sm:$0xff]   ;;  %v10172_v25 = vld [vmem:[%s13968_s29 + $0xb4] ss:$8 sps:$4 sm:$0xff]   ;;  %v10174_v26 = vld [vmem:[%s13968_s29 + $0xb0] ss:$8 sps:$4 sm:$0xff]  }
  0x11   :  { %v10175_v27 = vld [vmem:[%s13968_s29 + $0xc4] ss:$8 sps:$4 sm:$0xff]   ;;  %v10177_v28 = vld [vmem:[%s13968_s29 + $0xc0] ss:$8 sps:$4 sm:$0xff]   ;;  %v10178_v29 = vld [vmem:[%s13968_s29 + $0xd4] ss:$8 sps:$4 sm:$0xff]  }
  0x12   :  { %1000 = vmatpush1.bf16.msra.mxu0 %v10147_v5  ;;  %v10180_v30 = vld [vmem:[%s13968_s29 + $0xd0] ss:$8 sps:$4 sm:$0xff]   ;;  %v10181_v31 = vld [vmem:[%s13968_s29 + $0xe4] ss:$8 sps:$4 sm:$0xff]   ;;  %v10183_v32 = vld [vmem:[%s13968_s29 + $0xe0] ss:$8 sps:$4 sm:$0xff]  }
  0x13   :  { %1001 = vmatprep.subr.bf16.mxu0 %v10148_v6  ;;  %v10184_v33 = vld [vmem:[%s13968_s29 + $0xf4] ss:$8 sps:$4 sm:$0xff]   ;;  %v10186_v34 = vld [vmem:[%s13968_s29 + $0xf0] ss:$8 sps:$4 sm:$0xff]   ;;  %v10187_v35 = vld [vmem:[%s13969_s2] ss:$12 sps:$4 sm:$0xff]  }
  0x14   :  { %v10190_v36 = vld [vmem:[%s13969_s2 + $0x1c] ss:$12 sps:$4 sm:$0xff]   ;;  %v10192_v37 = vld [vmem:[%s13969_s2 + $0x18] ss:$12 sps:$4 sm:$0xff]   ;;  %v10193_v38 = vld [vmem:[%s13969_s2 + $0x34] ss:$12 sps:$4 sm:$0xff]  }
  0x15   :  { %v10195_v39 = vld [vmem:[%s13969_s2 + $0x30] ss:$12 sps:$4 sm:$0xff]   ;;  %v10196_v40 = vld [vmem:[%s13969_s2 + $0x4c] ss:$12 sps:$4 sm:$0xff]   ;;  %v10198_v41 = vld [vmem:[%s13969_s2 + $0x48] ss:$12 sps:$4 sm:$0xff]  }
  0x16   :  { %1002 = vmatpush1.bf16.msra.mxu0 %v10150_v7  ;;  %v10202_v42 = vld [vmem:[%s13969_s2 + $0x64] ss:$12 sps:$4 sm:$0xff]   ;;  %v10252_v44 = vld [vmem:[%s13968_s29 + $0x114] ss:$8 sps:$4 sm:$0xff]   ;;  %v10204_v45 = vld [vmem:[%s13969_s2 + $0x60] ss:$12 sps:$4 sm:$0xff]  }
  0x17   :  { %1003 = vmatprep.subr.bf16.mxu0 %v10151_v8  ;;  %v10250_v43 = vld [vmem:[%s13968_s29 + $0x110] ss:$8 sps:$4 sm:$0xff]   ;;  %9683 = vmatprep.subr.bf16.mxu1 %v10252_v44  ;;  %v10205_v46 = vld [vmem:[%s13969_s2 + $0x7c] ss:$12 sps:$4 sm:$0xff]   ;;  %v10208_v48 = vld [vmem:[%s13969_s2 + $0x94] ss:$12 sps:$4 sm:$0xff]  }
  0x18   :  { %9685 = vmatpush1.bf16.msra.mxu1 %v10250_v43  ;;  %v10207_v47 = vld [vmem:[%s13969_s2 + $0x78] ss:$12 sps:$4 sm:$0xff]   ;;  %v10210_v49 = vld [vmem:[%s13969_s2 + $0x90] ss:$12 sps:$4 sm:$0xff]   ;;  %v10213_v51 = vld [vmem:[%s13969_s2 + $0xa8] ss:$12 sps:$4 sm:$0xff]  }
  0x19   :  { %v10211_v50 = vld [vmem:[%s13969_s2 + $0xac] ss:$12 sps:$4 sm:$0xff]   ;;  %v10214_v52 = vld [vmem:[%s13969_s2 + $0xc4] ss:$12 sps:$4 sm:$0xff]   ;;  %v10217_v54 = vld [vmem:[%s13969_s2 + $0xdc] ss:$12 sps:$4 sm:$0xff]  }
  0x1a   :  { %1004 = vmatpush1.bf16.msra.mxu0 %v10153_v9  ;;  %v10216_v53 = vld [vmem:[%s13969_s2 + $0xc0] ss:$12 sps:$4 sm:$0xff]   ;;  %v10219_v56 = vld [vmem:[%s13969_s2 + $0xd8] ss:$12 sps:$4 sm:$0xff]   ;;  %v10222_v59 = vld [vmem:[%s13969_s2 + $0xf0] ss:$12 sps:$4 sm:$0xff]  }
  0x1b   :  { %1005 = vmatprep.subr.bf16.mxu0 %v10154_v10  ;;  %v10220_v57 = vld [vmem:[%s13969_s2 + $0xf4] ss:$12 sps:$4 sm:$0xff]   ;;  %v10223_v60 = vld [vmem:[%s13969_s2 + $0x10c] ss:$12 sps:$4 sm:$0xff]   ;;  %v10226_v63 = vld [vmem:[%s13969_s2 + $0x124] ss:$12 sps:$4 sm:$0xff]  }
  0x1c   :  { %v10271_v58 = vld [vmem:[%s13969_s2 + $0x260] ss:$12 sps:$4 sm:$0xff]   ;;  %v10275_v61 = vld [vmem:[%s13969_s2 + $0x278] ss:$12 sps:$4 sm:$0xff]   ;;  %v10225_v62 = vld [vmem:[%s13969_s2 + $0x108] ss:$12 sps:$4 sm:$0xff]  }
  0x1d   :  { %8185 = vmatmul.mubr.msk.bf16.vlgmr.msra.gmra.mrb[0].mxu1 %vm898_vm0, %v10271_v58  ;;  %v10279_v0 = vld [vmem:[%s13969_s2 + $0x290] ss:$12 sps:$4 sm:$0xff]   ;;  %v10228_v1 = vld [vmem:[%s13969_s2 + $0x120] ss:$12 sps:$4 sm:$0xff]   ;;  %v10283_v3 = vld [vmem:[%s13969_s2 + $0x2a8] ss:$12 sps:$4 sm:$0xff]  }
  0x1e   :  { %1006 = vmatpush1.bf16.msra.mxu0 %v10156_v11  ;;  %1640 = vmatprep.mubr.bf16.mxu1 %v13933_v55  ;;  %v10229_v2 = vld [vmem:[%s13969_s2 + $0x13c] ss:$12 sps:$4 sm:$0xff]   ;;  %v10231_v4 = vld [vmem:[%s13969_s2 + $0x138] ss:$12 sps:$4 sm:$0xff]   ;;  %v10232_v5 = vld [vmem:[%s13969_s2 + $0x154] ss:$12 sps:$4 sm:$0xff]  }
  0x1f   :  { %1007 = vmatprep.subr.bf16.mxu0 %v10157_v12  ;;  %v10287_v6 = vld [vmem:[%s13969_s2 + $0x2c0] ss:$12 sps:$4 sm:$0xff]   ;;  %v10234_v7 = vld [vmem:[%s13969_s2 + $0x150] ss:$12 sps:$4 sm:$0xff]   ;;  %v10291_v9 = vld [vmem:[%s13969_s2 + $0x2d8] ss:$12 sps:$4 sm:$0xff]  }
  0x20   :  { %v10235_v8 = vld [vmem:[%s13969_s2 + $0x16c] ss:$12 sps:$4 sm:$0xff]   ;;  %v10237_v10 = vld [vmem:[%s13969_s2 + $0x168] ss:$12 sps:$4 sm:$0xff]   ;;  %v10238_v11 = vld [vmem:[%s13969_s2 + $0x184] ss:$12 sps:$4 sm:$0xff]  }
  0x21   :  { %v10295_v12 = vld [vmem:[%s13969_s2 + $0x2f0] ss:$12 sps:$4 sm:$0xff]   ;;  %v10240_v13 = vld [vmem:[%s13969_s2 + $0x180] ss:$12 sps:$4 sm:$0xff]   ;;  %s14023_s30 = sld [smem:[#allocation52_spill]]  ;;  %s14095_s25 = sld [smem:[#allocation53_spill]] }
  0x22   :  { %1008 = vmatpush1.bf16.msra.mxu0 %v10159_v14  ;;  %v10241_v14 = vld [vmem:[%s13969_s2 + $0x19c] ss:$12 sps:$4 sm:$0xff]  }
  0x23   :  { %1009 = vmatprep.subr.bf16.mxu0 %v10160_v15  ;;  %v10243_v15 = vld [vmem:[%s13969_s2 + $0x198] ss:$12 sps:$4 sm:$0xff]  }
  0x25   :  { %8186 = vmatmul.mubr.msk.bf16.gmra.mrb[4].mxu1 %vm898_vm0, %v10275_v61 }
  0x26   :  { %1010 = vmatpush1.bf16.msra.mxu0 %v10162_v16  ;;  %1650 = vmatprep.mubr.bf16.mxu1 %v13933_v55  ;;  %v10244_v16 = vld [vmem:[%s13969_s2 + $0x1b4] ss:$12 sps:$4 sm:$0xff]  }
  0x27   :  { %1011 = vmatprep.subr.bf16.mxu0 %v10163_v19  ;;  %v10249_v19 = vld [vmem:[%s13969_s2 + $0x1c8] ss:$12 sps:$4 sm:$0xff]  }
  0x2a   :  { %1012 = vmatpush1.bf16.msra.mxu0 %v10165_v20  ;;  %v10253_v20 = vld [vmem:[%s13969_s2 + $0x1e4] ss:$12 sps:$4 sm:$0xff]  }
  0x2b   :  { %1013 = vmatprep.subr.bf16.mxu0 %v10166_v21  ;;  %v10255_v21 = vld [vmem:[%s13969_s2 + $0x1e0] ss:$12 sps:$4 sm:$0xff]  }
  0x2d   :  { %8187 = vmatmul.mubr.msk.bf16.gmra.mrb[8].mxu1 %vm898_vm0, %v10279_v0 }
  0x2e   :  { %1014 = vmatpush1.bf16.msra.mxu0 %v10168_v22  ;;  %1660 = vmatprep.mubr.bf16.mxu1 %v13933_v55  ;;  %v10256_v22 = vld [vmem:[%s13969_s2 + $0x1fc] ss:$12 sps:$4 sm:$0xff]  }
  0x2f   :  { %1015 = vmatprep.subr.bf16.mxu0 %v10169_v23  ;;  %v10258_v23 = vld [vmem:[%s13969_s2 + $0x1f8] ss:$12 sps:$4 sm:$0xff]  }
  0x32   :  { %1016 = vmatpush1.bf16.msra.mxu0 %v10171_v24  ;;  %v10259_v24 = vld [vmem:[%s13969_s2 + $0x214] ss:$12 sps:$4 sm:$0xff]  }
  0x33   :  { %1017 = vmatprep.subr.bf16.mxu0 %v10172_v25  ;;  %v10261_v25 = vld [vmem:[%s13969_s2 + $0x210] ss:$12 sps:$4 sm:$0xff]  }
  0x35   :  { %8188 = vmatmul.mubr.msk.bf16.gmra.mrb[12].mxu1 %vm898_vm0, %v10283_v3 }
  0x36   :  { %1018 = vmatpush1.bf16.msra.mxu0 %v10174_v26  ;;  %1670 = vmatprep.mubr.bf16.mxu1 %v13933_v55  ;;  %v10262_v26 = vld [vmem:[%s13969_s2 + $0x22c] ss:$12 sps:$4 sm:$0xff]  }
  0x37   :  { %1019 = vmatprep.subr.bf16.mxu0 %v10175_v27  ;;  %v10264_v27 = vld [vmem:[%s13969_s2 + $0x228] ss:$12 sps:$4 sm:$0xff]  }
  0x3a   :  { %1020 = vmatpush1.bf16.msra.mxu0 %v10177_v28  ;;  %v10265_v28 = vld [vmem:[%s13969_s2 + $0x244] ss:$12 sps:$4 sm:$0xff]  }
  0x3b   :  { %1021 = vmatprep.subr.bf16.mxu0 %v10178_v29  ;;  %v10267_v29 = vld [vmem:[%s13969_s2 + $0x240] ss:$12 sps:$4 sm:$0xff]  }
  0x3d   :  { %8189 = vmatmul.mubr.msk.bf16.gmra.mrb[16].mxu1 %vm898_vm0, %v10287_v6  ;;  %v10304_v6 = vld [vmem:[%s13969_s2 + $0xc8] ss:$12 sps:$4 sm:$0xff]  }
  0x3e   :  { %1022 = vmatpush1.bf16.msra.mxu0 %v10180_v30  ;;  %1680 = vmatprep.mubr.bf16.mxu1 %v13933_v55  ;;  %v10268_v30 = vld [vmem:[%s13969_s2 + $0x25c] ss:$12 sps:$4 sm:$0xff]  }
  0x3f   :  { %1023 = vmatprep.subr.bf16.mxu0 %v10181_v31  ;;  %v10270_v31 = vld [vmem:[%s13969_s2 + $0x258] ss:$12 sps:$4 sm:$0xff]  }
  0x42   :  { %1024 = vmatpush1.bf16.msra.mxu0 %v10183_v32  ;;  %v10272_v32 = vld [vmem:[%s13969_s2 + $0x274] ss:$12 sps:$4 sm:$0xff]  }
  0x43   :  { %1025 = vmatprep.subr.bf16.mxu0 %v10184_v33  ;;  %v10274_v33 = vld [vmem:[%s13969_s2 + $0x270] ss:$12 sps:$4 sm:$0xff]  }
  0x45   :  { %8190 = vmatmul.mubr.msk.bf16.gmra.mrb[20].mxu1 %vm898_vm0, %v10291_v9 }
  0x46   :  { %1026 = vmatpush1.bf16.msra.mxu0 %v10186_v34  ;;  %1690 = vmatprep.mubr.bf16.mxu1 %v13933_v55  ;;  %v10276_v34 = vld [vmem:[%s13969_s2 + $0x28c] ss:$12 sps:$4 sm:$0xff]  }
  0x47   :  { %1348 = vmatprep.subr.bf16.mxu0 %v10201_v18  ;;  %v10247_v18 = vld [vmem:[%s13969_s2 + $0x1cc] ss:$12 sps:$4 sm:$0xff]  }
  0x49   :  { %1028 = vmatmul.mubr.bf16.vlgmr.msra.gmra.mrb[0].mxu0 %v10187_v35  ;;  %v10278_v35 = vld [vmem:[%s13969_s2 + $0x288] ss:$12 sps:$4 sm:$0xff]  }
  0x4a   :  { %1037 = vmatprep.mubr.bf16.mxu0 %v10190_v36  ;;  %1349 = vmatpush1.bf16.msra.mxu0 %v10199_v17  ;;  %v10246_v17 = vld [vmem:[%s13969_s2 + $0x1b0] ss:$12 sps:$4 sm:$0xff]  }
  0x4b   :  { %1350 = vmatprep.subr.bf16.mxu0 %v10252_v44  ;;  %v10280_v36 = vld [vmem:[%s13969_s2 + $0x2a4] ss:$12 sps:$4 sm:$0xff]   ;;  %v10296_v44 = vld [vmem:[%s13969_s2 + $0x8] ss:$12 sps:$4 sm:$0xff]  }
  0x4d   :  { %8191 = vmatmul.mubr.msk.bf16.gmra.mrb[24].mxu1 %vm898_vm0, %v10295_v12 }
  0x4e   :  { %1351 = vmatpush1.bf16.msra.mxu0 %v10250_v43  ;;  %v10294_v43 = vld [vmem:[%s13969_s2 + $0x2e8] ss:$12 sps:$4 sm:$0xff]  }
  0x51   :  { %1038 = vmatmul.mubr.bf16.gmra.mrb[4].mxu0 %v10192_v37  ;;  %v10282_v37 = vld [vmem:[%s13969_s2 + $0x2a0] ss:$12 sps:$4 sm:$0xff]  }
  0x52   :  { %1047 = vmatprep.mubr.bf16.mxu0 %v10193_v38  ;;  %v10284_v38 = vld [vmem:[%s13969_s2 + $0x2bc] ss:$12 sps:$4 sm:$0xff]  }
  0x59   :  { %1048 = vmatmul.mubr.bf16.gmra.mrb[8].mxu0 %v10195_v39  ;;  %v10286_v39 = vld [vmem:[%s13969_s2 + $0x2b8] ss:$12 sps:$4 sm:$0xff]  }
  0x5a   :  { %1057 = vmatprep.mubr.bf16.mxu0 %v10196_v40  ;;  %v10288_v40 = vld [vmem:[%s13969_s2 + $0x2d4] ss:$12 sps:$4 sm:$0xff]  }
  0x61   :  { %1058 = vmatmul.mubr.bf16.gmra.mrb[12].mxu0 %v10198_v41  ;;  %v10290_v41 = vld [vmem:[%s13969_s2 + $0x2d0] ss:$12 sps:$4 sm:$0xff]  }
  0x62   :  { %1067 = vmatprep.mubr.bf16.mxu0 %v10202_v42  ;;  %v10292_v42 = vld [vmem:[%s13969_s2 + $0x2ec] ss:$12 sps:$4 sm:$0xff]  }
  0x69   :  { %1068 = vmatmul.mubr.bf16.gmra.mrb[16].mxu0 %v10204_v45  ;;  %v10297_v45 = vld [vmem:[%s13969_s2 + $0x20] ss:$12 sps:$4 sm:$0xff]  }
  0x6a   :  { %1077 = vmatprep.mubr.bf16.mxu0 %v10205_v46  ;;  %v10298_v46 = vld [vmem:[%s13969_s2 + $0x38] ss:$12 sps:$4 sm:$0xff]  }
  0x71   :  { %1078 = vmatmul.mubr.bf16.gmra.mrb[20].mxu0 %v10207_v47  ;;  %v10299_v47 = vld [vmem:[%s13969_s2 + $0x50] ss:$12 sps:$4 sm:$0xff]  }
  0x72   :  { %1087 = vmatprep.mubr.bf16.mxu0 %v10208_v48 }
  0x79   :  { %1088 = vmatmul.mubr.bf16.gmra.mrb[24].mxu0 %v10210_v49  ;;  %v10300_v49 = vld [vmem:[%s13969_s2 + $0x68] ss:$12 sps:$4 sm:$0xff]  }
  0x7a   :  { %1097 = vmatprep.mubr.bf16.mxu0 %v10211_v50 }
  0x81   :  { %1098 = vmatmul.mubr.bf16.gmra.mrb[28].mxu0 %v10213_v51 }
  0x82   :  { %1107 = vmatprep.mubr.bf16.mxu0 %v10214_v52 }
  0x89   :  { %1108 = vmatmul.mubr.bf16.gmra.mrb[32].mxu0 %v10216_v53 }
  0x8a   :  { %1117 = vmatprep.mubr.bf16.mxu0 %v10217_v54  ;;  %v10301_v54 = vld [vmem:[%s13969_s2 + $0x80] ss:$12 sps:$4 sm:$0xff]  }
  0x91   :  { %1118 = vmatmul.mubr.bf16.gmra.mrb[36].mxu0 %v10219_v56 }
  0x92   :  { %1127 = vmatprep.mubr.bf16.mxu0 %v10220_v57 }
  0x99   :  { %1128 = vmatmul.mubr.bf16.gmra.mrb[40].mxu0 %v10222_v59 }
  0x9a   :  { %1137 = vmatprep.mubr.bf16.mxu0 %v10223_v60  ;;  %v10302_v60 = vld [vmem:[%s13969_s2 + $0x98] ss:$12 sps:$4 sm:$0xff]  }
  0xa1   :  { %1138 = vmatmul.mubr.bf16.gmra.mrb[44].mxu0 %v10225_v62 }
  0xa2   :  { %1147 = vmatprep.mubr.bf16.mxu0 %v10226_v63 }
  0xa9   :  { %1148 = vmatmul.mubr.bf16.gmra.mrb[48].mxu0 %v10228_v1  ;;  %v10303_v1 = vld [vmem:[%s13969_s2 + $0xb0] ss:$12 sps:$4 sm:$0xff]  }
  0xaa   :  { %1157 = vmatprep.mubr.bf16.mxu0 %v10229_v2 }
  0xb1   :  { %1158 = vmatmul.mubr.bf16.gmra.mrb[52].mxu0 %v10231_v4 }
  0xb2   :  { %1167 = vmatprep.mubr.bf16.mxu0 %v10232_v5 }
  0xb9   :  { %1168 = vmatmul.mubr.bf16.gmra.mrb[56].mxu0 %v10234_v7 }
  0xba   :  { %1177 = vmatprep.mubr.bf16.mxu0 %v10235_v8 }
  0xc1   :  { %1178 = vmatmul.mubr.bf16.gmra.mrb[60].mxu0 %v10237_v10 }
  0xc2   :  { %1187 = vmatprep.mubr.bf16.mxu0 %v10238_v11  ;;  %v10305_v11 = vld [vmem:[%s13969_s2 + $0xe0] ss:$12 sps:$4 sm:$0xff]  }
  0xc9   :  { %1188 = vmatmul.mubr.bf16.gmra.mrb[64].mxu0 %v10240_v13 }
  0xca   :  { %1197 = vmatprep.mubr.bf16.mxu0 %v10241_v14 }
  0xd1   :  { %1198 = vmatmul.mubr.bf16.gmra.mrb[68].mxu0 %v10243_v15 }
  0xd2   :  { %1207 = vmatprep.mubr.bf16.mxu0 %v10244_v16  ;;  %v10306_v16 = vld [vmem:[%s13969_s2 + $0xf8] ss:$12 sps:$4 sm:$0xff]  }
  0xd9   :  { %1208 = vmatmul.mubr.bf16.gmra.mrb[72].mxu0 %v10246_v17 }
  0xda   :  { %1217 = vmatprep.mubr.bf16.mxu0 %v10247_v18 }
  0xe1   :  { %1218 = vmatmul.mubr.bf16.gmra.mrb[76].mxu0 %v10249_v19 }
  0xe2   :  { %1227 = vmatprep.mubr.bf16.mxu0 %v10253_v20  ;;  %v10307_v20 = vld [vmem:[%s13969_s2 + $0x110] ss:$12 sps:$4 sm:$0xff]  }
  0xe9   :  { %1228 = vmatmul.mubr.bf16.gmra.mrb[80].mxu0 %v10255_v21  ;;  %v10308_v21 = vld [vmem:[%s13969_s2 + $0x128] ss:$12 sps:$4 sm:$0xff]  }
  0xea   :  { %1237 = vmatprep.mubr.bf16.mxu0 %v10256_v22  ;;  %v10309_v22 = vld [vmem:[%s13969_s2 + $0x140] ss:$12 sps:$4 sm:$0xff]  }
  0xf0   :  { %v11319_v48 = vpop.f32.mrb[0].mxu1 }
  0xf1   :  { %1238 = vmatmul.mubr.bf16.gmra.mrb[84].mxu0 %v10258_v23  ;;  %v11324_v50 = vpop.f32.mrb[1].mxu1  ;;  %v10310_v23 = vld [vmem:[%s13969_s2 + $0x158] ss:$12 sps:$4 sm:$0xff]  }
  0xf2   :  { %1247 = vmatprep.mubr.bf16.mxu0 %v10259_v24  ;;  %v11326_v51 = vpop.f32.mrb[2].mxu1  ;;  %v10311_v24 = vld [vmem:[%s13969_s2 + $0x170] ss:$12 sps:$4 sm:$0xff]  }
  0xf3   :  { %v11328_v52 = vpop.f32.mrb[3].mxu1 }
  0xf8   :  { %v11332_v53 = vpop.f32.mrb[4].mxu1 }
  0xf9   :  { %1248 = vmatmul.mubr.bf16.gmra.mrb[88].mxu0 %v10261_v25  ;;  %v11337_v56 = vpop.f32.mrb[5].mxu1  ;;  %v10312_v25 = vld [vmem:[%s13969_s2 + $0x188] ss:$12 sps:$4 sm:$0xff]  }
  0xfa   :  { %1257 = vmatprep.mubr.bf16.mxu0 %v10262_v26  ;;  %v11339_v57 = vpop.f32.mrb[6].mxu1  ;;  %v10313_v26 = vld [vmem:[%s13969_s2 + $0x1a0] ss:$12 sps:$4 sm:$0xff]  }
  0xfb   :  { %v11341_v58 = vpop.f32.mrb[7].mxu1 }
 0x100   :  { %v11345_v59 = vpop.f32.mrb[8].mxu1 }
 0x101   :  { %1258 = vmatmul.mubr.bf16.gmra.mrb[92].mxu0 %v10264_v27  ;;  %v11350_v61 = vpop.f32.mrb[9].mxu1  ;;  %v10314_v27 = vld [vmem:[%s13969_s2 + $0x1b8] ss:$12 sps:$4 sm:$0xff]  }
 0x102   :  { %1267 = vmatprep.mubr.bf16.mxu0 %v10265_v28  ;;  %v11352_v62 = vpop.f32.mrb[10].mxu1  ;;  %v10315_v28 = vld [vmem:[%s13969_s2 + $0x1d0] ss:$12 sps:$4 sm:$0xff]  }
 0x103   :  { %v11354_v63 = vpop.f32.mrb[11].mxu1 }
 0x108   :  { %v11358_v0 = vpop.f32.mrb[12].mxu1 }
 0x109   :  { %1268 = vmatmul.mubr.bf16.gmra.mrb[96].mxu0 %v10267_v29  ;;  %v11363_v2 = vpop.f32.mrb[13].mxu1 }
 0x10a   :  { %1277 = vmatprep.mubr.bf16.mxu0 %v10268_v30  ;;  %v11365_v3 = vpop.f32.mrb[14].mxu1 }
 0x10b   :  { %v11367_v4 = vpop.f32.mrb[15].mxu1 }
 0x110   :  { %v11371_v5 = vpop.f32.mrb[16].mxu1 }
 0x111   :  { %1278 = vmatmul.mubr.bf16.gmra.mrb[100].mxu0 %v10270_v31  ;;  %v11376_v7 = vpop.f32.mrb[17].mxu1 }
 0x112   :  { %1287 = vmatprep.mubr.bf16.mxu0 %v10272_v32  ;;  %v11378_v8 = vpop.f32.mrb[18].mxu1  ;;  %v10316_v32 = vld [vmem:[%s13969_s2 + $0x1e8] ss:$12 sps:$4 sm:$0xff]  }
 0x113   :  { %v11380_v9 = vpop.f32.mrb[19].mxu1 }
 0x118   :  { %v11384_v10 = vpop.f32.mrb[20].mxu1 }
 0x119   :  { %1288 = vmatmul.mubr.bf16.gmra.mrb[104].mxu0 %v10274_v33  ;;  %v11389_v12 = vpop.f32.mrb[21].mxu1 }
 0x11a   :  { %1297 = vmatprep.mubr.bf16.mxu0 %v10276_v34  ;;  %v11391_v13 = vpop.f32.mrb[22].mxu1 }
 0x11b   :  { %v11393_v14 = vpop.f32.mrb[23].mxu1 }
 0x120   :  { %v11397_v15 = vpop.f32.mrb[24].mxu1 }
 0x121   :  { %1298 = vmatmul.mubr.bf16.gmra.mrb[108].mxu0 %v10278_v35  ;;  %v11402_v17 = vpop.f32.mrb[25].mxu1 }
 0x122   :  { %1307 = vmatprep.mubr.bf16.mxu0 %v10280_v36  ;;  %v11404_v18 = vpop.f32.mrb[26].mxu1 }
 0x123   :  { %v11406_v19 = vpop.f32.mrb[27].mxu1 }
 0x129   :  { %1308 = vmatmul.mubr.bf16.gmra.mrb[112].mxu0 %v10282_v37 }
 0x12a   :  { %1317 = vmatprep.mubr.bf16.mxu0 %v10284_v38 }
 0x131   :  { %1318 = vmatmul.mubr.bf16.gmra.mrb[116].mxu0 %v10286_v39 }
 0x132   :  { %1327 = vmatprep.mubr.bf16.mxu0 %v10288_v40 }
 0x139   :  { %1328 = vmatmul.mubr.bf16.gmra.mrb[120].mxu0 %v10290_v41  ;;  %v10317_v41 = vld [vmem:[%s13969_s2 + $0x200] ss:$12 sps:$4 sm:$0xff]  }
 0x13a   :  { %1337 = vmatprep.mubr.bf16.mxu0 %v10292_v42 }
 0x141   :  { %1338 = vmatmul.mubr.bf16.gmra.mrb[124].mxu0 %v10294_v43 }
 0x142   :  { %1380 = vmatprep.mubr.bf16.mxu0 %v13933_v55 }
 0x149   :  { %8160 = vmatmul.mubr.msk.bf16.vlgmr.msra.gmra.mrb[0].mxu0 %vm898_vm0, %v10296_v44 }
 0x14a   :  { %1390 = vmatprep.mubr.bf16.mxu0 %v13933_v55 }
 0x151   :  { %8161 = vmatmul.mubr.msk.bf16.gmra.mrb[4].mxu0 %vm898_vm0, %v10297_v45 }
 0x152   :  { %1400 = vmatprep.mubr.bf16.mxu0 %v13933_v55 }
 0x159   :  { %8162 = vmatmul.mubr.msk.bf16.gmra.mrb[8].mxu0 %vm898_vm0, %v10298_v46 }
 0x15a   :  { %1410 = vmatprep.mubr.bf16.mxu0 %v13933_v55 }
 0x161   :  { %8163 = vmatmul.mubr.msk.bf16.gmra.mrb[12].mxu0 %vm898_vm0, %v10299_v47 }
 0x162   :  { %1420 = vmatprep.mubr.bf16.mxu0 %v13933_v55 }
 0x169   :  { %8164 = vmatmul.mubr.msk.bf16.gmra.mrb[16].mxu0 %vm898_vm0, %v10300_v49 }
 0x16a   :  { %1430 = vmatprep.mubr.bf16.mxu0 %v13933_v55 }
 0x171   :  { %8165 = vmatmul.mubr.msk.bf16.gmra.mrb[20].mxu0 %vm898_vm0, %v10301_v54 }
 0x172   :  { %1440 = vmatprep.mubr.bf16.mxu0 %v13933_v55 }
 0x179   :  { %8166 = vmatmul.mubr.msk.bf16.gmra.mrb[24].mxu0 %vm898_vm0, %v10302_v60  ;;  %v10319_v60 = vld [vmem:[%s13969_s2 + $0x230] ss:$12 sps:$4 sm:$0xff]  }
 0x17a   :  { %1450 = vmatprep.mubr.bf16.mxu0 %v13933_v55 }
 0x181   :  { %8167 = vmatmul.mubr.msk.bf16.gmra.mrb[28].mxu0 %vm898_vm0, %v10303_v1 }
 0x182   :  { %1460 = vmatprep.mubr.bf16.mxu0 %v13933_v55 }
 0x189   :  { %8168 = vmatmul.mubr.msk.bf16.gmra.mrb[32].mxu0 %vm898_vm0, %v10304_v6 }
 0x18a   :  { %1470 = vmatprep.mubr.bf16.mxu0 %v13933_v55 }
 0x191   :  { %8169 = vmatmul.mubr.msk.bf16.gmra.mrb[36].mxu0 %vm898_vm0, %v10305_v11 }
 0x192   :  { %1480 = vmatprep.mubr.bf16.mxu0 %v13933_v55 }
 0x199   :  { %8170 = vmatmul.mubr.msk.bf16.gmra.mrb[40].mxu0 %vm898_vm0, %v10306_v16 }
 0x19a   :  { %1490 = vmatprep.mubr.bf16.mxu0 %v13933_v55 }
 0x1a1   :  { %8171 = vmatmul.mubr.msk.bf16.gmra.mrb[44].mxu0 %vm898_vm0, %v10307_v20 }
 0x1a2   :  { %1500 = vmatprep.mubr.bf16.mxu0 %v13933_v55 }
 0x1a9   :  { %8172 = vmatmul.mubr.msk.bf16.gmra.mrb[48].mxu0 %vm898_vm0, %v10308_v21 }
 0x1aa   :  { %1510 = vmatprep.mubr.bf16.mxu0 %v13933_v55 }
 0x1b1   :  { %8173 = vmatmul.mubr.msk.bf16.gmra.mrb[52].mxu0 %vm898_vm0, %v10309_v22 }
 0x1b2   :  { %1520 = vmatprep.mubr.bf16.mxu0 %v13933_v55 }
 0x1b9   :  { %8174 = vmatmul.mubr.msk.bf16.gmra.mrb[56].mxu0 %vm898_vm0, %v10310_v23 }
 0x1ba   :  { %1530 = vmatprep.mubr.bf16.mxu0 %v13933_v55 }
 0x1c1   :  { %8175 = vmatmul.mubr.msk.bf16.gmra.mrb[60].mxu0 %vm898_vm0, %v10311_v24 }
 0x1c2   :  { %1540 = vmatprep.mubr.bf16.mxu0 %v13933_v55 }
 0x1c9   :  { %8176 = vmatmul.mubr.msk.bf16.gmra.mrb[64].mxu0 %vm898_vm0, %v10312_v25 }
 0x1ca   :  { %1550 = vmatprep.mubr.bf16.mxu0 %v13933_v55 }
 0x1d1   :  { %8177 = vmatmul.mubr.msk.bf16.gmra.mrb[68].mxu0 %vm898_vm0, %v10313_v26 }
 0x1d2   :  { %1560 = vmatprep.mubr.bf16.mxu0 %v13933_v55 }
 0x1d9   :  { %8178 = vmatmul.mubr.msk.bf16.gmra.mrb[72].mxu0 %vm898_vm0, %v10314_v27 }
 0x1da   :  { %1570 = vmatprep.mubr.bf16.mxu0 %v13933_v55 }
 0x1e1   :  { %8179 = vmatmul.mubr.msk.bf16.gmra.mrb[76].mxu0 %vm898_vm0, %v10315_v28 }
 0x1e2   :  { %1580 = vmatprep.mubr.bf16.mxu0 %v13933_v55 }
 0x1e4   :  { %v1279_v29 = vpop.f32.mrb[100].mxu0 }
 0x1e5   :  { %v11456_v30 = vadd.f32 %v11319_v48, %v1279_v29  ;;  %v1281_v31 = vpop.f32.mrb[101].mxu0 }
 0x1e6   :  { %v11462_v33 = vadd.f32 %v11324_v50, %v1281_v31  ;;  %v1283_v34 = vpop.f32.mrb[102].mxu0  ;;  %v10318_v50 = vld [vmem:[%s13969_s2 + $0x218] ss:$12 sps:$4 sm:$0xff]  }
 0x1e7   :  { %v11465_v35 = vadd.f32 %v11326_v51, %v1283_v34  ;;  %v1285_v36 = vpop.f32.mrb[103].mxu0 }
 0x1e8   :  { %v11468_v37 = vadd.f32 %v11328_v52, %v1285_v36 }
 0x1e9   :  { %8180 = vmatmul.mubr.msk.bf16.gmra.mrb[80].mxu0 %vm898_vm0, %v10316_v32 }
 0x1ea   :  { %1590 = vmatprep.mubr.bf16.mxu0 %v13933_v55 }
 0x1ec   :  { %v1289_v38 = vpop.f32.mrb[104].mxu0 }
 0x1ed   :  { %v11473_v39 = vadd.f32 %v11332_v53, %v1289_v38  ;;  %v1291_v40 = vpop.f32.mrb[105].mxu0 }
 0x1ee   :  { %v11479_v42 = vadd.f32 %v11337_v56, %v1291_v40  ;;  %v1293_v43 = vpop.f32.mrb[106].mxu0 }
 0x1ef   :  { %v11482_v44 = vadd.f32 %v11339_v57, %v1293_v43  ;;  %v1295_v45 = vpop.f32.mrb[107].mxu0 }
 0x1f0   :  { %v11485_v46 = vadd.f32 %v11341_v58, %v1295_v45 }
 0x1f1   :  { %8181 = vmatmul.mubr.msk.bf16.gmra.mrb[84].mxu0 %vm898_vm0, %v10317_v41 }
 0x1f2   :  { %1600 = vmatprep.mubr.bf16.mxu0 %v13933_v55 }
 0x1f4   :  { %v1299_v47 = vpop.f32.mrb[108].mxu0 }
 0x1f5   :  { %v11490_v48 = vadd.f32 %v11345_v59, %v1299_v47  ;;  %v1301_v49 = vpop.f32.mrb[109].mxu0 }
 0x1f6   :  { %v11496_v51 = vadd.f32 %v11350_v61, %v1301_v49  ;;  %v1303_v52 = vpop.f32.mrb[110].mxu0 }
 0x1f7   :  { %v11499_v53 = vadd.f32 %v11352_v62, %v1303_v52  ;;  %v1305_v54 = vpop.f32.mrb[111].mxu0 }
 0x1f8   :  { %v11502_v56 = vadd.f32 %v11354_v63, %v1305_v54 }
 0x1f9   :  { %8182 = vmatmul.mubr.msk.bf16.gmra.mrb[88].mxu0 %vm898_vm0, %v10318_v50 }
 0x1fa   :  { %1610 = vmatprep.mubr.bf16.mxu0 %v13933_v55 }
 0x1fc   :  { %v1309_v57 = vpop.f32.mrb[112].mxu0 }
 0x1fd   :  { %v11507_v58 = vadd.f32 %v11358_v0, %v1309_v57  ;;  %v1311_v59 = vpop.f32.mrb[113].mxu0 }
 0x1fe   :  { %v11513_v61 = vadd.f32 %v11363_v2, %v1311_v59  ;;  %v1313_v62 = vpop.f32.mrb[114].mxu0  ;;  %v10320_v2 = vld [vmem:[%s13969_s2 + $0x248] ss:$12 sps:$4 sm:$0xff]  }
 0x1ff   :  { %v11516_v63 = vadd.f32 %v11365_v3, %v1313_v62  ;;  %v1315_v1 = vpop.f32.mrb[115].mxu0 }
 0x200   :  { %v11519_v6 = vadd.f32 %v11367_v4, %v1315_v1 }
 0x201   :  { %13970 = vst [vmem:[#allocation3_spill] sm:$0xff] %v11516_v63  ;;  %8183 = vmatmul.mubr.msk.bf16.gmra.mrb[92].mxu0 %vm898_vm0, %v10319_v60 }
 0x202   :  { %13971 = vst [vmem:[#allocation4_spill] sm:$0xff] %v11519_v6  ;;  %1620 = vmatprep.mubr.bf16.mxu0 %v13933_v55 }
 0x204   :  { %v1319_v0 = vpop.f32.mrb[116].mxu0 }
 0x205   :  { %v11524_v11 = vadd.f32 %v11371_v5, %v1319_v0  ;;  %v1321_v16 = vpop.f32.mrb[117].mxu0 }
 0x206   :  { %v11530_v3 = vadd.f32 %v11376_v7, %v1321_v16  ;;  %v1323_v20 = vpop.f32.mrb[118].mxu0 }
 0x207   :  { %13972 = vst [vmem:[#allocation5_spill] sm:$0xff] %v11524_v11  ;;  %v11533_v4 = vadd.f32 %v11378_v8, %v1323_v20  ;;  %v1325_v21 = vpop.f32.mrb[119].mxu0 }
 0x208   :  { %13973 = vst [vmem:[#allocation6_spill] sm:$0xff] %v11530_v3  ;;  %v11536_v22 = vadd.f32 %v11380_v9, %v1325_v21 }
 0x209   :  { %13974 = vst [vmem:[#allocation7_spill] sm:$0xff] %v11533_v4  ;;  %8184 = vmatmul.mubr.msk.bf16.gmra.mrb[96].mxu0 %vm898_vm0, %v10320_v2 }
 0x20a   :  { %13975 = vst [vmem:[#allocation8_spill] sm:$0xff] %v11536_v22 }
 0x20c   :  { %v1329_v5 = vpop.f32.mrb[120].mxu0 }
 0x20d   :  { %v11540_v23 = vadd.f32 %v11384_v10, %v1329_v5  ;;  %v1331_v24 = vpop.f32.mrb[121].mxu0 }
 0x20e   :  { %v11543_v25 = vadd.f32 %v11389_v12, %v1331_v24  ;;  %v1333_v7 = vpop.f32.mrb[122].mxu0 }
 0x20f   :  { %13976 = vst [vmem:[#allocation9_spill] sm:$0xff] %v11540_v23  ;;  %v11546_v26 = vadd.f32 %v11391_v13, %v1333_v7  ;;  %v1335_v8 = vpop.f32.mrb[123].mxu0 }
 0x210   :  { %13977 = vst [vmem:[#allocation10_spill] sm:$0xff] %v11543_v25  ;;  %v11549_v27 = vadd.f32 %v11393_v14, %v1335_v8 }
 0x211   :  { %13978 = vst [vmem:[#allocation11_spill] sm:$0xff] %v11546_v26 }
 0x212   :  { %13979 = vst [vmem:[#allocation12_spill] sm:$0xff] %v11549_v27 }
 0x214   :  { %v1339_v9 = vpop.f32.mrb[124].mxu0 }
 0x215   :  { %v11552_v28 = vadd.f32 %v11397_v15, %v1339_v9  ;;  %v1341_v29 = vpop.f32.mrb[125].mxu0 }
 0x216   :  { %v11555_v10 = vadd.f32 %v11402_v17, %v1341_v29  ;;  %v1343_v31 = vpop.f32.mrb[126].mxu0 }
 0x217   :  { %13980 = vst [vmem:[#allocation13_spill] sm:$0xff] %v11552_v28  ;;  %v11558_v12 = vadd.f32 %v11404_v18, %v1343_v31  ;;  %v1345_v32 = vpop.f32.mrb[127].mxu0  ;;  %v10321_v28 = vld [vmem:[%s14007_s1] sm:$0xff]  }
 0x218   :  { %13981 = vst [vmem:[#allocation14_spill] sm:$0xff] %v11555_v10  ;;  %v11561_v13 = vadd.f32 %v11406_v19, %v1345_v32  ;;  %9243 = vmatprep.mubr.bf16.mxu1 %v10321_v28  ;;  %v10323_v31 = vld [vmem:[%s14007_s1 + $0x180] sm:$0xff]  }
 0x219   :  { %13982 = vst [vmem:[#allocation15_spill] sm:$0xff] %v11558_v12  ;;  %9435 = vmatprep.mubr.bf16.mxu0 %v10323_v31 }
 0x21a   :  { %13983 = vst [vmem:[#allocation16_spill] sm:$0xff] %v11561_v13 }
 0x21c   :  { %v11563_v34 = vpop.f32.mrb[0].mxu0 }
 0x21d   :  { %13984 = vst [vmem:[#allocation17_spill] sm:$0xff] %v11563_v34  ;;  %v11565_v14 = vpop.f32.mrb[1].mxu0 }
 0x21e   :  { %13985 = vst [vmem:[#allocation18_spill] sm:$0xff] %v11565_v14  ;;  %v11567_v36 = vpop.f32.mrb[2].mxu0 }
 0x21f   :  { %13986 = vst [vmem:[#allocation19_spill] sm:$0xff] %v11567_v36  ;;  %v11569_v15 = vpop.f32.mrb[3].mxu0 }
 0x220   :  { %13987 = vst [vmem:[#allocation20_spill] sm:$0xff] %v11569_v15 }
 0x224   :  { %v11571_v38 = vpop.f32.mrb[4].mxu0 }
 0x225   :  { %v11573_v17 = vpop.f32.mrb[5].mxu0 }
 0x226   :  { %v11575_v40 = vpop.f32.mrb[6].mxu0 }
 0x227   :  { %v11577_v18 = vpop.f32.mrb[7].mxu0 }
 0x22c   :  { %v11579_v41 = vpop.f32.mrb[8].mxu0 }
 0x22d   :  { %v11581_v19 = vpop.f32.mrb[9].mxu0 }
 0x22e   :  { %v11583_v43 = vpop.f32.mrb[10].mxu0 }
 0x22f   :  { %v11585_v45 = vpop.f32.mrb[11].mxu0 }
 0x234   :  { %v11587_v47 = vpop.f32.mrb[12].mxu0 }
 0x235   :  { %v11589_v49 = vpop.f32.mrb[13].mxu0 }
 0x236   :  { %v11591_v50 = vpop.f32.mrb[14].mxu0 }
 0x237   :  { %v11593_v52 = vpop.f32.mrb[15].mxu0 }
 0x23c   :  { %v11595_v54 = vpop.f32.mrb[16].mxu0 }
 0x23d   :  { %v11597_v57 = vpop.f32.mrb[17].mxu0 }
 0x23e   :  { %v11599_v59 = vpop.f32.mrb[18].mxu0 }
 0x23f   :  { %v11601_v60 = vpop.f32.mrb[19].mxu0 }
 0x244   :  { %v11603_v62 = vpop.f32.mrb[20].mxu0 }
 0x245   :  { %v11605_v1 = vpop.f32.mrb[21].mxu0 }
 0x246   :  { %v11607_v0 = vpop.f32.mrb[22].mxu0 }
 0x247   :  { %v11609_v16 = vpop.f32.mrb[23].mxu0 }
 0x24c   :  { %v11611_v2 = vpop.f32.mrb[24].mxu0 }
 0x24d   :  { %v11613_v20 = vpop.f32.mrb[25].mxu0 }
 0x24e   :  { %v11615_v21 = vpop.f32.mrb[26].mxu0 }
 0x24f   :  { %13988 = vst [vmem:[#allocation21_spill] sm:$0xff] %v11615_v21  ;;  %v11617_v5 = vpop.f32.mrb[27].mxu0 }
 0x250   :  { %13989 = vst [vmem:[#allocation22_spill] sm:$0xff] %v11617_v5 }
 0x254   :  { %v11619_v24 = vpop.f32.mrb[28].mxu0 }
 0x255   :  { %13990 = vst [vmem:[#allocation23_spill] sm:$0xff] %v11619_v24  ;;  %v11621_v7 = vpop.f32.mrb[29].mxu0 }
 0x256   :  { %13991 = vst [vmem:[#allocation24_spill] sm:$0xff] %v11621_v7  ;;  %v11623_v8 = vpop.f32.mrb[30].mxu0 }
 0x257   :  { %13992 = vst [vmem:[#allocation25_spill] sm:$0xff] %v11623_v8  ;;  %v11625_v9 = vpop.f32.mrb[31].mxu0 }
 0x25c   :  { %v11627_v29 = vpop.f32.mrb[32].mxu0 }
 0x25d   :  { %13993 = vst [vmem:[#allocation26_spill] sm:$0xff] %v11627_v29  ;;  %v11631_v32 = vpop.f32.mrb[33].mxu0 }
 0x25e   :  { %13994 = vst [vmem:[#allocation27_spill] sm:$0xff] %v11631_v32  ;;  %v11635_v13 = vpop.f32.mrb[34].mxu0 }
 0x25f   :  { %13995 = vst [vmem:[#allocation28_spill] sm:$0xff] %v11635_v13  ;;  %v11639_v10 = vpop.f32.mrb[35].mxu0 }
 0x260   :  { %13996 = vst [vmem:[#allocation29_spill] sm:$0xff] %v11639_v10 }
 0x264   :  { %v11643_v27 = vpop.f32.mrb[36].mxu0 }
 0x265   :  { %v11647_v29 = vpop.f32.mrb[37].mxu0 }
 0x266   :  { %v11651_v32 = vpop.f32.mrb[38].mxu0 }
 0x267   :  { %v11655_v13 = vpop.f32.mrb[39].mxu0 }
 0x26c   :  { %v11659_v10 = vpop.f32.mrb[40].mxu0 }
 0x26d   :  { %v11663_v15 = vpop.f32.mrb[41].mxu0 }
 0x26e   :  { %v11667_v36 = vpop.f32.mrb[42].mxu0 }
 0x26f   :  { %v11671_v14 = vpop.f32.mrb[43].mxu0 }
 0x274   :  { %v11675_v34 = vpop.f32.mrb[44].mxu0 }
 0x275   :  { %v11679_v26 = vpop.f32.mrb[45].mxu0 }
 0x276   :  { %v11683_v25 = vpop.f32.mrb[46].mxu0 }
 0x277   :  { %v11687_v23 = vpop.f32.mrb[47].mxu0 }
 0x27c   :  { %v11691_v22 = vpop.f32.mrb[48].mxu0 }
 0x27d   :  { %v11695_v4 = vpop.f32.mrb[49].mxu0 }
 0x27e   :  { %13997 = vst [vmem:[#allocation30_spill] sm:$0xff] %v11695_v4  ;;  %v11699_v3 = vpop.f32.mrb[50].mxu0 }
 0x27f   :  { %13998 = vst [vmem:[#allocation31_spill] sm:$0xff] %v11699_v3  ;;  %v11703_v11 = vpop.f32.mrb[51].mxu0 }
 0x280   :  { %13999 = vst [vmem:[#allocation32_spill] sm:$0xff] %v11703_v11 }
 0x284   :  { %v11707_v6 = vpop.f32.mrb[52].mxu0 }
 0x285   :  { %14000 = vst [vmem:[#allocation33_spill] sm:$0xff] %v11707_v6  ;;  %v11711_v63 = vpop.f32.mrb[53].mxu0 }
 0x286   :  { %14001 = vst [vmem:[#allocation34_spill] sm:$0xff] %v11711_v63  ;;  %v11715_v4 = vpop.f32.mrb[54].mxu0 }
 0x287   :  { %14002 = vst [vmem:[#allocation35_spill] sm:$0xff] %v11715_v4  ;;  %v11719_v3 = vpop.f32.mrb[55].mxu0 }
 0x288   :  { %14003 = vst [vmem:[#allocation36_spill] sm:$0xff] %v11719_v3 }
 0x28c   :  { %v11723_v11 = vpop.f32.mrb[56].mxu0 }
 0x28d   :  { %v11727_v6 = vpop.f32.mrb[57].mxu0 }
 0x28e   :  { %14004 = vst [vmem:[#allocation37_spill] sm:$0xff] %v11727_v6  ;;  %v11731_v63 = vpop.f32.mrb[58].mxu0 }
 0x28f   :  { %14005 = vst [vmem:[#allocation38_spill] sm:$0xff] %v11731_v63  ;;  %v11735_v4 = vpop.f32.mrb[59].mxu0 }
 0x290   :  { %14006 = vst [vmem:[#allocation39_spill] sm:$0xff] %v11735_v4 }
 0x294   :  { %v11745_v55 = vpop.f32.mrb[60].mxu0 }
 0x295   :  { %14008 = vst [vmem:[#allocation40_spill] sm:$0xff] %v11745_v55  ;;  %v11749_v63 = vpop.f32.mrb[61].mxu0 }
 0x296   :  { %14009 = vst [vmem:[#allocation41_spill] sm:$0xff] %v11749_v63  ;;  %v11753_v6 = vpop.f32.mrb[62].mxu0 }
 0x297   :  { %14010 = vst [vmem:[#allocation42_spill] sm:$0xff] %v11753_v6  ;;  %v11757_v3 = vpop.f32.mrb[63].mxu0  ;;  %v14015_v6 = vmax.f32 %v11571_v38, %v11643_v27 }
 0x29c   :  { %v11761_v4 = vpop.f32.mrb[64].mxu0 }
 0x29d   :  { %14011 = vst [vmem:[#allocation43_spill] sm:$0xff] %v11761_v4  ;;  %v11763_v5 = vpop.f32.mrb[65].mxu0 }
 0x29e   :  { %14012 = vst [vmem:[#allocation44_spill] sm:$0xff] %v11763_v5  ;;  %v11765_v12 = vpop.f32.mrb[66].mxu0  ;;  %v14016_v5 = vmax.f32 %v11573_v17, %v11647_v29 }
 0x29f   :  { %14013 = vst [vmem:[#allocation45_spill] sm:$0xff] %v11765_v12  ;;  %v11767_v55 = vpop.f32.mrb[67].mxu0 }
 0x2a0   :  { %14014 = vst [vmem:[#allocation46_spill] sm:$0xff] %v11767_v55 }
 0x2a4   :  { %v1552_v24 = vpop.f32.mrb[68].mxu0 }
 0x2a5   :  { %v1737_v21 = vmax.f32 %v1552_v24, %v11456_v30  ;;  %v1554_v63 = vpop.f32.mrb[69].mxu0  ;;  %v11782_v30 = vld [vmem:[%s14017_s6] ss:$0 sm:$0xff] }
 0x2a6   :  { %v1738_v7 = vmax.f32 %v1554_v63, %v11462_v33  ;;  %v1556_v28 = vpop.f32.mrb[70].mxu0  ;;  %v14018_v33 = vmax.f32 %v11575_v40, %v11651_v32 }
 0x2a7   :  { %v1769_v8 = vmax.f32 %v14015_v6, %v1737_v21  ;;  %v1739_v31 = vmax.f32 %v1556_v28, %v11465_v35  ;;  %v1558_v4 = vpop.f32.mrb[71].mxu0  ;;  %v14019_v35 = vmax.f32 %v11577_v18, %v11655_v13 }
 0x2a8   :  { %v1770_v12 = vmax.f32 %v14016_v5, %v1738_v7  ;;  %v1740_v55 = vmax.f32 %v1558_v4, %v11468_v37  ;;  %v11794_v37 = vld [vmem:[%s14020_s5] ss:$0 sm:$0xff] }
 0x2a9   :  { %v1771_v63 = vmax.f32 %v14018_v33, %v1739_v31 }
 0x2aa   :  { %v1799_v27 = vmax.f32 %v1769_v8, %v1770_v12  ;;  %v1772_v6 = vmax.f32 %v14019_v35, %v1740_v55  ;;  %v14021_v55 = vmax.f32 %v11579_v41, %v11659_v10  ;;  %v14024_v10 = vmax.f32 %v11583_v43, %v11667_v36 }
 0x2ac   :  { %v1822_v38 = vadd.f32 %v11782_v30, %v1799_v27  ;;  %v1800_v4 = vmax.f32 %v1771_v63, %v1772_v6  ;;  %v1562_v17 = vpop.f32.mrb[72].mxu0 }
 0x2ad   :  { %v1741_v21 = vmax.f32 %v1562_v17, %v11473_v39  ;;  %v1564_v5 = vpop.f32.mrb[73].mxu0  ;;  %v14022_v39 = vmax.f32 %v11581_v19, %v11663_v15  ;;  %v14025_v15 = vmax.f32 %v11585_v45, %v11671_v14  ;;  %v14026_v45 = vmax.f32 %v11587_v47, %v11675_v34 }
 0x2ae   :  { %vm1838_vm1 = vcmp.ge.f32.partialorder %v1822_v38, 0.0  ;;  %v1854_v40 = vmul.f32 0.01, %v1822_v38  ;;  %v1823_v12 = vadd.f32 %v11782_v30, %v1800_v4  ;;  %v1742_v24 = vmax.f32 %v1564_v5, %v11479_v42  ;;  %v1566_v13 = vpop.f32.mrb[74].mxu0  ;;  %v11810_v42 = vld [vmem:[%s14023_s30] ss:$0 sm:$0xff] }
 0x2af   :  { %v1773_v18 = vmax.f32 %v14021_v55, %v1741_v21  ;;  %v1743_v7 = vmax.f32 %v1566_v13, %v11482_v44  ;;  %v1568_v8 = vpop.f32.mrb[75].mxu0 }
 0x2b0   :  { %v1870_v29 = vsel %vm1838_vm1, %v1822_v38, %v1854_v40  ;;  %vm1839_vm2 = vcmp.ge.f32.partialorder %v1823_v12, 0.0  ;;  %v1855_v32 = vmul.f32 0.01, %v1823_v12  ;;  %v1774_v28 = vmax.f32 %v14022_v39, %v1742_v24 }
 0x2b1   :  { %v1893_v31 = vmul.f32 %v11794_v37, %v1870_v29  ;;  %v1775_v41 = vmax.f32 %v14024_v10, %v1743_v7  ;;  %v1744_v44 = vmax.f32 %v1568_v8, %v11485_v46  ;;  %v14028_v29 = vmax.f32 %v11591_v50, %v11683_v25 }
 0x2b2   :  { %v1871_v33 = vsel %vm1839_vm2, %v1823_v12, %v1855_v32  ;;  %v1801_v63 = vmax.f32 %v1773_v18, %v1774_v28 }
 0x2b3   :  { %v1894_v27 = vmul.f32 %v11794_v37, %v1871_v33  ;;  %v1776_v19 = vmax.f32 %v14025_v15, %v1744_v44  ;;  %v1916_v38 = vadd.f32 %v11810_v42, %v1893_v31 }
 0x2b4   :  { %v1824_v35 = vadd.f32 %v11782_v30, %v1801_v63  ;;  %v1572_v6 = vpop.f32.mrb[76].mxu0 }
 0x2b5   :  { %v1917_v4 = vadd.f32 %v11810_v42, %v1894_v27  ;;  %v1802_v17 = vmax.f32 %v1775_v41, %v1776_v19  ;;  %v1745_v36 = vmax.f32 %v1572_v6, %v11490_v48  ;;  %v1574_v43 = vpop.f32.mrb[77].mxu0  ;;  %v14027_v48 = vmax.f32 %v11589_v49, %v11679_v26  ;;  %v14031_v27 = vld [vmem:[#allocation3_spill] sm:$0xff] }
 0x2b6   :  { %vm1840_vm3 = vcmp.ge.f32.partialorder %v1824_v35, 0.0  ;;  %v1856_v46 = vmul.f32 0.01, %v1824_v35  ;;  %v1746_v21 = vmax.f32 %v1574_v43, %v11496_v51  ;;  %v1576_v5 = vpop.f32.mrb[78].mxu0  ;;  %v14034_v43 = vld [vmem:[#allocation31_spill] sm:$0xff] }
 0x2b7   :  { %v11825_v40 = vpack.c.bf16 %v1917_v4, %v1916_v38  ;;  %v1825_v14 = vadd.f32 %v11782_v30, %v1802_v17  ;;  %v1777_v12 = vmax.f32 %v14026_v45, %v1745_v36  ;;  %v1747_v24 = vmax.f32 %v1576_v5, %v11499_v53  ;;  %v1578_v13 = vpop.f32.mrb[79].mxu0  ;;  %v14032_v4 = vld [vmem:[#allocation30_spill] sm:$0xff]  ;;  %v14037_v45 = vld [vmem:[#allocation32_spill] sm:$0xff] }
 0x2b8   :  { %v1872_v55 = vsel %vm1840_vm3, %v1824_v35, %v1856_v46  ;;  %v1778_v18 = vmax.f32 %v14027_v48, %v1746_v21  ;;  %v1748_v7 = vmax.f32 %v1578_v13, %v11502_v56  ;;  %v14029_v53 = vmax.f32 %v11593_v52, %v11687_v23  ;;  %v14036_v46 = vld [vmem:[#allocation4_spill] sm:$0xff] }
 0x2b9   :  { %v1895_v51 = vmul.f32 %v11794_v37, %v1872_v55  ;;  %vm1841_vm4 = vcmp.ge.f32.partialorder %v1825_v14, 0.0  ;;  %v1857_v8 = vmul.f32 0.01, %v1825_v14  ;;  %v1779_v32 = vmax.f32 %v14028_v29, %v1747_v24 }
 0x2ba   :  { %v1803_v34 = vmax.f32 %v1777_v12, %v1778_v18  ;;  %v1780_v47 = vmax.f32 %v14029_v53, %v1748_v7  ;;  %v14030_v52 = vmax.f32 %v11595_v54, %v11691_v22  ;;  %v14033_v17 = vmax.f32 %v11597_v57, %v14032_v4 }
 0x2bb   :  { %v1873_v39 = vsel %vm1841_vm4, %v1825_v14, %v1857_v8  ;;  %v1918_v31 = vadd.f32 %v11810_v42, %v1895_v51  ;;  %v14035_v22 = vmax.f32 %v11599_v59, %v14034_v43  ;;  %v14038_v12 = vmax.f32 %v11601_v60, %v14037_v45  ;;  %v14039_v59 = vld [vmem:[#allocation5_spill] sm:$0xff]  ;;  %v14040_v8 = vld [vmem:[#allocation6_spill] sm:$0xff] }
 0x2bc   :  { %v1896_v28 = vmul.f32 %v11794_v37, %v1873_v39  ;;  %v1826_v26 = vadd.f32 %v11782_v30, %v1803_v34  ;;  %v1804_v49 = vmax.f32 %v1779_v32, %v1780_v47  ;;  %v1582_v56 = vpop.f32.mrb[80].mxu0  ;;  %v14041_v39 = vld [vmem:[#allocation33_spill] sm:$0xff] }
 0x2bd   :  { %v1749_v10 = vmax.f32 %v1582_v56, %v11507_v58  ;;  %v1584_v41 = vpop.f32.mrb[81].mxu0  ;;  %v14051_v43 = vld [vmem:[#allocation9_spill] sm:$0xff] }
 0x2be   :  { %v1919_v25 = vadd.f32 %v11810_v42, %v1896_v28  ;;  %vm1842_vm5 = vcmp.ge.f32.partialorder %v1826_v26, 0.0  ;;  %v1858_v50 = vmul.f32 0.01, %v1826_v26  ;;  %v1827_v44 = vadd.f32 %v11782_v30, %v1804_v49  ;;  %v1586_v23 = vpop.f32.mrb[82].mxu0  ;;  %v14043_v49 = vld [vmem:[#allocation34_spill] sm:$0xff] }
 0x2bf   :  { %v1781_v33 = vmax.f32 %v14030_v52, %v1749_v10  ;;  %v1750_v63 = vmax.f32 %v1584_v41, %v11513_v61  ;;  %v1751_v15 = vmax.f32 %v1586_v23, %v14031_v27  ;;  %v1588_v19 = vpop.f32.mrb[83].mxu0  ;;  %v14042_v28 = vmax.f32 %v11603_v62, %v14041_v39  ;;  %v14045_v10 = vld [vmem:[#allocation7_spill] sm:$0xff]  ;;  %v14049_v62 = vld [vmem:[#allocation36_spill] sm:$0xff] }
 0x2c0   :  { %v11854_v35 = vpack.c.bf16 %v1919_v25, %v1918_v31  ;;  %v1874_v58 = vsel %vm1842_vm5, %v1826_v26, %v1858_v50  ;;  %vm1843_vm6 = vcmp.ge.f32.partialorder %v1827_v44, 0.0  ;;  %v1859_v6 = vmul.f32 0.01, %v1827_v44  ;;  %v14046_v25 = vld [vmem:[#allocation8_spill] sm:$0xff] }
 0x2c1   :  { %v1897_v38 = vmul.f32 %v11794_v37, %v1874_v58  ;;  %v1782_v36 = vmax.f32 %v14033_v17, %v1750_v63  ;;  %v1783_v54 = vmax.f32 %v14035_v22, %v1751_v15  ;;  %v1752_v61 = vmax.f32 %v1588_v19, %v14036_v46  ;;  %v14047_v63 = vld [vmem:[#allocation35_spill] sm:$0xff] }
 0x2c2   :  { %v1875_v21 = vsel %vm1843_vm6, %v1827_v44, %v1859_v6  ;;  %v14044_v56 = vmax.f32 %v11605_v1, %v14043_v49  ;;  %v14048_v27 = vmax.f32 %v11607_v0, %v14047_v63  ;;  %v14050_v19 = vmax.f32 %v11609_v16, %v14049_v62 }
 0x2c3   :  { %v1898_v5 = vmul.f32 %v11794_v37, %v1875_v21  ;;  %v1805_v14 = vmax.f32 %v1781_v33, %v1782_v36  ;;  %v1784_v24 = vmax.f32 %v14038_v12, %v1752_v61  ;;  %v1920_v13 = vadd.f32 %v11810_v42, %v1897_v38  ;;  %v14054_v12 = vld [vmem:[#allocation11_spill] sm:$0xff] }
 0x2c4   :  { %v1592_v55 = vpop.f32.mrb[84].mxu0  ;;  %v14052_v21 = vmax.f32 %v11611_v2, %v11723_v11 }
 0x2c5   :  { %v1921_v57 = vadd.f32 %v11810_v42, %v1898_v5  ;;  %v1828_v48 = vadd.f32 %v11782_v30, %v1805_v14  ;;  %v1806_v18 = vmax.f32 %v1783_v54, %v1784_v24  ;;  %v1753_v7 = vmax.f32 %v1592_v55, %v14039_v59  ;;  %v1594_v51 = vpop.f32.mrb[85].mxu0  ;;  %v14053_v14 = vld [vmem:[#allocation10_spill] sm:$0xff]  ;;  %v14055_v59 = vld [vmem:[#allocation37_spill] sm:$0xff] }
 0x2c6   :  { %v1754_v29 = vmax.f32 %v1594_v51, %v14040_v8  ;;  %v1596_v32 = vpop.f32.mrb[86].mxu0  ;;  %v14057_v8 = vld [vmem:[#allocation21_spill] sm:$0xff] }
 0x2c7   :  { %v11873_v34 = vpack.c.bf16 %v1921_v57, %v1920_v13  ;;  %vm1844_vm7 = vcmp.ge.f32.partialorder %v1828_v48, 0.0  ;;  %v1860_v53 = vmul.f32 0.01, %v1828_v48  ;;  %v1829_v60 = vadd.f32 %v11782_v30, %v1806_v18  ;;  %v1598_v47 = vpop.f32.mrb[87].mxu0 }
 0x2c8   :  { %v1785_v26 = vmax.f32 %v14042_v28, %v1753_v7  ;;  %v1786_v31 = vmax.f32 %v14044_v56, %v1754_v29  ;;  %v1755_v41 = vmax.f32 %v1596_v32, %v14045_v10  ;;  %v1756_v50 = vmax.f32 %v1598_v47, %v14046_v25  ;;  %v14058_v29 = vld [vmem:[#allocation38_spill] sm:$0xff]  ;;  %v14060_v32 = vld [vmem:[#allocation12_spill] sm:$0xff] }
 0x2c9   :  { %v1876_v44 = vsel %vm1844_vm7, %v1828_v48, %v1860_v53  ;;  %vm1845_vm8 = vcmp.ge.f32.partialorder %v1829_v60, 0.0  ;;  %v1861_v23 = vmul.f32 0.01, %v1829_v60  ;;  %v14056_v7 = vmax.f32 %v11613_v20, %v14055_v59  ;;  %v14061_v28 = vld [vmem:[#allocation22_spill] sm:$0xff] }
 0x2ca   :  { %v1899_v52 = vmul.f32 %v11794_v37, %v1876_v44  ;;  %v1807_v33 = vmax.f32 %v1785_v26, %v1786_v31  ;;  %v1787_v15 = vmax.f32 %v14048_v27, %v1755_v41  ;;  %v1788_v58 = vmax.f32 %v14050_v19, %v1756_v50  ;;  %v14062_v26 = vld [vmem:[#allocation39_spill] sm:$0xff]  ;;  %v14064_v50 = vld [vmem:[#allocation13_spill] sm:$0xff] }
 0x2cb   :  { %v1877_v1 = vsel %vm1845_vm8, %v1829_v60, %v1861_v23  ;;  %v14059_v11 = vmax.f32 %v14057_v8, %v14058_v29  ;;  %v14063_v49 = vmax.f32 %v14061_v28, %v14062_v26  ;;  %v14078_v29 = vld [vmem:[#allocation43_spill] sm:$0xff]  ;;  %v14082_v26 = vld [vmem:[#allocation44_spill] sm:$0xff]  ;;  %vm7747_vm7 = vcmask 64512  }
 0x2cc   :  { %v1900_v6 = vmul.f32 %v11794_v37, %v1877_v1  ;;  %v1830_v38 = vadd.f32 %v11782_v30, %v1807_v33  ;;  %v1808_v4 = vmax.f32 %v1787_v15, %v1788_v58  ;;  %v1602_v17 = vpop.f32.mrb[88].mxu0  ;;  %v1922_v36 = vadd.f32 %v11810_v42, %v1899_v52  ;;  %v14065_v52 = vld [vmem:[#allocation14_spill] sm:$0xff]  ;;  %v14066_v58 = vld [vmem:[#allocation23_spill] sm:$0xff]  ;;  %v14067_v1 = vld [vmem:[#allocation40_spill] sm:$0xff] }
 0x2cd   :  { %v1757_v22 = vmax.f32 %v1602_v17, %v14051_v43  ;;  %v1604_v54 = vpop.f32.mrb[89].mxu0  ;;  %v14070_v17 = vld [vmem:[#allocation41_spill] sm:$0xff]  ;;  %vm7836_vm8 = vcmask 523264  }
 0x2ce   :  { %v1923_v46 = vadd.f32 %v11810_v42, %v1900_v6  ;;  %vm1846_vm9 = vcmp.ge.f32.partialorder %v1830_v38, 0.0  ;;  %v1862_v0 = vmul.f32 0.01, %v1830_v38  ;;  %v1831_v61 = vadd.f32 %v11782_v30, %v1808_v4  ;;  %v1606_v16 = vpop.f32.mrb[90].mxu0  ;;  %v14069_v4 = vld [vmem:[#allocation24_spill] sm:$0xff] }
 0x2cf   :  { %v1789_v5 = vmax.f32 %v14052_v21, %v1757_v22  ;;  %v1758_v45 = vmax.f32 %v1604_v54, %v14053_v14  ;;  %v1759_v24 = vmax.f32 %v1606_v16, %v14054_v12  ;;  %v1608_v13 = vpop.f32.mrb[91].mxu0  ;;  %v14068_v6 = vmax.f32 %v14066_v58, %v14067_v1  ;;  %v14072_v22 = vld [vmem:[#allocation15_spill] sm:$0xff]  ;;  %v14074_v14 = vld [vmem:[#allocation25_spill] sm:$0xff]  ;;  %v14090_v58 = vld [vmem:[#allocation46_spill] sm:$0xff] }
 0x2d0   :  { %v11902_v55 = vpack.c.bf16 %v1923_v46, %v1922_v36  ;;  %v1878_v57 = vsel %vm1846_vm9, %v1830_v38, %v1862_v0  ;;  %vm1847_vm10 = vcmp.ge.f32.partialorder %v1831_v61, 0.0  ;;  %v1863_v48 = vmul.f32 0.01, %v1831_v61  ;;  %v14073_v46 = vld [vmem:[#allocation16_spill] sm:$0xff] }
 0x2d1   :  { %v1901_v18 = vmul.f32 %v11794_v37, %v1878_v57  ;;  %v1790_v51 = vmax.f32 %v14056_v7, %v1758_v45  ;;  %v1791_v2 = vmax.f32 %v14059_v11, %v1759_v24  ;;  %v1760_v53 = vmax.f32 %v1608_v13, %v14060_v32  ;;  %v14075_v45 = vld [vmem:[#allocation42_spill] sm:$0xff] }
 0x2d2   :  { %v1879_v60 = vsel %vm1847_vm10, %v1831_v61, %v1863_v48  ;;  %v14071_v36 = vmax.f32 %v14069_v4, %v14070_v17  ;;  %v14076_v12 = vmax.f32 %v14074_v14, %v14075_v45  ;;  %v14077_v13 = vmax.f32 %v11625_v9, %v11757_v3  ;;  %v14079_v9 = vld [vmem:[#allocation17_spill] sm:$0xff]  ;;  %v14091_v17 = vld [vmem:[#allocation20_spill] sm:$0xff] }
 0x2d3   :  { %v1902_v47 = vmul.f32 %v11794_v37, %v1879_v60  ;;  %v1809_v39 = vmax.f32 %v1789_v5, %v1790_v51  ;;  %v1792_v56 = vmax.f32 %v14063_v49, %v1760_v53  ;;  %v1924_v31 = vadd.f32 %v11810_v42, %v1901_v18 }
 0x2d4   :  { %v1612_v10 = vpop.f32.mrb[92].mxu0  ;;  %vm8022_vm10 = vcmask 1024  }
 0x2d5   :  { %v1925_v20 = vadd.f32 %v11810_v42, %v1902_v47  ;;  %v1832_v41 = vadd.f32 %v11782_v30, %v1809_v39  ;;  %v1810_v25 = vmax.f32 %v1791_v2, %v1792_v56  ;;  %v1761_v44 = vmax.f32 %v1612_v10, %v14064_v50  ;;  %v1614_v23 = vpop.f32.mrb[93].mxu0  ;;  %v14080_v47 = vld [vmem:[#allocation26_spill] sm:$0xff]  ;;  %v14083_v56 = vld [vmem:[#allocation45_spill] sm:$0xff] }
 0x2d6   :  { %v1762_v33 = vmax.f32 %v1614_v23, %v14065_v52  ;;  %v1616_v63 = vpop.f32.mrb[94].mxu0  ;;  %v14081_v39 = vmax.f32 %v14079_v9, %v14080_v47  ;;  %v14085_v23 = vld [vmem:[#allocation27_spill] sm:$0xff] }
 0x2d7   :  { %v11921_v27 = vpack.c.bf16 %v1925_v20, %v1924_v31  ;;  %vm1848_vm11 = vcmp.ge.f32.partialorder %v1832_v41, 0.0  ;;  %v1864_v15 = vmul.f32 0.01, %v1832_v41  ;;  %v1833_v62 = vadd.f32 %v11782_v30, %v1810_v25  ;;  %v1618_v19 = vpop.f32.mrb[95].mxu0  ;;  %v10337_v9 = vld [vmem:[%s14007_s1 + $0x40] sm:$0xff]  }
 0x2d8   :  { %v1793_v38 = vmax.f32 %v14068_v6, %v1761_v44  ;;  %v1794_v43 = vmax.f32 %v14071_v36, %v1762_v33  ;;  %v1763_v54 = vmax.f32 %v1616_v63, %v14072_v22  ;;  %v1764_v0 = vmax.f32 %v1618_v19, %v14073_v46  ;;  %v14084_v44 = vld [vmem:[#allocation18_spill] sm:$0xff]  ;;  %v14087_v63 = vld [vmem:[#allocation19_spill] sm:$0xff]  ;;  %v14092_v36 = vld [vmem:[#allocation29_spill] sm:$0xff] }
 0x2d9   :  { %v1880_v61 = vsel %vm1848_vm11, %v1832_v41, %v1864_v15  ;;  %vm1849_vm12 = vcmp.ge.f32.partialorder %v1833_v62, 0.0  ;;  %v1865_v16 = vmul.f32 0.01, %v1833_v62  ;;  %v14086_v52 = vmax.f32 %v14084_v44, %v14085_v23  ;;  %v14088_v15 = vld [vmem:[#allocation28_spill] sm:$0xff]  ;;  %v10339_v47 = vld [vmem:[%s14007_s1 + $0x1c0] sm:$0xff]  }
 0x2da   :  { %v1903_v21 = vmul.f32 %v11794_v37, %v1880_v61  ;;  %v1811_v5 = vmax.f32 %v1793_v38, %v1794_v43  ;;  %v1795_v24 = vmax.f32 %v14076_v12, %v1763_v54  ;;  %v1796_v57 = vmax.f32 %v14077_v13, %v1764_v0  ;;  %v10347_v44 = vld [vmem:[%s14095_s25 + $0x80] ss:$8 sps:$4 sm:$0xff]   ;;  %v10352_v23 = vld [vmem:[%s14095_s25 + $0x94] ss:$8 sps:$4 sm:$0xff]  }
 0x2db   :  { %v1881_v48 = vsel %vm1849_vm12, %v1833_v62, %v1865_v16  ;;  %v14089_v62 = vmax.f32 %v14087_v63, %v14088_v15  ;;  %v14093_v43 = vmax.f32 %v14091_v17, %v14092_v36  ;;  %v10353_v63 = vld [vmem:[%s14095_s25 + $0xa0] ss:$8 sps:$4 sm:$0xff]   ;;  %v10358_v15 = vld [vmem:[%s14095_s25 + $0xb4] ss:$8 sps:$4 sm:$0xff]   ;;  %v10368_v36 = vld [vmem:[%s14095_s25 + $0xf0] ss:$8 sps:$4 sm:$0xff]  }
 0x2dc   :  { %v1904_v18 = vmul.f32 %v11794_v37, %v1881_v48  ;;  %v1834_v59 = vadd.f32 %v11782_v30, %v1811_v5  ;;  %v1812_v7 = vmax.f32 %v1795_v24, %v1796_v57  ;;  %v1622_v51 = vpop.f32.mrb[96].mxu0  ;;  %v1926_v8 = vadd.f32 %v11810_v42, %v1903_v21  ;;  %v10370_v17 = vld [vmem:[%s14095_s25 + $0xf4] ss:$8 sps:$4 sm:$0xff]  }
 0x2dd   :  { %v1733_v11 = vmax.f32 %v14078_v29, %v1622_v51  ;;  %v1624_v2 = vpop.f32.mrb[97].mxu0  ;;  %v10328_v51 = vld [vmem:[%s14007_s1 + $0x198] sm:$0xff]   ;;  %v10331_v29 = vld [vmem:[%s14007_s1 + $0x1a0] sm:$0xff]  }
 0x2de   :  { %v1927_v32 = vadd.f32 %v11810_v42, %v1904_v18  ;;  %vm1850_vm13 = vcmp.ge.f32.partialorder %v1834_v59, 0.0  ;;  %v1866_v53 = vmul.f32 0.01, %v1834_v59  ;;  %v1835_v60 = vadd.f32 %v11782_v30, %v1812_v7  ;;  %v1626_v3 = vpop.f32.mrb[98].mxu0  ;;  %v10326_v7 = vld [vmem:[%s14007_s1 + $0x18] sm:$0xff]  }
 0x2df   :  { %v1765_v28 = vmax.f32 %v14081_v39, %v1733_v11  ;;  %v1734_v49 = vmax.f32 %v14082_v26, %v1624_v2  ;;  %v1735_v31 = vmax.f32 %v14083_v56, %v1626_v3  ;;  %v1628_v10 = vpop.f32.mrb[99].mxu0  ;;  %v10330_v11 = vld [vmem:[%s14007_s1 + $0x28] sm:$0xff]   ;;  %v10336_v3 = vld [vmem:[%s14007_s1 + $0x1b8] sm:$0xff]   ;;  %v10341_v26 = vld [vmem:[%s14007_s1 + $0x50] sm:$0xff]  }
 0x2e0   :  { %v11950_v20 = vpack.c.bf16 %v1927_v32, %v1926_v8  ;;  %v1882_v41 = vsel %vm1850_vm13, %v1834_v59, %v1866_v53  ;;  %vm1851_vm14 = vcmp.ge.f32.partialorder %v1835_v60, 0.0  ;;  %v1867_v25 = vmul.f32 0.01, %v1835_v60  ;;  %v10327_v59 = vld [vmem:[%s14007_s1 + $0x190] sm:$0xff]   ;;  %v10329_v8 = vld [vmem:[%s14007_s1 + $0x20] sm:$0xff]   ;;  %v10332_v2 = vld [vmem:[%s14007_s1 + $0x1a8] sm:$0xff]  }
 0x2e1   :  { %v1905_v50 = vmul.f32 %v11794_v37, %v1882_v41  ;;  %v1766_v33 = vmax.f32 %v14086_v52, %v1734_v49  ;;  %v1767_v19 = vmax.f32 %v14089_v62, %v1735_v31  ;;  %v1736_v1 = vmax.f32 %v14090_v58, %v1628_v10  ;;  %v10333_v32 = vld [vmem:[%s14007_s1 + $0x30] sm:$0xff]   ;;  %v10338_v39 = vld [vmem:[%s14007_s1 + $0x48] sm:$0xff]   ;;  %v10342_v49 = vld [vmem:[%s14007_s1 + $0x58] sm:$0xff]  }
 0x2e2   :  { %v1883_v6 = vsel %vm1851_vm14, %v1835_v60, %v1867_v25  ;;  %v10335_v53 = vld [vmem:[%s14007_s1 + $0x1b0] sm:$0xff]   ;;  %v10334_v60 = vld [vmem:[%s14007_s1 + $0x38] sm:$0xff]   ;;  %v10343_v56 = vld [vmem:[%s14007_s1 + $0x60] sm:$0xff]   ;;  %v14094_v25 = vmov 0  }
 0x2e3   :  { %v1906_v38 = vmul.f32 %v11794_v37, %v1883_v6  ;;  %v1797_v4 = vmax.f32 %v1765_v28, %v1766_v33  ;;  %v1768_v22 = vmax.f32 %v14093_v43, %v1736_v1  ;;  %v1928_v54 = vadd.f32 %v11810_v42, %v1905_v50  ;;  %v10340_v28 = vld [vmem:[%s14007_s1 + $0x1c8] sm:$0xff]   ;;  %v10345_v10 = vld [vmem:[%s14007_s1 + $0x70] sm:$0xff]   ;;  %v10346_v41 = vld [vmem:[%s14007_s1 + $0x78] sm:$0xff]  }
 0x2e4   :  { %v10344_v31 = vld [vmem:[%s14007_s1 + $0x68] sm:$0xff]   ;;  %v10350_v52 = vld [vmem:[%s14095_s25 + $0x90] ss:$8 sps:$4 sm:$0xff]   ;;  %v10364_v1 = vld [vmem:[%s14095_s25 + $0xd4] ss:$8 sps:$4 sm:$0xff]  }
 0x2e5   :  { %v1929_v46 = vadd.f32 %v11810_v42, %v1906_v38  ;;  %v1820_v0 = vadd.f32 %v11782_v30, %v1797_v4  ;;  %v1798_v61 = vmax.f32 %v1767_v19, %v1768_v22  ;;  %v10349_v50 = vld [vmem:[%s14095_s25 + $0x84] ss:$8 sps:$4 sm:$0xff]   ;;  %v10356_v62 = vld [vmem:[%s14095_s25 + $0xb0] ss:$8 sps:$4 sm:$0xff]   ;;  %v10359_v58 = vld [vmem:[%s14095_s25 + $0xc0] ss:$8 sps:$4 sm:$0xff]  }
 0x2e6   :  { %v10355_v33 = vld [vmem:[%s14095_s25 + $0xa4] ss:$8 sps:$4 sm:$0xff]   ;;  %v10362_v6 = vld [vmem:[%s14095_s25 + $0xd0] ss:$8 sps:$4 sm:$0xff]   ;;  %v10365_v4 = vld [vmem:[%s14095_s25 + $0xe0] ss:$8 sps:$4 sm:$0xff]  }
 0x2e7   :  { %v11967_v16 = vpack.c.bf16 %v1929_v46, %v1928_v54  ;;  %vm1836_vm15 = vcmp.ge.f32.partialorder %v1820_v0, 0.0  ;;  %v1852_v21 = vmul.f32 0.01, %v1820_v0  ;;  %v1821_v5 = vadd.f32 %v11782_v30, %v1798_v61  ;;  %v10322_v30 = vld [vmem:[%s14007_s1 + $0x8] sm:$0xff]  }
 0x2e8   :  { %v10361_v19 = vld [vmem:[%s14095_s25 + $0xc4] ss:$8 sps:$4 sm:$0xff]  }
 0x2e9   :  { %v1868_v14 = vsel %vm1836_vm15, %v1820_v0, %v1852_v21  ;;  %vm1837_vm1 = vcmp.ge.f32.partialorder %v1821_v5, 0.0  ;;  %v1853_v45 = vmul.f32 0.01, %v1821_v5  ;;  %v10367_v38 = vld [vmem:[%s14095_s25 + $0xe4] ss:$8 sps:$4 sm:$0xff]  }
 0x2ea   :  { %v1891_v12 = vmul.f32 %v11794_v37, %v1868_v14  ;;  %v10373_v43 = vld [vmem:[%s14095_s25 + $0x4] ss:$8 sps:$4 sm:$0xff]  }
 0x2eb   :  { %v1869_v24 = vsel %vm1837_vm1, %v1821_v5, %v1853_v45 }
 0x2ec   :  { %v1892_v13 = vmul.f32 %v11794_v37, %v1869_v24  ;;  %v1914_v57 = vadd.f32 %v11810_v42, %v1891_v12  ;;  %v10324_v37 = vld [vmem:[%s14007_s1 + $0x188] sm:$0xff]  }
 0x2ee   :  { %v1915_v48 = vadd.f32 %v11810_v42, %v1892_v13  ;;  %v10325_v42 = vld [vmem:[%s14007_s1 + $0x10] sm:$0xff]  }
 0x2f0   :  { %v11974_v18 = vpack.c.bf16 %v1915_v48, %v1914_v57 }
 0x2f2   :  { %9227 = vmatprep.subr.bf16.mxu1 %v11974_v18  ;;  %9419 = vmatprep.subr.bf16.mxu0 %v11974_v18 }
 0x2f3   :  { %9228 = vmatpush3.bf16.msra.mxu1 %v11974_v18  ;;  %9420 = vmatpush3.bf16.msra.mxu0 %v11974_v18 }
 0x2f4   :  { %9229 = vmatprep.subr.bf16.mxu1 %v11825_v40  ;;  %9421 = vmatprep.subr.bf16.mxu0 %v11825_v40 }
 0x2f7   :  { %9230 = vmatpush3.bf16.msra.mxu1 %v11825_v40  ;;  %9422 = vmatpush3.bf16.msra.mxu0 %v11825_v40 }
 0x2f8   :  { %9231 = vmatprep.subr.bf16.mxu1 %v11854_v35  ;;  %9423 = vmatprep.subr.bf16.mxu0 %v11854_v35 }
 0x2fb   :  { %9232 = vmatpush3.bf16.msra.mxu1 %v11854_v35  ;;  %9424 = vmatpush3.bf16.msra.mxu0 %v11854_v35 }
 0x2fc   :  { %9233 = vmatprep.subr.bf16.mxu1 %v11873_v34  ;;  %9425 = vmatprep.subr.bf16.mxu0 %v11873_v34 }
 0x2ff   :  { %9234 = vmatpush3.bf16.msra.mxu1 %v11873_v34  ;;  %9426 = vmatpush3.bf16.msra.mxu0 %v11873_v34 }
 0x300   :  { %9235 = vmatprep.subr.bf16.mxu1 %v11902_v55  ;;  %9427 = vmatprep.subr.bf16.mxu0 %v11902_v55 }
 0x303   :  { %9236 = vmatpush3.bf16.msra.mxu1 %v11902_v55  ;;  %9428 = vmatpush3.bf16.msra.mxu0 %v11902_v55 }
 0x304   :  { %9237 = vmatprep.subr.bf16.mxu1 %v11921_v27  ;;  %9429 = vmatprep.subr.bf16.mxu0 %v11921_v27 }
 0x307   :  { %9238 = vmatpush3.bf16.msra.mxu1 %v11921_v27  ;;  %9430 = vmatpush3.bf16.msra.mxu0 %v11921_v27 }
 0x308   :  { %9239 = vmatprep.subr.bf16.mxu1 %v11950_v20  ;;  %9431 = vmatprep.subr.bf16.mxu0 %v11950_v20 }
 0x30b   :  { %9240 = vmatpush3.bf16.msra.mxu1 %v11950_v20  ;;  %9432 = vmatpush3.bf16.msra.mxu0 %v11950_v20 }
 0x30c   :  { %9241 = vmatprep.subr.bf16.mxu1 %v11967_v16  ;;  %9433 = vmatprep.subr.bf16.mxu0 %v11967_v16 }
 0x30f   :  { %9242 = vmatpush3.bf16.msra.mxu1 %v11967_v16  ;;  %9434 = vmatpush3.bf16.msra.mxu0 %v11967_v16 }
 0x310   :  { %9259 = vmatprep.subr.bf16.mxu1 %v11974_v18  ;;  %9451 = vmatprep.subr.bf16.mxu0 %v11974_v18 }
 0x312   :  { %9244 = vmatmul.mubr.bf16.vlgmr.msra.gmra.mrb[28].mxu1 %v10322_v30  ;;  %9436 = vmatmul.mubr.bf16.vlgmr.msra.gmra.mrb[128].mxu0 %v10324_v37 }
 0x313   :  { %9260 = vmatpush3.bf16.msra.mxu1 %v11974_v18  ;;  %9452 = vmatpush3.bf16.msra.mxu0 %v11974_v18 }
 0x314   :  { %9261 = vmatprep.subr.bf16.mxu1 %v11825_v40  ;;  %9453 = vmatprep.subr.bf16.mxu0 %v11825_v40 }
 0x315   :  { %9247 = vmatprep.mubr.bf16.mxu1 %v10325_v42  ;;  %9439 = vmatprep.mubr.bf16.mxu0 %v10327_v59 }
 0x317   :  { %9262 = vmatpush3.bf16.msra.mxu1 %v11825_v40  ;;  %9454 = vmatpush3.bf16.msra.mxu0 %v11825_v40 }
 0x318   :  { %9263 = vmatprep.subr.bf16.mxu1 %v11854_v35  ;;  %9455 = vmatprep.subr.bf16.mxu0 %v11854_v35 }
 0x31a   :  { %9248 = vmatmul.mubr.bf16.gmra.mrb[32].mxu1 %v10326_v7  ;;  %9440 = vmatmul.mubr.bf16.gmra.mrb[132].mxu0 %v10328_v51 }
 0x31b   :  { %9264 = vmatpush3.bf16.msra.mxu1 %v11854_v35  ;;  %9456 = vmatpush3.bf16.msra.mxu0 %v11854_v35 }
 0x31c   :  { %9265 = vmatprep.subr.bf16.mxu1 %v11873_v34  ;;  %9457 = vmatprep.subr.bf16.mxu0 %v11873_v34 }
 0x31d   :  { %9251 = vmatprep.mubr.bf16.mxu1 %v10329_v8  ;;  %9443 = vmatprep.mubr.bf16.mxu0 %v10331_v29 }
 0x31f   :  { %9266 = vmatpush3.bf16.msra.mxu1 %v11873_v34  ;;  %9458 = vmatpush3.bf16.msra.mxu0 %v11873_v34 }
 0x320   :  { %9267 = vmatprep.subr.bf16.mxu1 %v11902_v55  ;;  %9459 = vmatprep.subr.bf16.mxu0 %v11902_v55 }
 0x322   :  { %9252 = vmatmul.mubr.bf16.gmra.mrb[36].mxu1 %v10330_v11  ;;  %9444 = vmatmul.mubr.bf16.gmra.mrb[136].mxu0 %v10332_v2 }
 0x323   :  { %9268 = vmatpush3.bf16.msra.mxu1 %v11902_v55  ;;  %9460 = vmatpush3.bf16.msra.mxu0 %v11902_v55 }
 0x324   :  { %9269 = vmatprep.subr.bf16.mxu1 %v11921_v27  ;;  %9461 = vmatprep.subr.bf16.mxu0 %v11921_v27 }
 0x325   :  { %9255 = vmatprep.mubr.bf16.mxu1 %v10333_v32  ;;  %9447 = vmatprep.mubr.bf16.mxu0 %v10335_v53 }
 0x327   :  { %9270 = vmatpush3.bf16.msra.mxu1 %v11921_v27  ;;  %9462 = vmatpush3.bf16.msra.mxu0 %v11921_v27 }
 0x328   :  { %9271 = vmatprep.subr.bf16.mxu1 %v11950_v20  ;;  %9463 = vmatprep.subr.bf16.mxu0 %v11950_v20 }
 0x32a   :  { %9256 = vmatmul.mubr.bf16.gmra.mrb[40].mxu1 %v10334_v60  ;;  %9448 = vmatmul.mubr.bf16.gmra.mrb[140].mxu0 %v10336_v3 }
 0x32b   :  { %9272 = vmatpush3.bf16.msra.mxu1 %v11950_v20  ;;  %9464 = vmatpush3.bf16.msra.mxu0 %v11950_v20 }
 0x32c   :  { %9273 = vmatprep.subr.bf16.mxu1 %v11967_v16  ;;  %9465 = vmatprep.subr.bf16.mxu0 %v11967_v16 }
 0x32d   :  { %9275 = vmatprep.mubr.bf16.mxu1 %v10337_v9  ;;  %9467 = vmatprep.mubr.bf16.mxu0 %v10339_v47  ;;  %v10371_v47 = vld [vmem:[%s14095_s25] ss:$8 sps:$4 sm:$0xff]  }
 0x32f   :  { %9274 = vmatpush3.bf16.msra.mxu1 %v11967_v16  ;;  %9466 = vmatpush3.bf16.msra.mxu0 %v11967_v16 }
 0x330   :  { %9483 = vmatprep.subr.bf16.mxu0 %v11974_v18  ;;  %2390 = vmatprep.subr.bf16.mxu1 %v10349_v50 }
 0x332   :  { %9276 = vmatmul.mubr.bf16.vlgmr.msra.gmra.mrb[44].mxu1 %v10338_v39  ;;  %9468 = vmatmul.mubr.bf16.vlgmr.msra.gmra.mrb[144].mxu0 %v10340_v28  ;;  %v10376_v28 = vld [vmem:[%s14095_s25 + $0x14] ss:$8 sps:$4 sm:$0xff]  }
 0x333   :  { %9484 = vmatpush3.bf16.msra.mxu0 %v11974_v18  ;;  %9279 = vmatprep.mubr.bf16.mxu1 %v10341_v26  ;;  %v10374_v26 = vld [vmem:[%s14095_s25 + $0x10] ss:$8 sps:$4 sm:$0xff]  }
 0x334   :  { %9485 = vmatprep.subr.bf16.mxu0 %v11825_v40  ;;  %2391 = vmatpush1.bf16.msra.mxu1 %v10347_v44 }
 0x335   :  { %2392 = vmatprep.subr.bf16.mxu1 %v10352_v23  ;;  %v10382_v23 = vld [vmem:[%s14095_s25 + $0x34] ss:$8 sps:$4 sm:$0xff]  }
 0x337   :  { %9486 = vmatpush3.bf16.msra.mxu0 %v11825_v40 }
 0x338   :  { %9487 = vmatprep.subr.bf16.mxu0 %v11854_v35  ;;  %2393 = vmatpush1.bf16.msra.mxu1 %v10350_v52 }
 0x339   :  { %2394 = vmatprep.subr.bf16.mxu1 %v10355_v33  ;;  %v10380_v33 = vld [vmem:[%s14095_s25 + $0x30] ss:$8 sps:$4 sm:$0xff]  }
 0x33a   :  { %9280 = vmatmul.mubr.bf16.gmra.mrb[48].mxu1 %v10342_v49  ;;  %v10379_v49 = vld [vmem:[%s14095_s25 + $0x24] ss:$8 sps:$4 sm:$0xff]  }
 0x33b   :  { %9488 = vmatpush3.bf16.msra.mxu0 %v11854_v35  ;;  %9283 = vmatprep.mubr.bf16.mxu1 %v10343_v56 }
 0x33c   :  { %9489 = vmatprep.subr.bf16.mxu0 %v11873_v34  ;;  %2395 = vmatpush1.bf16.msra.mxu1 %v10353_v63  ;;  %v10385_v63 = vld [vmem:[%s14095_s25 + $0x44] ss:$8 sps:$4 sm:$0xff]  }
 0x33d   :  { %2396 = vmatprep.subr.bf16.mxu1 %v10358_v15 }
 0x33f   :  { %9490 = vmatpush3.bf16.msra.mxu0 %v11873_v34 }
 0x340   :  { %9491 = vmatprep.subr.bf16.mxu0 %v11902_v55  ;;  %2397 = vmatpush1.bf16.msra.mxu1 %v10356_v62 }
 0x341   :  { %2398 = vmatprep.subr.bf16.mxu1 %v10361_v19 }
 0x342   :  { %9284 = vmatmul.mubr.bf16.gmra.mrb[52].mxu1 %v10344_v31 }
 0x343   :  { %9492 = vmatpush3.bf16.msra.mxu0 %v11902_v55  ;;  %9287 = vmatprep.mubr.bf16.mxu1 %v10345_v10 }
 0x344   :  { %9493 = vmatprep.subr.bf16.mxu0 %v11921_v27  ;;  %2399 = vmatpush1.bf16.msra.mxu1 %v10359_v58  ;;  %v10383_v58 = vld [vmem:[%s14095_s25 + $0x40] ss:$8 sps:$4 sm:$0xff]  }
 0x345   :  { %2400 = vmatprep.subr.bf16.mxu1 %v10364_v1 }
 0x347   :  { %9494 = vmatpush3.bf16.msra.mxu0 %v11921_v27 }
 0x348   :  { %9495 = vmatprep.subr.bf16.mxu0 %v11950_v20  ;;  %2401 = vmatpush1.bf16.msra.mxu1 %v10362_v6 }
 0x349   :  { %2402 = vmatprep.subr.bf16.mxu1 %v10367_v38  ;;  %v10388_v38 = vld [vmem:[%s14095_s25 + $0x54] ss:$8 sps:$4 sm:$0xff]  }
 0x34a   :  { %9288 = vmatmul.mubr.bf16.gmra.mrb[56].mxu1 %v10346_v41  ;;  %v10377_v41 = vld [vmem:[%s14095_s25 + $0x20] ss:$8 sps:$4 sm:$0xff]  }
 0x34b   :  { %9496 = vmatpush3.bf16.msra.mxu0 %v11950_v20  ;;  %2422 = vmatprep.mubr.bf16.mxu1 %v14094_v25 }
 0x34c   :  { %9497 = vmatprep.subr.bf16.mxu0 %v11967_v16  ;;  %2403 = vmatpush1.bf16.msra.mxu1 %v10365_v4 }
 0x34d   :  { %2404 = vmatprep.subr.bf16.mxu1 %v10370_v17  ;;  %v10386_v17 = vld [vmem:[%s14095_s25 + $0x50] ss:$8 sps:$4 sm:$0xff]  }
 0x34f   :  { %9498 = vmatpush3.bf16.msra.mxu0 %v11967_v16 }
 0x350   :  { %2405 = vmatpush1.bf16.msra.mxu1 %v10368_v36  ;;  %v10391_v36 = vld [vmem:[%s14095_s25 + $0x64] ss:$8 sps:$4 sm:$0xff]  }
 0x351   :  { %2583 = vmatprep.subr.bf16.mxu1 %v10373_v43 }
 0x3e5   :  { %v12180_v22 = vpop.f32.mrb[28].mxu1 }
 0x3e6   :  { %v12182_v54 = vpop.f32.mrb[29].mxu1 }
 0x3e7   :  { %v12184_v46 = vpop.f32.mrb[30].mxu1 }
 0x3e8   :  { %v2100_v0 = vpack.c.bf16 %v12184_v46, %v12180_v22  ;;  %v12188_v61 = vpop.f32.mrb[31].mxu1  ;;  %v10398_v22 = vld [vmem:[%s14095_s25 + $0x104] ss:$8 sps:$4 sm:$0xff]  }
 0x3e9   :  { %v2099_v21 = vpack.c.bf16 %v12188_v61, %v12182_v54  ;;  %v10395_v54 = vld [vmem:[%s14007_s1 + $0x80] sm:$0xff]   ;;  %v10399_v46 = vld [vmem:[%s14007_s1 + $0x88] sm:$0xff]   ;;  %v10409_v61 = vld [vmem:[%s14007_s1 + $0x90] sm:$0xff]  }
 0x3ed   :  { %v12192_v5 = vpop.f32.mrb[32].mxu1 }
 0x3ee   :  { %v12194_v14 = vpop.f32.mrb[33].mxu1 }
 0x3ef   :  { %v12196_v45 = vpop.f32.mrb[34].mxu1 }
 0x3f0   :  { %v2102_v12 = vpack.c.bf16 %v12196_v45, %v12192_v5  ;;  %v12200_v24 = vpop.f32.mrb[35].mxu1  ;;  %v10400_v5 = vld [vmem:[%s14095_s25 + $0x110] ss:$8 sps:$4 sm:$0xff]  }
 0x3f1   :  { %v2101_v13 = vpack.c.bf16 %v12200_v24, %v12194_v14  ;;  %v10405_v14 = vld [vmem:[%s14095_s25 + $0x124] ss:$8 sps:$4 sm:$0xff]   ;;  %v10413_v45 = vld [vmem:[%s14007_s1 + $0x98] sm:$0xff]  }
 0x3f2   :  { %v10423_v24 = vld [vmem:[%s14007_s1 + $0xa0] sm:$0xff]  }
 0x3f5   :  { %v12204_v57 = vpop.f32.mrb[36].mxu1 }
 0x3f6   :  { %v12206_v48 = vpop.f32.mrb[37].mxu1 }
 0x3f7   :  { %v12208_v30 = vpop.f32.mrb[38].mxu1 }
 0x3f8   :  { %v2104_v37 = vpack.c.bf16 %v12208_v30, %v12204_v57  ;;  %v12212_v42 = vpop.f32.mrb[39].mxu1  ;;  %v10406_v57 = vld [vmem:[%s14095_s25 + $0x130] ss:$8 sps:$4 sm:$0xff]   ;;  %v10424_v30 = vld [vmem:[%s14007_s1 + $0xa8] sm:$0xff]  }
 0x3f9   :  { %v2103_v59 = vpack.c.bf16 %v12212_v42, %v12206_v48  ;;  %v10412_v48 = vld [vmem:[%s14095_s25 + $0x144] ss:$8 sps:$4 sm:$0xff]   ;;  %v10425_v42 = vld [vmem:[%s14007_s1 + $0xb0] sm:$0xff]  }
 0x3fd   :  { %v12216_v7 = vpop.f32.mrb[40].mxu1 }
 0x3fe   :  { %v12218_v51 = vpop.f32.mrb[41].mxu1 }
 0x3ff   :  { %v12220_v8 = vpop.f32.mrb[42].mxu1 }
 0x400   :  { %v2106_v29 = vpack.c.bf16 %v12220_v8, %v12216_v7  ;;  %v12224_v11 = vpop.f32.mrb[43].mxu1  ;;  %v10414_v7 = vld [vmem:[%s14095_s25 + $0x150] ss:$8 sps:$4 sm:$0xff]  }
 0x401   :  { %v2105_v2 = vpack.c.bf16 %v12224_v11, %v12218_v51  ;;  %v10419_v51 = vld [vmem:[%s14095_s25 + $0x164] ss:$8 sps:$4 sm:$0xff]   ;;  %v10426_v8 = vld [vmem:[%s14007_s1 + $0xb8] sm:$0xff]  }
 0x402   :  { %v10422_v11 = vld [vmem:[%s14095_s25 + $0x174] ss:$8 sps:$4 sm:$0xff]  }
 0x405   :  { %v9277_v32 = vpop.f32.mrb[44].mxu1 }
 0x406   :  { %v2222_v53 = vpop.f32.mrb[45].mxu1 }
 0x407   :  { %v9278_v60 = vpop.f32.mrb[46].mxu1 }
 0x408   :  { %v2286_v3 = vpack.c.bf16 %v9278_v60, %v9277_v32  ;;  %v2225_v9 = vpop.f32.mrb[47].mxu1  ;;  %v10389_v60 = vld [vmem:[%s14095_s25 + $0x60] ss:$8 sps:$4 sm:$0xff]  }
 0x409   :  { %v2285_v39 = vpack.c.bf16 %v2225_v9, %v2222_v53 }
 0x40b   :  { %2423 = vmatmul.mubr.bf16.vlgmr.msra.gmra.mrb[60].mxu1 %v2285_v39 }
 0x40c   :  { %2584 = vmatpush1.bf16.msra.mxu1 %v10371_v47  ;;  %2432 = vmatprep.mubr.bf16.mxu1 %v14094_v25  ;;  %v10394_v47 = vld [vmem:[%s14095_s25 + $0x74] ss:$8 sps:$4 sm:$0xff]  }
 0x40d   :  { %2585 = vmatprep.subr.bf16.mxu1 %v10376_v28  ;;  %v9281_v56 = vpop.f32.mrb[48].mxu1  ;;  %v10392_v28 = vld [vmem:[%s14095_s25 + $0x70] ss:$8 sps:$4 sm:$0xff]  }
 0x40e   :  { %v2238_v31 = vpop.f32.mrb[49].mxu1 }
 0x40f   :  { %v9282_v10 = vpop.f32.mrb[50].mxu1 }
 0x410   :  { %2586 = vmatpush1.bf16.msra.mxu1 %v10374_v26  ;;  %v2288_v50 = vpack.c.bf16 %v9282_v10, %v9281_v56  ;;  %v2241_v44 = vpop.f32.mrb[51].mxu1 }
 0x411   :  { %2587 = vmatprep.subr.bf16.mxu1 %v10379_v49  ;;  %v2287_v52 = vpack.c.bf16 %v2241_v44, %v2238_v31 }
 0x413   :  { %2433 = vmatmul.mubr.bf16.gmra.mrb[64].mxu1 %v2286_v3 }
 0x414   :  { %2588 = vmatpush1.bf16.msra.mxu1 %v10377_v41  ;;  %2442 = vmatprep.mubr.bf16.mxu1 %v14094_v25 }
 0x415   :  { %2589 = vmatprep.subr.bf16.mxu1 %v10382_v23  ;;  %v9285_v15 = vpop.f32.mrb[52].mxu1 }
 0x416   :  { %v2254_v62 = vpop.f32.mrb[53].mxu1 }
 0x417   :  { %v9286_v19 = vpop.f32.mrb[54].mxu1 }
 0x418   :  { %2590 = vmatpush1.bf16.msra.mxu1 %v10380_v33  ;;  %v2290_v1 = vpack.c.bf16 %v9286_v19, %v9285_v15  ;;  %v2257_v6 = vpop.f32.mrb[55].mxu1 }
 0x419   :  { %2591 = vmatprep.subr.bf16.mxu1 %v10385_v63  ;;  %v2289_v4 = vpack.c.bf16 %v2257_v6, %v2254_v62 }
 0x41b   :  { %2443 = vmatmul.mubr.bf16.gmra.mrb[68].mxu1 %v2287_v52 }
 0x41c   :  { %2592 = vmatpush1.bf16.msra.mxu1 %v10383_v58  ;;  %2452 = vmatprep.mubr.bf16.mxu1 %v14094_v25 }
 0x41d   :  { %2593 = vmatprep.subr.bf16.mxu1 %v10388_v38  ;;  %v9289_v43 = vpop.f32.mrb[56].mxu1 }
 0x41e   :  { %v2270_v32 = vpop.f32.mrb[57].mxu1 }
 0x41f   :  { %v9290_v53 = vpop.f32.mrb[58].mxu1 }
 0x420   :  { %2594 = vmatpush1.bf16.msra.mxu1 %v10386_v17  ;;  %v2292_v3 = vpack.c.bf16 %v9290_v53, %v9289_v43  ;;  %v2273_v9 = vpop.f32.mrb[59].mxu1  ;;  %v10430_v53 = vld [vmem:[%s14095_s25 + $0x184] ss:$8 sps:$4 sm:$0xff]  }
 0x421   :  { %2595 = vmatprep.subr.bf16.mxu1 %v10391_v36  ;;  %v2291_v39 = vpack.c.bf16 %v2273_v9, %v2270_v32  ;;  %v10428_v9 = vld [vmem:[%s14095_s25 + $0x180] ss:$8 sps:$4 sm:$0xff]  }
 0x423   :  { %2453 = vmatmul.mubr.bf16.gmra.mrb[72].mxu1 %v2288_v50 }
 0x424   :  { %2596 = vmatpush1.bf16.msra.mxu1 %v10389_v60  ;;  %2462 = vmatprep.mubr.bf16.mxu1 %v14094_v25  ;;  %v10427_v60 = vld [vmem:[%s14007_s1 + $0xc0] sm:$0xff]  }
 0x425   :  { %2597 = vmatprep.subr.bf16.mxu1 %v10394_v47  ;;  %v10441_v47 = vld [vmem:[%s14007_s1 + $0xd0] sm:$0xff]  }
 0x428   :  { %2598 = vmatpush1.bf16.msra.mxu1 %v10392_v28  ;;  %v10432_v28 = vld [vmem:[%s14095_s25 + $0x190] ss:$8 sps:$4 sm:$0xff]  }
 0x429   :  { %9291 = vmatprep.subr.bf16.mxu1 %v11974_v18 }
 0x42b   :  { %2463 = vmatmul.mubr.bf16.gmra.mrb[76].mxu1 %v2289_v4 }
 0x42c   :  { %2472 = vmatprep.mubr.bf16.mxu1 %v14094_v25 }
 0x433   :  { %2473 = vmatmul.mubr.bf16.gmra.mrb[80].mxu1 %v2290_v1 }
 0x434   :  { %2482 = vmatprep.mubr.bf16.mxu1 %v14094_v25 }
 0x43b   :  { %2483 = vmatmul.mubr.bf16.gmra.mrb[84].mxu1 %v2291_v39  ;;  %v10434_v39 = vld [vmem:[%s14095_s25 + $0x194] ss:$8 sps:$4 sm:$0xff]  }
 0x43c   :  { %2492 = vmatprep.mubr.bf16.mxu1 %v14094_v25 }
 0x443   :  { %2493 = vmatmul.mubr.bf16.gmra.mrb[88].mxu1 %v2292_v3  ;;  %v10431_v3 = vld [vmem:[%s14007_s1 + $0xc8] sm:$0xff]  }
 0x444   :  { %2615 = vmatprep.mubr.bf16.mxu1 %v14094_v25 }
 0x44b   :  { %2616 = vmatmul.mubr.bf16.vlgmr.msra.gmra.mrb[60].mxu1 %v2099_v21  ;;  %v10402_v21 = vld [vmem:[%s14095_s25 + $0x114] ss:$8 sps:$4 sm:$0xff]  }
 0x44c   :  { %9292 = vmatpush3.bf16.msra.mxu1 %v11974_v18  ;;  %2625 = vmatprep.mubr.bf16.mxu1 %v14094_v25 }
 0x44d   :  { %9293 = vmatprep.subr.bf16.mxu1 %v11825_v40 }
 0x450   :  { %9294 = vmatpush3.bf16.msra.mxu1 %v11825_v40 }
 0x451   :  { %9295 = vmatprep.subr.bf16.mxu1 %v11854_v35 }
 0x453   :  { %2626 = vmatmul.mubr.bf16.gmra.mrb[64].mxu1 %v2100_v0  ;;  %v10396_v0 = vld [vmem:[%s14095_s25 + $0x100] ss:$8 sps:$4 sm:$0xff]  }
 0x454   :  { %9296 = vmatpush3.bf16.msra.mxu1 %v11854_v35  ;;  %2635 = vmatprep.mubr.bf16.mxu1 %v14094_v25 }
 0x455   :  { %9297 = vmatprep.subr.bf16.mxu1 %v11873_v34 }
 0x458   :  { %9298 = vmatpush3.bf16.msra.mxu1 %v11873_v34 }
 0x459   :  { %9299 = vmatprep.subr.bf16.mxu1 %v11902_v55 }
 0x45b   :  { %2636 = vmatmul.mubr.bf16.gmra.mrb[68].mxu1 %v2101_v13  ;;  %v10408_v13 = vld [vmem:[%s14095_s25 + $0x134] ss:$8 sps:$4 sm:$0xff]  }
 0x45c   :  { %9300 = vmatpush3.bf16.msra.mxu1 %v11902_v55  ;;  %2645 = vmatprep.mubr.bf16.mxu1 %v14094_v25 }
 0x45d   :  { %9301 = vmatprep.subr.bf16.mxu1 %v11921_v27 }
 0x460   :  { %9302 = vmatpush3.bf16.msra.mxu1 %v11921_v27 }
 0x461   :  { %9303 = vmatprep.subr.bf16.mxu1 %v11950_v20 }
 0x463   :  { %2646 = vmatmul.mubr.bf16.gmra.mrb[72].mxu1 %v2102_v12  ;;  %v10403_v12 = vld [vmem:[%s14095_s25 + $0x120] ss:$8 sps:$4 sm:$0xff]  }
 0x464   :  { %9304 = vmatpush3.bf16.msra.mxu1 %v11950_v20  ;;  %2655 = vmatprep.mubr.bf16.mxu1 %v14094_v25 }
 0x465   :  { %9305 = vmatprep.subr.bf16.mxu1 %v11967_v16 }
 0x468   :  { %9306 = vmatpush3.bf16.msra.mxu1 %v11967_v16 }
 0x469   :  { %2963 = vmatprep.subr.bf16.mxu1 %v10398_v22  ;;  %v10437_v22 = vld [vmem:[%s14095_s25 + $0x1a4] ss:$8 sps:$4 sm:$0xff]  }
 0x46b   :  { %2656 = vmatmul.mubr.bf16.gmra.mrb[76].mxu1 %v2103_v59  ;;  %v10416_v59 = vld [vmem:[%s14095_s25 + $0x154] ss:$8 sps:$4 sm:$0xff]  }
 0x46c   :  { %2665 = vmatprep.mubr.bf16.mxu1 %v14094_v25 }
 0x473   :  { %2666 = vmatmul.mubr.bf16.gmra.mrb[80].mxu1 %v2104_v37  ;;  %v10410_v37 = vld [vmem:[%s14095_s25 + $0x140] ss:$8 sps:$4 sm:$0xff]  }
 0x474   :  { %2675 = vmatprep.mubr.bf16.mxu1 %v14094_v25 }
 0x47b   :  { %2676 = vmatmul.mubr.bf16.gmra.mrb[84].mxu1 %v2105_v2  ;;  %v10420_v2 = vld [vmem:[%s14095_s25 + $0x170] ss:$8 sps:$4 sm:$0xff]  }
 0x47c   :  { %2685 = vmatprep.mubr.bf16.mxu1 %v14094_v25 }
 0x483   :  { %2686 = vmatmul.mubr.bf16.gmra.mrb[88].mxu1 %v2106_v29  ;;  %v10417_v29 = vld [vmem:[%s14095_s25 + $0x160] ss:$8 sps:$4 sm:$0xff]  }
 0x484   :  { %9307 = vmatprep.mubr.bf16.mxu1 %v10395_v54  ;;  %v10445_v54 = vld [vmem:[%s14007_s1 + $0xd8] sm:$0xff]  }
 0x48b   :  { %9308 = vmatmul.mubr.bf16.vlgmr.msra.gmra.mrb[92].mxu1 %v10399_v46  ;;  %v10435_v46 = vld [vmem:[%s14095_s25 + $0x1a0] ss:$8 sps:$4 sm:$0xff]  }
 0x48c   :  { %2964 = vmatpush1.bf16.msra.mxu1 %v10396_v0  ;;  %9311 = vmatprep.mubr.bf16.mxu1 %v10409_v61  ;;  %v10455_v0 = vld [vmem:[%s14007_s1 + $0xe0] sm:$0xff]   ;;  %v10440_v61 = vld [vmem:[%s14095_s25 + $0x1b4] ss:$8 sps:$4 sm:$0xff]  }
 0x48d   :  { %2965 = vmatprep.subr.bf16.mxu1 %v10402_v21  ;;  %v10438_v21 = vld [vmem:[%s14095_s25 + $0x1b0] ss:$8 sps:$4 sm:$0xff]  }
 0x490   :  { %2966 = vmatpush1.bf16.msra.mxu1 %v10400_v5  ;;  %v10444_v5 = vld [vmem:[%s14095_s25 + $0x1c4] ss:$8 sps:$4 sm:$0xff]  }
 0x491   :  { %2967 = vmatprep.subr.bf16.mxu1 %v10405_v14  ;;  %v10456_v14 = vld [vmem:[%s14007_s1 + $0xe8] sm:$0xff]  }
 0x493   :  { %9312 = vmatmul.mubr.bf16.gmra.mrb[96].mxu1 %v10413_v45  ;;  %v10442_v45 = vld [vmem:[%s14095_s25 + $0x1c0] ss:$8 sps:$4 sm:$0xff]  }
 0x494   :  { %2968 = vmatpush1.bf16.msra.mxu1 %v10403_v12  ;;  %9315 = vmatprep.mubr.bf16.mxu1 %v10423_v24  ;;  %v10457_v12 = vld [vmem:[%s14007_s1 + $0xf0] sm:$0xff]  }
 0x495   :  { %2969 = vmatprep.subr.bf16.mxu1 %v10408_v13  ;;  %v10448_v24 = vld [vmem:[%s14095_s25 + $0x1d4] ss:$8 sps:$4 sm:$0xff]   ;;  %v10446_v13 = vld [vmem:[%s14095_s25 + $0x1d0] ss:$8 sps:$4 sm:$0xff]  }
 0x498   :  { %2970 = vmatpush1.bf16.msra.mxu1 %v10406_v57  ;;  %v10451_v57 = vld [vmem:[%s14095_s25 + $0x1e4] ss:$8 sps:$4 sm:$0xff]  }
 0x499   :  { %2971 = vmatprep.subr.bf16.mxu1 %v10412_v48  ;;  %v10458_v48 = vld [vmem:[%s14007_s1 + $0xf8] sm:$0xff]  }
 0x49b   :  { %9316 = vmatmul.mubr.bf16.gmra.mrb[100].mxu1 %v10424_v30  ;;  %v10449_v30 = vld [vmem:[%s14095_s25 + $0x1e0] ss:$8 sps:$4 sm:$0xff]  }
 0x49c   :  { %2972 = vmatpush1.bf16.msra.mxu1 %v10410_v37  ;;  %9319 = vmatprep.mubr.bf16.mxu1 %v10425_v42  ;;  %v10454_v37 = vld [vmem:[%s14095_s25 + $0x1f4] ss:$8 sps:$4 sm:$0xff]   ;;  %v10452_v42 = vld [vmem:[%s14095_s25 + $0x1f0] ss:$8 sps:$4 sm:$0xff]  }
 0x49d   :  { %2973 = vmatprep.subr.bf16.mxu1 %v10416_v59 }
 0x4a0   :  { %2974 = vmatpush1.bf16.msra.mxu1 %v10414_v7 }
 0x4a1   :  { %2975 = vmatprep.subr.bf16.mxu1 %v10419_v51 }
 0x4a3   :  { %9320 = vmatmul.mubr.bf16.gmra.mrb[104].mxu1 %v10426_v8 }
 0x4a4   :  { %2976 = vmatpush1.bf16.msra.mxu1 %v10417_v29  ;;  %2995 = vmatprep.mubr.bf16.mxu1 %v14094_v25 }
 0x4a5   :  { %2977 = vmatprep.subr.bf16.mxu1 %v10422_v11 }
 0x4a8   :  { %2978 = vmatpush1.bf16.msra.mxu1 %v10420_v2 }
 0x4a9   :  { %9323 = vmatprep.subr.bf16.mxu1 %v11974_v18 }
 0x55e   :  { %v9309_v26 = vpop.f32.mrb[92].mxu1 }
 0x55f   :  { %v2795_v49 = vpop.f32.mrb[93].mxu1 }
 0x560   :  { %v9310_v56 = vpop.f32.mrb[94].mxu1 }
 0x561   :  { %v2859_v31 = vpack.c.bf16 %v9310_v56, %v9309_v26  ;;  %v2798_v10 = vpop.f32.mrb[95].mxu1 }
 0x562   :  { %v2858_v41 = vpack.c.bf16 %v2798_v10, %v2795_v49 }
 0x564   :  { %2996 = vmatmul.mubr.bf16.vlgmr.msra.gmra.mrb[60].mxu1 %v2858_v41 }
 0x565   :  { %9324 = vmatpush3.bf16.msra.mxu1 %v11974_v18  ;;  %3005 = vmatprep.mubr.bf16.mxu1 %v14094_v25 }
 0x566   :  { %9325 = vmatprep.subr.bf16.mxu1 %v11825_v40  ;;  %v9313_v50 = vpop.f32.mrb[96].mxu1 }
 0x567   :  { %v2811_v44 = vpop.f32.mrb[97].mxu1 }
 0x568   :  { %v9314_v23 = vpop.f32.mrb[98].mxu1 }
 0x569   :  { %9326 = vmatpush3.bf16.msra.mxu1 %v11825_v40  ;;  %v2861_v52 = vpack.c.bf16 %v9314_v23, %v9313_v50  ;;  %v2814_v33 = vpop.f32.mrb[99].mxu1 }
 0x56a   :  { %9327 = vmatprep.subr.bf16.mxu1 %v11854_v35  ;;  %v2860_v63 = vpack.c.bf16 %v2814_v33, %v2811_v44 }
 0x56c   :  { %3006 = vmatmul.mubr.bf16.gmra.mrb[64].mxu1 %v2859_v31 }
 0x56d   :  { %9328 = vmatpush3.bf16.msra.mxu1 %v11854_v35  ;;  %3015 = vmatprep.mubr.bf16.mxu1 %v14094_v25 }
 0x56e   :  { %9329 = vmatprep.subr.bf16.mxu1 %v11873_v34  ;;  %v9317_v15 = vpop.f32.mrb[100].mxu1 }
 0x56f   :  { %v2827_v62 = vpop.f32.mrb[101].mxu1 }
 0x570   :  { %v9318_v19 = vpop.f32.mrb[102].mxu1 }
 0x571   :  { %9330 = vmatpush3.bf16.msra.mxu1 %v11873_v34  ;;  %v2863_v58 = vpack.c.bf16 %v9318_v19, %v9317_v15  ;;  %v2830_v1 = vpop.f32.mrb[103].mxu1 }
 0x572   :  { %9331 = vmatprep.subr.bf16.mxu1 %v11902_v55  ;;  %v2862_v6 = vpack.c.bf16 %v2830_v1, %v2827_v62 }
 0x574   :  { %3016 = vmatmul.mubr.bf16.gmra.mrb[68].mxu1 %v2860_v63 }
 0x575   :  { %9332 = vmatpush3.bf16.msra.mxu1 %v11902_v55  ;;  %3025 = vmatprep.mubr.bf16.mxu1 %v14094_v25 }
 0x576   :  { %9333 = vmatprep.subr.bf16.mxu1 %v11921_v27  ;;  %v9321_v38 = vpop.f32.mrb[104].mxu1 }
 0x577   :  { %v2843_v4 = vpop.f32.mrb[105].mxu1 }
 0x578   :  { %v9322_v17 = vpop.f32.mrb[106].mxu1 }
 0x579   :  { %9334 = vmatpush3.bf16.msra.mxu1 %v11921_v27  ;;  %v2865_v36 = vpack.c.bf16 %v9322_v17, %v9321_v38  ;;  %v2846_v43 = vpop.f32.mrb[107].mxu1  ;;  %v10459_v38 = vld [vmem:[%s14007_s1 + $0x100] sm:$0xff]  }
 0x57a   :  { %9335 = vmatprep.subr.bf16.mxu1 %v11950_v20  ;;  %v2864_v32 = vpack.c.bf16 %v2846_v43, %v2843_v4  ;;  %v10463_v4 = vld [vmem:[%s14007_s1 + $0x108] sm:$0xff]   ;;  %v10466_v43 = vld [vmem:[%s14095_s25 + $0x214] ss:$8 sps:$4 sm:$0xff]  }
 0x57b   :  { %v10460_v17 = vld [vmem:[%s14095_s25 + $0x200] ss:$8 sps:$4 sm:$0xff]  }
 0x57c   :  { %3026 = vmatmul.mubr.bf16.gmra.mrb[72].mxu1 %v2861_v52 }
 0x57d   :  { %9336 = vmatpush3.bf16.msra.mxu1 %v11950_v20  ;;  %3035 = vmatprep.mubr.bf16.mxu1 %v14094_v25 }
 0x57e   :  { %9337 = vmatprep.subr.bf16.mxu1 %v11967_v16 }
 0x581   :  { %9338 = vmatpush3.bf16.msra.mxu1 %v11967_v16 }
 0x582   :  { %3375 = vmatprep.subr.bf16.mxu1 %v10430_v53  ;;  %v10469_v53 = vld [vmem:[%s14095_s25 + $0x224] ss:$8 sps:$4 sm:$0xff]  }
 0x584   :  { %3036 = vmatmul.mubr.bf16.gmra.mrb[76].mxu1 %v2862_v6  ;;  %v10462_v6 = vld [vmem:[%s14095_s25 + $0x204] ss:$8 sps:$4 sm:$0xff]  }
 0x585   :  { %3045 = vmatprep.mubr.bf16.mxu1 %v14094_v25 }
 0x58c   :  { %3046 = vmatmul.mubr.bf16.gmra.mrb[80].mxu1 %v2863_v58 }
 0x58d   :  { %3055 = vmatprep.mubr.bf16.mxu1 %v14094_v25 }
 0x594   :  { %3056 = vmatmul.mubr.bf16.gmra.mrb[84].mxu1 %v2864_v32  ;;  %v10464_v32 = vld [vmem:[%s14095_s25 + $0x210] ss:$8 sps:$4 sm:$0xff]  }
 0x595   :  { %3065 = vmatprep.mubr.bf16.mxu1 %v14094_v25 }
 0x59c   :  { %3066 = vmatmul.mubr.bf16.gmra.mrb[88].mxu1 %v2865_v36  ;;  %v10473_v36 = vld [vmem:[%s14007_s1 + $0x110] sm:$0xff]  }
 0x59d   :  { %9339 = vmatprep.mubr.bf16.mxu1 %v10427_v60  ;;  %v10477_v60 = vld [vmem:[%s14007_s1 + $0x118] sm:$0xff]  }
 0x5a4   :  { %9340 = vmatmul.mubr.bf16.vlgmr.msra.gmra.mrb[108].mxu1 %v10431_v3  ;;  %v10467_v3 = vld [vmem:[%s14095_s25 + $0x220] ss:$8 sps:$4 sm:$0xff]  }
 0x5a5   :  { %3376 = vmatpush1.bf16.msra.mxu1 %v10428_v9  ;;  %9343 = vmatprep.mubr.bf16.mxu1 %v10441_v47  ;;  %v10487_v9 = vld [vmem:[%s14007_s1 + $0x120] sm:$0xff]   ;;  %v10472_v47 = vld [vmem:[%s14095_s25 + $0x234] ss:$8 sps:$4 sm:$0xff]  }
 0x5a6   :  { %3377 = vmatprep.subr.bf16.mxu1 %v10434_v39  ;;  %v10470_v39 = vld [vmem:[%s14095_s25 + $0x230] ss:$8 sps:$4 sm:$0xff]  }
 0x5a9   :  { %3378 = vmatpush1.bf16.msra.mxu1 %v10432_v28  ;;  %v10476_v28 = vld [vmem:[%s14095_s25 + $0x244] ss:$8 sps:$4 sm:$0xff]  }
 0x5aa   :  { %3379 = vmatprep.subr.bf16.mxu1 %v10437_v22  ;;  %v10488_v22 = vld [vmem:[%s14007_s1 + $0x128] sm:$0xff]  }
 0x5ac   :  { %9344 = vmatmul.mubr.bf16.gmra.mrb[112].mxu1 %v10445_v54  ;;  %v10474_v54 = vld [vmem:[%s14095_s25 + $0x240] ss:$8 sps:$4 sm:$0xff]  }
 0x5ad   :  { %3380 = vmatpush1.bf16.msra.mxu1 %v10435_v46  ;;  %9347 = vmatprep.mubr.bf16.mxu1 %v10455_v0  ;;  %v10489_v46 = vld [vmem:[%s14007_s1 + $0x130] sm:$0xff]  }
 0x5ae   :  { %3381 = vmatprep.subr.bf16.mxu1 %v10440_v61  ;;  %v10480_v0 = vld [vmem:[%s14095_s25 + $0x254] ss:$8 sps:$4 sm:$0xff]   ;;  %v10478_v61 = vld [vmem:[%s14095_s25 + $0x250] ss:$8 sps:$4 sm:$0xff]  }
 0x5b1   :  { %3382 = vmatpush1.bf16.msra.mxu1 %v10438_v21  ;;  %v10483_v21 = vld [vmem:[%s14095_s25 + $0x264] ss:$8 sps:$4 sm:$0xff]  }
 0x5b2   :  { %3383 = vmatprep.subr.bf16.mxu1 %v10444_v5  ;;  %v10490_v5 = vld [vmem:[%s14007_s1 + $0x138] sm:$0xff]  }
 0x5b4   :  { %9348 = vmatmul.mubr.bf16.gmra.mrb[116].mxu1 %v10456_v14  ;;  %v10481_v14 = vld [vmem:[%s14095_s25 + $0x260] ss:$8 sps:$4 sm:$0xff]  }
 0x5b5   :  { %3384 = vmatpush1.bf16.msra.mxu1 %v10442_v45  ;;  %9351 = vmatprep.mubr.bf16.mxu1 %v10457_v12  ;;  %v10486_v45 = vld [vmem:[%s14095_s25 + $0x274] ss:$8 sps:$4 sm:$0xff]   ;;  %v10484_v12 = vld [vmem:[%s14095_s25 + $0x270] ss:$8 sps:$4 sm:$0xff]  }
 0x5b6   :  { %3385 = vmatprep.subr.bf16.mxu1 %v10448_v24  ;;  %v10499_v24 = vld [vmem:[%s14007_s1 + $0x1d0] sm:$0xff]  }
 0x5b7   :  { %9471 = vmatprep.mubr.bf16.mxu0 %v10499_v24  ;;  %v12734_v24 = vpop.f32.mrb[128].mxu0 }
 0x5b9   :  { %3386 = vmatpush1.bf16.msra.mxu1 %v10446_v13  ;;  %v10500_v13 = vld [vmem:[%s14007_s1 + $0x1d8] sm:$0xff]  }
 0x5ba   :  { %3387 = vmatprep.subr.bf16.mxu1 %v10451_v57  ;;  %v10501_v57 = vld [vmem:[%s14007_s1 + $0x1e0] sm:$0xff]   ;;  %9472 = vmatmul.mubr.bf16.gmra.mrb[148].mxu0 %v10500_v13  ;;  %v12736_v13 = vpop.f32.mrb[129].mxu0 }
 0x5bb   :  { %9475 = vmatprep.mubr.bf16.mxu0 %v10501_v57  ;;  %v12738_v57 = vpop.f32.mrb[130].mxu0 }
 0x5bc   :  { %9352 = vmatmul.mubr.bf16.gmra.mrb[120].mxu1 %v10458_v48  ;;  %v10502_v48 = vld [vmem:[%s14007_s1 + $0x1e8] sm:$0xff]  }
 0x5bd   :  { %3388 = vmatpush1.bf16.msra.mxu1 %v10449_v30  ;;  %3407 = vmatprep.mubr.bf16.mxu1 %v14094_v25  ;;  %v10503_v30 = vld [vmem:[%s14007_s1 + $0x1f0] sm:$0xff]  }
 0x5be   :  { %3389 = vmatprep.subr.bf16.mxu1 %v10454_v37  ;;  %v10504_v37 = vld [vmem:[%s14007_s1 + $0x1f8] sm:$0xff]  }
 0x5c1   :  { %3390 = vmatpush1.bf16.msra.mxu1 %v10452_v42  ;;  %v10511_v42 = vld [vmem:[%s14007_s1 + $0x200] sm:$0xff]  }
 0x5c2   :  { %9355 = vmatprep.subr.bf16.mxu1 %v11974_v18  ;;  %9476 = vmatmul.mubr.bf16.gmra.mrb[152].mxu0 %v10502_v48  ;;  %v4507_v48 = vpack.c.bf16 %v12738_v57, %v12734_v24 }
 0x5c3   :  { %9479 = vmatprep.mubr.bf16.mxu0 %v10503_v30  ;;  %v12742_v30 = vpop.f32.mrb[131].mxu0 }
 0x5ca   :  { %9480 = vmatmul.mubr.bf16.gmra.mrb[156].mxu0 %v10504_v37  ;;  %v4506_v37 = vpack.c.bf16 %v12742_v30, %v12736_v13  ;;  %v10572_v13 = vld [vmem:[%s14095_s25 + $0x3b4] ss:$8 sps:$4 sm:$0xff]  }
 0x5cb   :  { %9499 = vmatprep.mubr.bf16.mxu0 %v10511_v42  ;;  %v12746_v42 = vpop.f32.mrb[132].mxu0 }
 0x677   :  { %v9341_v59 = vpop.f32.mrb[108].mxu1 }
 0x678   :  { %v3207_v7 = vpop.f32.mrb[109].mxu1 }
 0x679   :  { %v9342_v51 = vpop.f32.mrb[110].mxu1 }
 0x67a   :  { %v3271_v8 = vpack.c.bf16 %v9342_v51, %v9341_v59  ;;  %v3210_v29 = vpop.f32.mrb[111].mxu1  ;;  %v10512_v59 = vld [vmem:[%s14007_s1 + $0x208] sm:$0xff]   ;;  %v10526_v51 = vld [vmem:[%s14007_s1 + $0x218] sm:$0xff]  }
 0x67b   :  { %v3270_v11 = vpack.c.bf16 %v3210_v29, %v3207_v7  ;;  %v10525_v7 = vld [vmem:[%s14007_s1 + $0x210] sm:$0xff]   ;;  %9500 = vmatmul.mubr.bf16.vlgmr.msra.gmra.mrb[160].mxu0 %v10512_v59  ;;  %v12748_v59 = vpop.f32.mrb[133].mxu0 }
 0x67c   :  { %9503 = vmatprep.mubr.bf16.mxu0 %v10525_v7  ;;  %v12750_v7 = vpop.f32.mrb[134].mxu0 }
 0x67d   :  { %3408 = vmatmul.mubr.bf16.vlgmr.msra.gmra.mrb[60].mxu1 %v3270_v11 }
 0x67e   :  { %9356 = vmatpush3.bf16.msra.mxu1 %v11974_v18  ;;  %3417 = vmatprep.mubr.bf16.mxu1 %v14094_v25 }
 0x67f   :  { %9357 = vmatprep.subr.bf16.mxu1 %v11825_v40  ;;  %v9345_v2 = vpop.f32.mrb[112].mxu1 }
 0x680   :  { %v3223_v26 = vpop.f32.mrb[113].mxu1 }
 0x681   :  { %v9346_v49 = vpop.f32.mrb[114].mxu1 }
 0x682   :  { %9358 = vmatpush3.bf16.msra.mxu1 %v11825_v40  ;;  %v3273_v56 = vpack.c.bf16 %v9346_v49, %v9345_v2  ;;  %v3226_v31 = vpop.f32.mrb[115].mxu1 }
 0x683   :  { %9359 = vmatprep.subr.bf16.mxu1 %v11854_v35  ;;  %v3272_v10 = vpack.c.bf16 %v3226_v31, %v3223_v26  ;;  %9504 = vmatmul.mubr.bf16.gmra.mrb[164].mxu0 %v10526_v51  ;;  %v4509_v51 = vpack.c.bf16 %v12750_v7, %v12746_v42 }
 0x685   :  { %3418 = vmatmul.mubr.bf16.gmra.mrb[64].mxu1 %v3271_v8 }
 0x686   :  { %9360 = vmatpush3.bf16.msra.mxu1 %v11854_v35  ;;  %3427 = vmatprep.mubr.bf16.mxu1 %v14094_v25 }
 0x687   :  { %9361 = vmatprep.subr.bf16.mxu1 %v11873_v34  ;;  %v9349_v41 = vpop.f32.mrb[116].mxu1 }
 0x688   :  { %v3239_v50 = vpop.f32.mrb[117].mxu1 }
 0x689   :  { %v9350_v44 = vpop.f32.mrb[118].mxu1 }
 0x68a   :  { %9362 = vmatpush3.bf16.msra.mxu1 %v11873_v34  ;;  %v3275_v23 = vpack.c.bf16 %v9350_v44, %v9349_v41  ;;  %v3242_v52 = vpop.f32.mrb[119].mxu1 }
 0x68b   :  { %9363 = vmatprep.subr.bf16.mxu1 %v11902_v55  ;;  %v3274_v33 = vpack.c.bf16 %v3242_v52, %v3239_v50 }
 0x68d   :  { %3428 = vmatmul.mubr.bf16.gmra.mrb[68].mxu1 %v3272_v10 }
 0x68e   :  { %9364 = vmatpush3.bf16.msra.mxu1 %v11902_v55  ;;  %3437 = vmatprep.mubr.bf16.mxu1 %v14094_v25 }
 0x68f   :  { %9365 = vmatprep.subr.bf16.mxu1 %v11921_v27  ;;  %v9353_v63 = vpop.f32.mrb[120].mxu1 }
 0x690   :  { %v3255_v15 = vpop.f32.mrb[121].mxu1 }
 0x691   :  { %v9354_v62 = vpop.f32.mrb[122].mxu1 }
 0x692   :  { %9366 = vmatpush3.bf16.msra.mxu1 %v11921_v27  ;;  %v3277_v19 = vpack.c.bf16 %v9354_v62, %v9353_v63  ;;  %v3258_v58 = vpop.f32.mrb[123].mxu1 }
 0x693   :  { %9367 = vmatprep.subr.bf16.mxu1 %v11950_v20  ;;  %v3276_v1 = vpack.c.bf16 %v3258_v58, %v3255_v15 }
 0x695   :  { %3438 = vmatmul.mubr.bf16.gmra.mrb[72].mxu1 %v3273_v56 }
 0x696   :  { %9368 = vmatpush3.bf16.msra.mxu1 %v11950_v20  ;;  %3447 = vmatprep.mubr.bf16.mxu1 %v14094_v25 }
 0x697   :  { %9369 = vmatprep.subr.bf16.mxu1 %v11967_v16 }
 0x69a   :  { %9370 = vmatpush3.bf16.msra.mxu1 %v11967_v16 }
 0x69b   :  { %3787 = vmatprep.subr.bf16.mxu1 %v10462_v6  ;;  %v10510_v6 = vld [vmem:[%s14095_s25 + $0x294] ss:$8 sps:$4 sm:$0xff]  }
 0x69d   :  { %3448 = vmatmul.mubr.bf16.gmra.mrb[76].mxu1 %v3274_v33 }
 0x69e   :  { %3457 = vmatprep.mubr.bf16.mxu1 %v14094_v25 }
 0x6a5   :  { %3458 = vmatmul.mubr.bf16.gmra.mrb[80].mxu1 %v3275_v23 }
 0x6a6   :  { %3467 = vmatprep.mubr.bf16.mxu1 %v14094_v25 }
 0x6ad   :  { %3468 = vmatmul.mubr.bf16.gmra.mrb[84].mxu1 %v3276_v1  ;;  %v10505_v1 = vld [vmem:[%s14095_s25 + $0x280] ss:$8 sps:$4 sm:$0xff]  }
 0x6ae   :  { %3477 = vmatprep.mubr.bf16.mxu1 %v14094_v25 }
 0x6b5   :  { %3478 = vmatmul.mubr.bf16.gmra.mrb[88].mxu1 %v3277_v19 }
 0x6b6   :  { %9371 = vmatprep.mubr.bf16.mxu1 %v10459_v38  ;;  %v10508_v38 = vld [vmem:[%s14095_s25 + $0x290] ss:$8 sps:$4 sm:$0xff]  }
 0x6bd   :  { %9372 = vmatmul.mubr.bf16.vlgmr.msra.gmra.mrb[124].mxu1 %v10463_v4  ;;  %v10515_v4 = vld [vmem:[%s14095_s25 + $0x2a4] ss:$8 sps:$4 sm:$0xff]  }
 0x6be   :  { %3788 = vmatpush1.bf16.msra.mxu1 %v10460_v17  ;;  %9375 = vmatprep.mubr.bf16.mxu1 %v10473_v36  ;;  %v10494_v17 = vld [vmem:[%s14007_s1 + $0x158] sm:$0xff]   ;;  %v10495_v36 = vld [vmem:[%s14007_s1 + $0x160] sm:$0xff]  }
 0x6bf   :  { %3789 = vmatprep.subr.bf16.mxu1 %v10466_v43  ;;  %v10513_v43 = vld [vmem:[%s14095_s25 + $0x2a0] ss:$8 sps:$4 sm:$0xff]  }
 0x6c2   :  { %3790 = vmatpush1.bf16.msra.mxu1 %v10464_v32  ;;  %v10518_v32 = vld [vmem:[%s14095_s25 + $0x2b4] ss:$8 sps:$4 sm:$0xff]  }
 0x6c3   :  { %3791 = vmatprep.subr.bf16.mxu1 %v10469_v53  ;;  %v10516_v53 = vld [vmem:[%s14095_s25 + $0x2b0] ss:$8 sps:$4 sm:$0xff]  }
 0x6c5   :  { %9376 = vmatmul.mubr.bf16.gmra.mrb[128].mxu1 %v10477_v60  ;;  %v10521_v60 = vld [vmem:[%s14095_s25 + $0x2c4] ss:$8 sps:$4 sm:$0xff]  }
 0x6c6   :  { %3792 = vmatpush1.bf16.msra.mxu1 %v10467_v3  ;;  %9379 = vmatprep.mubr.bf16.mxu1 %v10487_v9  ;;  %v10496_v3 = vld [vmem:[%s14007_s1 + $0x168] sm:$0xff]   ;;  %v10497_v9 = vld [vmem:[%s14007_s1 + $0x170] sm:$0xff]  }
 0x6c7   :  { %3793 = vmatprep.subr.bf16.mxu1 %v10472_v47  ;;  %v10519_v47 = vld [vmem:[%s14095_s25 + $0x2c0] ss:$8 sps:$4 sm:$0xff]  }
 0x6ca   :  { %3794 = vmatpush1.bf16.msra.mxu1 %v10470_v39  ;;  %v10524_v39 = vld [vmem:[%s14095_s25 + $0x2d4] ss:$8 sps:$4 sm:$0xff]  }
 0x6cb   :  { %3795 = vmatprep.subr.bf16.mxu1 %v10476_v28  ;;  %v10522_v28 = vld [vmem:[%s14095_s25 + $0x2d0] ss:$8 sps:$4 sm:$0xff]  }
 0x6cd   :  { %9380 = vmatmul.mubr.bf16.gmra.mrb[132].mxu1 %v10488_v22  ;;  %v10529_v22 = vld [vmem:[%s14095_s25 + $0x2e4] ss:$8 sps:$4 sm:$0xff]  }
 0x6ce   :  { %3796 = vmatpush1.bf16.msra.mxu1 %v10474_v54  ;;  %9383 = vmatprep.mubr.bf16.mxu1 %v10489_v46  ;;  %v10498_v54 = vld [vmem:[%s14007_s1 + $0x178] sm:$0xff]   ;;  %v10527_v46 = vld [vmem:[%s14095_s25 + $0x2e0] ss:$8 sps:$4 sm:$0xff]  }
 0x6cf   :  { %3797 = vmatprep.subr.bf16.mxu1 %v10480_v0  ;;  %v10532_v0 = vld [vmem:[%s14095_s25 + $0x2f4] ss:$8 sps:$4 sm:$0xff]  }
 0x6d2   :  { %3798 = vmatpush1.bf16.msra.mxu1 %v10478_v61  ;;  %v10530_v61 = vld [vmem:[%s14095_s25 + $0x2f0] ss:$8 sps:$4 sm:$0xff]  }
 0x6d3   :  { %3799 = vmatprep.subr.bf16.mxu1 %v10483_v21  ;;  %v10533_v21 = vld [vmem:[%s14007_s1 + $0x220] sm:$0xff]  }
 0x6d4   :  { %9507 = vmatprep.mubr.bf16.mxu0 %v10533_v21 }
 0x6d5   :  { %9384 = vmatmul.mubr.bf16.gmra.mrb[136].mxu1 %v10490_v5  ;;  %v10534_v5 = vld [vmem:[%s14007_s1 + $0x228] sm:$0xff]  }
 0x6d6   :  { %3800 = vmatpush1.bf16.msra.mxu1 %v10481_v14  ;;  %3819 = vmatprep.mubr.bf16.mxu1 %v14094_v25  ;;  %v10535_v14 = vld [vmem:[%s14007_s1 + $0x230] sm:$0xff]  }
 0x6d7   :  { %3801 = vmatprep.subr.bf16.mxu1 %v10486_v45  ;;  %9508 = vmatmul.mubr.bf16.gmra.mrb[168].mxu0 %v10534_v5  ;;  %v10536_v45 = vld [vmem:[%s14007_s1 + $0x238] sm:$0xff]  }
 0x6d8   :  { %9511 = vmatprep.mubr.bf16.mxu0 %v10535_v14 }
 0x6da   :  { %3802 = vmatpush1.bf16.msra.mxu1 %v10484_v12  ;;  %v10539_v12 = vld [vmem:[%s14095_s25 + $0x304] ss:$8 sps:$4 sm:$0xff]  }
 0x6db   :  { %9387 = vmatprep.subr.bf16.mxu1 %v11974_v18 }
 0x6df   :  { %9512 = vmatmul.mubr.bf16.gmra.mrb[172].mxu0 %v10536_v45  ;;  %v10549_v45 = vld [vmem:[%s14095_s25 + $0x340] ss:$8 sps:$4 sm:$0xff]  }
 0x790   :  { %v9373_v8 = vpop.f32.mrb[124].mxu1 }
 0x791   :  { %v3619_v29 = vpop.f32.mrb[125].mxu1 }
 0x792   :  { %v9374_v11 = vpop.f32.mrb[126].mxu1 }
 0x793   :  { %v3683_v2 = vpack.c.bf16 %v9374_v11, %v9373_v8  ;;  %v3622_v26 = vpop.f32.mrb[127].mxu1  ;;  %v12754_v8 = vpop.f32.mrb[135].mxu0 }
 0x794   :  { %v3682_v49 = vpack.c.bf16 %v3622_v26, %v3619_v29  ;;  %v4508_v29 = vpack.c.bf16 %v12754_v8, %v12748_v59  ;;  %v12758_v11 = vpop.f32.mrb[136].mxu0  ;;  %v10584_v59 = vld [vmem:[%s14095_s25 + $0x3f4] ss:$8 sps:$4 sm:$0xff]  }
 0x796   :  { %3820 = vmatmul.mubr.bf16.vlgmr.msra.gmra.mrb[60].mxu1 %v3682_v49 }
 0x797   :  { %9388 = vmatpush3.bf16.msra.mxu1 %v11974_v18  ;;  %3829 = vmatprep.mubr.bf16.mxu1 %v14094_v25 }
 0x798   :  { %9389 = vmatprep.subr.bf16.mxu1 %v11825_v40  ;;  %v9377_v56 = vpop.f32.mrb[128].mxu1 }
 0x799   :  { %v3635_v31 = vpop.f32.mrb[129].mxu1 }
 0x79a   :  { %v9378_v10 = vpop.f32.mrb[130].mxu1 }
 0x79b   :  { %9390 = vmatpush3.bf16.msra.mxu1 %v11825_v40  ;;  %v3685_v41 = vpack.c.bf16 %v9378_v10, %v9377_v56  ;;  %v3638_v50 = vpop.f32.mrb[131].mxu1 }
 0x79c   :  { %9391 = vmatprep.subr.bf16.mxu1 %v11854_v35  ;;  %v3684_v44 = vpack.c.bf16 %v3638_v50, %v3635_v31 }
 0x79e   :  { %3830 = vmatmul.mubr.bf16.gmra.mrb[64].mxu1 %v3683_v2  ;;  %v12760_v2 = vpop.f32.mrb[137].mxu0 }
 0x79f   :  { %9392 = vmatpush3.bf16.msra.mxu1 %v11854_v35  ;;  %3839 = vmatprep.mubr.bf16.mxu1 %v14094_v25  ;;  %v12762_v26 = vpop.f32.mrb[138].mxu0 }
 0x7a0   :  { %9393 = vmatprep.subr.bf16.mxu1 %v11873_v34  ;;  %v9381_v18 = vpop.f32.mrb[132].mxu1  ;;  %v4511_v49 = vpack.c.bf16 %v12762_v26, %v12758_v11  ;;  %v12766_v56 = vpop.f32.mrb[139].mxu0  ;;  %v10585_v11 = vld [vmem:[%s14095_s25 + $0x400] ss:$8 sps:$4 sm:$0xff]   ;;  %v10590_v26 = vld [vmem:[%s14095_s25 + $0x414] ss:$8 sps:$4 sm:$0xff]  }
 0x7a1   :  { %v3651_v23 = vpop.f32.mrb[133].mxu1  ;;  %v4510_v31 = vpack.c.bf16 %v12766_v56, %v12760_v2  ;;  %v12770_v10 = vpop.f32.mrb[140].mxu0  ;;  %v10593_v56 = vld [vmem:[%s14095_s25 + $0x424] ss:$8 sps:$4 sm:$0xff]  }
 0x7a2   :  { %v9382_v52 = vpop.f32.mrb[134].mxu1 }
 0x7a3   :  { %9394 = vmatpush3.bf16.msra.mxu1 %v11873_v34  ;;  %v3687_v33 = vpack.c.bf16 %v9382_v52, %v9381_v18  ;;  %v3654_v63 = vpop.f32.mrb[135].mxu1 }
 0x7a4   :  { %9395 = vmatprep.subr.bf16.mxu1 %v11902_v55  ;;  %v3686_v40 = vpack.c.bf16 %v3654_v63, %v3651_v23 }
 0x7a6   :  { %3840 = vmatmul.mubr.bf16.gmra.mrb[68].mxu1 %v3684_v44 }
 0x7a7   :  { %9396 = vmatpush3.bf16.msra.mxu1 %v11902_v55  ;;  %3849 = vmatprep.mubr.bf16.mxu1 %v14094_v25  ;;  %v10507_v55 = vld [vmem:[%s14095_s25 + $0x284] ss:$8 sps:$4 sm:$0xff]  }
 0x7a8   :  { %9397 = vmatprep.subr.bf16.mxu1 %v11921_v27  ;;  %v9385_v35 = vpop.f32.mrb[136].mxu1 }
 0x7a9   :  { %v3667_v15 = vpop.f32.mrb[137].mxu1 }
 0x7aa   :  { %v9386_v62 = vpop.f32.mrb[138].mxu1 }
 0x7ab   :  { %9398 = vmatpush3.bf16.msra.mxu1 %v11921_v27  ;;  %v3689_v19 = vpack.c.bf16 %v9386_v62, %v9385_v35  ;;  %v3670_v58 = vpop.f32.mrb[139].mxu1  ;;  %v10491_v27 = vld [vmem:[%s14007_s1 + $0x140] sm:$0xff]  }
 0x7ac   :  { %9399 = vmatprep.subr.bf16.mxu1 %v11950_v20  ;;  %v3688_v34 = vpack.c.bf16 %v3670_v58, %v3667_v15 }
 0x7ae   :  { %3850 = vmatmul.mubr.bf16.gmra.mrb[72].mxu1 %v3685_v41  ;;  %v12772_v41 = vpop.f32.mrb[141].mxu0 }
 0x7af   :  { %9400 = vmatpush3.bf16.msra.mxu1 %v11950_v20  ;;  %3859 = vmatprep.mubr.bf16.mxu1 %v14094_v25  ;;  %v10492_v20 = vld [vmem:[%s14007_s1 + $0x148] sm:$0xff]   ;;  %v12774_v50 = vpop.f32.mrb[142].mxu0 }
 0x7b0   :  { %9401 = vmatprep.subr.bf16.mxu1 %v11967_v16  ;;  %v4513_v44 = vpack.c.bf16 %v12774_v50, %v12770_v10  ;;  %v12778_v18 = vpop.f32.mrb[143].mxu0  ;;  %v10596_v10 = vld [vmem:[%s14095_s25 + $0x434] ss:$8 sps:$4 sm:$0xff]   ;;  %v10599_v50 = vld [vmem:[%s14095_s25 + $0x444] ss:$8 sps:$4 sm:$0xff]  }
 0x7b1   :  { %v4512_v23 = vpack.c.bf16 %v12778_v18, %v12772_v41  ;;  %v12782_v52 = vpop.f32.mrb[144].mxu0  ;;  %v10594_v41 = vld [vmem:[%s14095_s25 + $0x430] ss:$8 sps:$4 sm:$0xff]   ;;  %v10602_v18 = vld [vmem:[%s14095_s25 + $0x454] ss:$8 sps:$4 sm:$0xff]  }
 0x7b3   :  { %9402 = vmatpush3.bf16.msra.mxu1 %v11967_v16  ;;  %v10493_v16 = vld [vmem:[%s14007_s1 + $0x150] sm:$0xff]  }
 0x7b4   :  { %4199 = vmatprep.subr.bf16.mxu1 %v10507_v55 }
 0x7b6   :  { %3860 = vmatmul.mubr.bf16.gmra.mrb[76].mxu1 %v3686_v40 }
 0x7b7   :  { %3869 = vmatprep.mubr.bf16.mxu1 %v14094_v25 }
 0x7be   :  { %3870 = vmatmul.mubr.bf16.gmra.mrb[80].mxu1 %v3687_v33  ;;  %v12784_v33 = vpop.f32.mrb[145].mxu0 }
 0x7bf   :  { %3879 = vmatprep.mubr.bf16.mxu1 %v14094_v25  ;;  %v12786_v40 = vpop.f32.mrb[146].mxu0 }
 0x7c0   :  { %v4919_v15 = vpack.c.bf16 %v12786_v40, %v12782_v52  ;;  %v12790_v62 = vpop.f32.mrb[147].mxu0  ;;  %v10605_v52 = vld [vmem:[%s14095_s25 + $0x464] ss:$8 sps:$4 sm:$0xff]   ;;  %v10608_v40 = vld [vmem:[%s14095_s25 + $0x474] ss:$8 sps:$4 sm:$0xff]  }
 0x7c1   :  { %v4918_v58 = vpack.c.bf16 %v12790_v62, %v12784_v33  ;;  %v10603_v33 = vld [vmem:[%s14095_s25 + $0x460] ss:$8 sps:$4 sm:$0xff]   ;;  %v10609_v62 = vld [vmem:[%s13913_s10 + $0x10] sm:$0xff]  }
 0x7c2   :  { %9527 = vmatprep.mubr.msk.bf16.mxu0 %vm898_vm0, %v10609_v62 }
 0x7c6   :  { %3880 = vmatmul.mubr.bf16.gmra.mrb[84].mxu1 %v3688_v34 }
 0x7c7   :  { %3889 = vmatprep.mubr.bf16.mxu1 %v14094_v25 }
 0x7ce   :  { %3890 = vmatmul.mubr.bf16.gmra.mrb[88].mxu1 %v3689_v19 }
 0x7cf   :  { %9403 = vmatprep.mubr.bf16.mxu1 %v10491_v27  ;;  %v10537_v27 = vld [vmem:[%s14095_s25 + $0x300] ss:$8 sps:$4 sm:$0xff]  }
 0x7d6   :  { %9404 = vmatmul.mubr.bf16.vlgmr.msra.gmra.mrb[140].mxu1 %v10492_v20 }
 0x7d7   :  { %9407 = vmatprep.mubr.bf16.mxu1 %v10493_v16  ;;  %4200 = vmatpush1.bf16.msra.mxu1 %v10505_v1  ;;  %v10542_v16 = vld [vmem:[%s14095_s25 + $0x314] ss:$8 sps:$4 sm:$0xff]   ;;  %v10540_v1 = vld [vmem:[%s14095_s25 + $0x310] ss:$8 sps:$4 sm:$0xff]  }
 0x7d8   :  { %4201 = vmatprep.subr.bf16.mxu1 %v10510_v6 }
 0x7db   :  { %4202 = vmatpush1.bf16.msra.mxu1 %v10508_v38  ;;  %v10545_v38 = vld [vmem:[%s14095_s25 + $0x324] ss:$8 sps:$4 sm:$0xff]  }
 0x7dc   :  { %4203 = vmatprep.subr.bf16.mxu1 %v10515_v4 }
 0x7de   :  { %9408 = vmatmul.mubr.bf16.gmra.mrb[144].mxu1 %v10494_v17 }
 0x7df   :  { %9411 = vmatprep.mubr.bf16.mxu1 %v10495_v36  ;;  %4204 = vmatpush1.bf16.msra.mxu1 %v10513_v43 }
 0x7e0   :  { %4205 = vmatprep.subr.bf16.mxu1 %v10518_v32  ;;  %v10543_v32 = vld [vmem:[%s14095_s25 + $0x320] ss:$8 sps:$4 sm:$0xff]  }
 0x7e3   :  { %4206 = vmatpush1.bf16.msra.mxu1 %v10516_v53 }
 0x7e4   :  { %4207 = vmatprep.subr.bf16.mxu1 %v10521_v60  ;;  %v10548_v60 = vld [vmem:[%s14095_s25 + $0x334] ss:$8 sps:$4 sm:$0xff]  }
 0x7e6   :  { %9412 = vmatmul.mubr.bf16.gmra.mrb[148].mxu1 %v10496_v3  ;;  %v12813_v3 = vpop.f32.mrb[148].mxu0 }
 0x7e7   :  { %9415 = vmatprep.mubr.bf16.mxu1 %v10497_v9  ;;  %4208 = vmatpush1.bf16.msra.mxu1 %v10519_v47  ;;  %v10546_v9 = vld [vmem:[%s14095_s25 + $0x330] ss:$8 sps:$4 sm:$0xff]   ;;  %v12819_v47 = vpop.f32.mrb[149].mxu0 }
 0x7e8   :  { %4209 = vmatprep.subr.bf16.mxu1 %v10524_v39 }
 0x7eb   :  { %4210 = vmatpush1.bf16.msra.mxu1 %v10522_v28  ;;  %v10551_v28 = vld [vmem:[%s14095_s25 + $0x344] ss:$8 sps:$4 sm:$0xff]  }
 0x7ec   :  { %4211 = vmatprep.subr.bf16.mxu1 %v10529_v22  ;;  %v12824_v22 = vpop.f32.mrb[150].mxu0 }
 0x7ee   :  { %9416 = vmatmul.mubr.bf16.gmra.mrb[152].mxu1 %v10498_v54 }
 0x7ef   :  { %4212 = vmatpush1.bf16.msra.mxu1 %v10527_v46  ;;  %4231 = vmatprep.mubr.bf16.mxu1 %v14094_v25  ;;  %v4921_v46 = vpack.c.bf16 %v12824_v22, %v12813_v3 }
 0x7f0   :  { %4213 = vmatprep.subr.bf16.mxu1 %v10532_v0  ;;  %v12828_v0 = vpop.f32.mrb[151].mxu0 }
 0x7f1   :  { %v4920_v21 = vpack.c.bf16 %v12828_v0, %v12819_v47 }
 0x7f3   :  { %4214 = vmatpush1.bf16.msra.mxu1 %v10530_v61 }
 0x7f4   :  { %4611 = vmatprep.subr.bf16.mxu1 %v10539_v12 }
 0x8a9   :  { %v9405_v63 = vpop.f32.mrb[140].mxu1 }
 0x8aa   :  { %v4031_v35 = vpop.f32.mrb[141].mxu1 }
 0x8ab   :  { %v9406_v19 = vpop.f32.mrb[142].mxu1 }
 0x8ac   :  { %v4095_v34 = vpack.c.bf16 %v9406_v19, %v9405_v63  ;;  %v4034_v55 = vpop.f32.mrb[143].mxu1  ;;  %v10554_v63 = vld [vmem:[%s14095_s25 + $0x354] ss:$8 sps:$4 sm:$0xff]  }
 0x8ad   :  { %v4094_v20 = vpack.c.bf16 %v4034_v55, %v4031_v35  ;;  %v10552_v35 = vld [vmem:[%s14095_s25 + $0x350] ss:$8 sps:$4 sm:$0xff]  }
 0x8af   :  { %4232 = vmatmul.mubr.bf16.vlgmr.msra.gmra.mrb[60].mxu1 %v4094_v20 }
 0x8b0   :  { %4241 = vmatprep.mubr.bf16.mxu1 %v14094_v25  ;;  %4612 = vmatpush1.bf16.msra.mxu1 %v10537_v27 }
 0x8b1   :  { %v9409_v6 = vpop.f32.mrb[144].mxu1  ;;  %4613 = vmatprep.subr.bf16.mxu1 %v10542_v16 }
 0x8b2   :  { %v4047_v4 = vpop.f32.mrb[145].mxu1 }
 0x8b3   :  { %v9410_v17 = vpop.f32.mrb[146].mxu1 }
 0x8b4   :  { %v4097_v36 = vpack.c.bf16 %v9410_v17, %v9409_v6  ;;  %v4050_v43 = vpop.f32.mrb[147].mxu1  ;;  %4614 = vmatpush1.bf16.msra.mxu1 %v10540_v1  ;;  %v10555_v1 = vld [vmem:[%s14095_s25 + $0x360] ss:$8 sps:$4 sm:$0xff]   ;;  %v10558_v17 = vld [vmem:[%s14095_s25 + $0x370] ss:$8 sps:$4 sm:$0xff]  }
 0x8b5   :  { %v4096_v53 = vpack.c.bf16 %v4050_v43, %v4047_v4  ;;  %4615 = vmatprep.subr.bf16.mxu1 %v10545_v38  ;;  %v10560_v38 = vld [vmem:[%s14095_s25 + $0x374] ss:$8 sps:$4 sm:$0xff]   ;;  %v12851_v4 = vpop.f32.mrb[152].mxu0 }
 0x8b6   :  { %v12857_v43 = vpop.f32.mrb[153].mxu0 }
 0x8b7   :  { %4242 = vmatmul.mubr.bf16.gmra.mrb[64].mxu1 %v4095_v34  ;;  %v10557_v34 = vld [vmem:[%s14095_s25 + $0x364] ss:$8 sps:$4 sm:$0xff]  }
 0x8b8   :  { %4251 = vmatprep.mubr.bf16.mxu1 %v14094_v25  ;;  %4616 = vmatpush1.bf16.msra.mxu1 %v10543_v32  ;;  %v10563_v32 = vld [vmem:[%s14095_s25 + $0x384] ss:$8 sps:$4 sm:$0xff]  }
 0x8b9   :  { %v9413_v39 = vpop.f32.mrb[148].mxu1  ;;  %4617 = vmatprep.subr.bf16.mxu1 %v10548_v60 }
 0x8ba   :  { %v4063_v54 = vpop.f32.mrb[149].mxu1 }
 0x8bb   :  { %v9414_v61 = vpop.f32.mrb[150].mxu1 }
 0x8bc   :  { %v4099_v5 = vpack.c.bf16 %v9414_v61, %v9413_v39  ;;  %v4066_v14 = vpop.f32.mrb[151].mxu1  ;;  %4618 = vmatpush1.bf16.msra.mxu1 %v10546_v9 }
 0x8bd   :  { %v4098_v12 = vpack.c.bf16 %v4066_v14, %v4063_v54  ;;  %4619 = vmatprep.subr.bf16.mxu1 %v10551_v28 }
 0x8bf   :  { %4252 = vmatmul.mubr.bf16.gmra.mrb[68].mxu1 %v4096_v53  ;;  %v12862_v53 = vpop.f32.mrb[154].mxu0 }
 0x8c0   :  { %4261 = vmatprep.mubr.bf16.mxu1 %v14094_v25  ;;  %4620 = vmatpush1.bf16.msra.mxu1 %v10549_v45  ;;  %v12866_v60 = vpop.f32.mrb[155].mxu0 }
 0x8c1   :  { %v9417_v19 = vpop.f32.mrb[152].mxu1  ;;  %4621 = vmatprep.subr.bf16.mxu1 %v10554_v63  ;;  %v4922_v9 = vpack.c.bf16 %v12866_v60, %v12857_v43  ;;  %v12871_v39 = vpop.f32.mrb[156].mxu0 }
 0x8c2   :  { %v4079_v55 = vpop.f32.mrb[153].mxu1  ;;  %v12874_v28 = vpop.f32.mrb[157].mxu0 }
 0x8c3   :  { %v9418_v27 = vpop.f32.mrb[154].mxu1  ;;  %v12876_v54 = vpop.f32.mrb[158].mxu0 }
 0x8c4   :  { %v4101_v20 = vpack.c.bf16 %v9418_v27, %v9417_v19  ;;  %v4082_v16 = vpop.f32.mrb[155].mxu1  ;;  %4622 = vmatpush1.bf16.msra.mxu1 %v10552_v35  ;;  %v4925_v61 = vpack.c.bf16 %v12876_v54, %v12871_v39  ;;  %v12880_v14 = vpop.f32.mrb[159].mxu0  ;;  %v10566_v27 = vld [vmem:[%s14095_s25 + $0x394] ss:$8 sps:$4 sm:$0xff]  }
 0x8c5   :  { %v4100_v6 = vpack.c.bf16 %v4082_v16, %v4079_v55  ;;  %4623 = vmatprep.subr.bf16.mxu1 %v10557_v34  ;;  %v4924_v45 = vpack.c.bf16 %v12880_v14, %v12874_v28  ;;  %v10561_v55 = vld [vmem:[%s14095_s25 + $0x380] ss:$8 sps:$4 sm:$0xff]   ;;  %v10569_v16 = vld [vmem:[%s14095_s25 + $0x3a4] ss:$8 sps:$4 sm:$0xff]  }
 0x8c7   :  { %4262 = vmatmul.mubr.bf16.gmra.mrb[72].mxu1 %v4097_v36  ;;  %v4923_v36 = vpack.c.bf16 %v12862_v53, %v12851_v4 }
 0x8c8   :  { %4271 = vmatprep.mubr.bf16.mxu1 %v14094_v25  ;;  %4624 = vmatpush1.bf16.msra.mxu1 %v10555_v1  ;;  %v10567_v1 = vld [vmem:[%s14095_s25 + $0x3a0] ss:$8 sps:$4 sm:$0xff]  }
 0x8c9   :  { %4625 = vmatprep.subr.bf16.mxu1 %v10560_v38  ;;  %v10575_v38 = vld [vmem:[%s14095_s25 + $0x3c4] ss:$8 sps:$4 sm:$0xff]  }
 0x8cc   :  { %4626 = vmatpush1.bf16.msra.mxu1 %v10558_v17 }
 0x8cd   :  { %5023 = vmatprep.subr.bf16.mxu1 %v10563_v32  ;;  %v10573_v32 = vld [vmem:[%s14095_s25 + $0x3c0] ss:$8 sps:$4 sm:$0xff]  }
 0x8cf   :  { %4272 = vmatmul.mubr.bf16.gmra.mrb[76].mxu1 %v4098_v12 }
 0x8d0   :  { %4281 = vmatprep.mubr.bf16.mxu1 %v14094_v25 }
 0x8d7   :  { %4282 = vmatmul.mubr.bf16.gmra.mrb[80].mxu1 %v4099_v5  ;;  %v12885_v5 = vpop.f32.mrb[160].mxu0 }
 0x8d8   :  { %4291 = vmatprep.mubr.bf16.mxu1 %v14094_v25  ;;  %v12888_v12 = vpop.f32.mrb[161].mxu0 }
 0x8d9   :  { %v12890_v63 = vpop.f32.mrb[162].mxu0 }
 0x8da   :  { %v5331_v35 = vpack.c.bf16 %v12890_v63, %v12885_v5  ;;  %v12894_v19 = vpop.f32.mrb[163].mxu0 }
 0x8db   :  { %v5330_v34 = vpack.c.bf16 %v12894_v19, %v12888_v12  ;;  %v12923_v30 = vpop.f32.mrb[164].mxu0 }
 0x8df   :  { %4292 = vmatmul.mubr.bf16.gmra.mrb[84].mxu1 %v4100_v6  ;;  %v12929_v6 = vpop.f32.mrb[165].mxu0 }
 0x8e0   :  { %4301 = vmatprep.mubr.bf16.mxu1 %v14094_v25  ;;  %v12934_v17 = vpop.f32.mrb[166].mxu0 }
 0x8e1   :  { %v5333_v24 = vpack.c.bf16 %v12934_v17, %v12923_v30  ;;  %v12938_v57 = vpop.f32.mrb[167].mxu0 }
 0x8e2   :  { %v12967_v8 = vpop.f32.mrb[168].mxu0 }
 0x8e7   :  { %4302 = vmatmul.mubr.bf16.gmra.mrb[88].mxu1 %v4101_v20  ;;  %v10564_v20 = vld [vmem:[%s14095_s25 + $0x390] ss:$8 sps:$4 sm:$0xff]  }
 0x8e8   :  { %4643 = vmatprep.mubr.bf16.mxu1 %v14094_v25 }
 0x8ef   :  { %4644 = vmatmul.mubr.bf16.vlgmr.msra.gmra.mrb[60].mxu1 %v4506_v37  ;;  %v10570_v37 = vld [vmem:[%s14095_s25 + $0x3b0] ss:$8 sps:$4 sm:$0xff]  }
 0x8f0   :  { %4653 = vmatprep.mubr.bf16.mxu1 %v14094_v25  ;;  %5024 = vmatpush1.bf16.msra.mxu1 %v10561_v55  ;;  %v10578_v55 = vld [vmem:[%s14095_s25 + $0x3d4] ss:$8 sps:$4 sm:$0xff]  }
 0x8f1   :  { %5025 = vmatprep.subr.bf16.mxu1 %v10566_v27  ;;  %v10576_v27 = vld [vmem:[%s14095_s25 + $0x3d0] ss:$8 sps:$4 sm:$0xff]  }
 0x8f4   :  { %5026 = vmatpush1.bf16.msra.mxu1 %v10564_v20  ;;  %v10581_v20 = vld [vmem:[%s14095_s25 + $0x3e4] ss:$8 sps:$4 sm:$0xff]  }
 0x8f5   :  { %5027 = vmatprep.subr.bf16.mxu1 %v10569_v16  ;;  %v10579_v16 = vld [vmem:[%s14095_s25 + $0x3e0] ss:$8 sps:$4 sm:$0xff]  }
 0x8f7   :  { %4654 = vmatmul.mubr.bf16.gmra.mrb[64].mxu1 %v4507_v48  ;;  %v5332_v48 = vpack.c.bf16 %v12938_v57, %v12929_v6 }
 0x8f8   :  { %4663 = vmatprep.mubr.bf16.mxu1 %v14094_v25  ;;  %5028 = vmatpush1.bf16.msra.mxu1 %v10567_v1  ;;  %v12973_v1 = vpop.f32.mrb[169].mxu0 }
 0x8f9   :  { %5029 = vmatprep.subr.bf16.mxu1 %v10572_v13  ;;  %v10587_v13 = vld [vmem:[%s14095_s25 + $0x404] ss:$8 sps:$4 sm:$0xff]  }
 0x8fc   :  { %5030 = vmatpush1.bf16.msra.mxu1 %v10570_v37  ;;  %v12978_v37 = vpop.f32.mrb[170].mxu0 }
 0x8fd   :  { %5031 = vmatprep.subr.bf16.mxu1 %v10575_v38  ;;  %v5335_v42 = vpack.c.bf16 %v12978_v37, %v12967_v8  ;;  %v12982_v7 = vpop.f32.mrb[171].mxu0 }
 0x8fe   :  { %v12993_v38 = vpop.f32.mrb[172].mxu0 }
 0x8ff   :  { %4664 = vmatmul.mubr.bf16.gmra.mrb[68].mxu1 %v4508_v29  ;;  %v10582_v29 = vld [vmem:[%s14095_s25 + $0x3f0] ss:$8 sps:$4 sm:$0xff]  }
 0x900   :  { %4673 = vmatprep.mubr.bf16.mxu1 %v14094_v25  ;;  %5032 = vmatpush1.bf16.msra.mxu1 %v10573_v32  ;;  %v12996_v32 = vpop.f32.mrb[173].mxu0 }
 0x901   :  { %5033 = vmatprep.subr.bf16.mxu1 %v10578_v55  ;;  %v12998_v55 = vpop.f32.mrb[174].mxu0 }
 0x904   :  { %5034 = vmatpush1.bf16.msra.mxu1 %v10576_v27  ;;  %v5337_v27 = vpack.c.bf16 %v12998_v55, %v12993_v38  ;;  %v8667_v55 = vld [vmem:[%s13915_s7] ss:$0 sm:$0xff] }
 0x905   :  { %5035 = vmatprep.subr.bf16.mxu1 %v10581_v20  ;;  %v13002_v20 = vpop.f32.mrb[175].mxu0 }
 0x906   :  { %v5336_v2 = vpack.c.bf16 %v13002_v20, %v12996_v32 }
 0x907   :  { %4674 = vmatmul.mubr.bf16.gmra.mrb[72].mxu1 %v4509_v51  ;;  %v5334_v51 = vpack.c.bf16 %v12982_v7, %v12973_v1 }
 0x908   :  { %4683 = vmatprep.mubr.bf16.mxu1 %v14094_v25  ;;  %5036 = vmatpush1.bf16.msra.mxu1 %v10579_v16 }
 0x909   :  { %5037 = vmatprep.subr.bf16.mxu1 %v10584_v59 }
 0x90c   :  { %5038 = vmatpush1.bf16.msra.mxu1 %v10582_v29 }
 0x90d   :  { %5435 = vmatprep.subr.bf16.mxu1 %v10587_v13 }
 0x90f   :  { %4684 = vmatmul.mubr.bf16.gmra.mrb[76].mxu1 %v4510_v31  ;;  %v10591_v31 = vld [vmem:[%s14095_s25 + $0x420] ss:$8 sps:$4 sm:$0xff]  }
 0x910   :  { %4693 = vmatprep.mubr.bf16.mxu1 %v14094_v25 }
 0x917   :  { %4694 = vmatmul.mubr.bf16.gmra.mrb[80].mxu1 %v4511_v49  ;;  %v10588_v49 = vld [vmem:[%s14095_s25 + $0x410] ss:$8 sps:$4 sm:$0xff]  }
 0x918   :  { %4703 = vmatprep.mubr.bf16.mxu1 %v14094_v25 }
 0x91f   :  { %4704 = vmatmul.mubr.bf16.gmra.mrb[84].mxu1 %v4512_v23  ;;  %v10600_v23 = vld [vmem:[%s14095_s25 + $0x450] ss:$8 sps:$4 sm:$0xff]  }
 0x920   :  { %4713 = vmatprep.mubr.bf16.mxu1 %v14094_v25 }
 0x927   :  { %4714 = vmatmul.mubr.bf16.gmra.mrb[88].mxu1 %v4513_v44  ;;  %v10597_v44 = vld [vmem:[%s14095_s25 + $0x440] ss:$8 sps:$4 sm:$0xff]  }
 0x928   :  { %5055 = vmatprep.mubr.bf16.mxu1 %v14094_v25 }
 0x92f   :  { %5056 = vmatmul.mubr.bf16.vlgmr.msra.gmra.mrb[60].mxu1 %v4918_v58  ;;  %v10610_v58 = vld [vmem:[%s13913_s10] sm:$0xff]  }
 0x930   :  { %5065 = vmatprep.mubr.bf16.mxu1 %v14094_v25  ;;  %5436 = vmatpush1.bf16.msra.mxu1 %v10585_v11 }
 0x931   :  { %5437 = vmatprep.subr.bf16.mxu1 %v10590_v26 }
 0x934   :  { %5438 = vmatpush1.bf16.msra.mxu1 %v10588_v49 }
 0x935   :  { %5439 = vmatprep.subr.bf16.mxu1 %v10593_v56 }
 0x937   :  { %5066 = vmatmul.mubr.bf16.gmra.mrb[64].mxu1 %v4919_v15  ;;  %v10606_v15 = vld [vmem:[%s14095_s25 + $0x470] ss:$8 sps:$4 sm:$0xff]  }
 0x938   :  { %5075 = vmatprep.mubr.bf16.mxu1 %v14094_v25  ;;  %5440 = vmatpush1.bf16.msra.mxu1 %v10591_v31 }
 0x939   :  { %5441 = vmatprep.subr.bf16.mxu1 %v10596_v10 }
 0x93c   :  { %5442 = vmatpush1.bf16.msra.mxu1 %v10594_v41  ;;  %v8668_v41 = vld [vmem:[%s13916_s8] ss:$0 sm:$0xff] }
 0x93d   :  { %5443 = vmatprep.subr.bf16.mxu1 %v10599_v50 }
 0x93f   :  { %5076 = vmatmul.mubr.bf16.gmra.mrb[68].mxu1 %v4920_v21 }
 0x940   :  { %5085 = vmatprep.mubr.bf16.mxu1 %v14094_v25  ;;  %5444 = vmatpush1.bf16.msra.mxu1 %v10597_v44 }
 0x941   :  { %5445 = vmatprep.subr.bf16.mxu1 %v10602_v18 }
 0x944   :  { %5446 = vmatpush1.bf16.msra.mxu1 %v10600_v23 }
 0x945   :  { %5447 = vmatprep.subr.bf16.mxu1 %v10605_v52 }
 0x947   :  { %5086 = vmatmul.mubr.bf16.gmra.mrb[72].mxu1 %v4921_v46 }
 0x948   :  { %5095 = vmatprep.mubr.bf16.mxu1 %v14094_v25  ;;  %5448 = vmatpush1.bf16.msra.mxu1 %v10603_v33 }
 0x949   :  { %5449 = vmatprep.subr.bf16.mxu1 %v10608_v40 }
 0x94c   :  { %5450 = vmatpush1.bf16.msra.mxu1 %v10606_v15 }
 0x94f   :  { %5096 = vmatmul.mubr.bf16.gmra.mrb[76].mxu1 %v4922_v9 }
 0x950   :  { %5105 = vmatprep.mubr.bf16.mxu1 %v14094_v25 }
 0x957   :  { %5106 = vmatmul.mubr.bf16.gmra.mrb[80].mxu1 %v4923_v36 }
 0x958   :  { %5115 = vmatprep.mubr.bf16.mxu1 %v14094_v25 }
 0x95f   :  { %5116 = vmatmul.mubr.bf16.gmra.mrb[84].mxu1 %v4924_v45 }
 0x960   :  { %5125 = vmatprep.mubr.bf16.mxu1 %v14094_v25 }
 0x967   :  { %5126 = vmatmul.mubr.bf16.gmra.mrb[88].mxu1 %v4925_v61 }
 0x968   :  { %5467 = vmatprep.mubr.bf16.mxu1 %v14094_v25 }
 0x96f   :  { %5468 = vmatmul.mubr.bf16.vlgmr.msra.gmra.mrb[60].mxu1 %v5330_v34 }
 0x970   :  { %5477 = vmatprep.mubr.bf16.mxu1 %v14094_v25 }
 0x977   :  { %5478 = vmatmul.mubr.bf16.gmra.mrb[64].mxu1 %v5331_v35 }
 0x978   :  { %5487 = vmatprep.mubr.bf16.mxu1 %v14094_v25 }
 0x97f   :  { %5488 = vmatmul.mubr.bf16.gmra.mrb[68].mxu1 %v5332_v48 }
 0x980   :  { %5497 = vmatprep.mubr.bf16.mxu1 %v14094_v25 }
 0x987   :  { %5498 = vmatmul.mubr.bf16.gmra.mrb[72].mxu1 %v5333_v24 }
 0x988   :  { %5507 = vmatprep.mubr.bf16.mxu1 %v14094_v25 }
 0x98f   :  { %5508 = vmatmul.mubr.bf16.gmra.mrb[76].mxu1 %v5334_v51 }
 0x990   :  { %5517 = vmatprep.mubr.bf16.mxu1 %v14094_v25 }
 0x997   :  { %5518 = vmatmul.mubr.bf16.gmra.mrb[80].mxu1 %v5335_v42 }
 0x998   :  { %5527 = vmatprep.mubr.bf16.mxu1 %v14094_v25 }
 0x99f   :  { %5528 = vmatmul.mubr.bf16.gmra.mrb[84].mxu1 %v5336_v2 }
 0x9a0   :  { %5537 = vmatprep.mubr.bf16.mxu1 %v14094_v25 }
 0x9a7   :  { %5538 = vmatmul.mubr.bf16.gmra.mrb[88].mxu1 %v5337_v27 }
 0x9a8   :  { %9519 = vmatprep.mubr.msk.bf16.mxu1 %vm898_vm0, %v10610_v58 }
 0xa42   :  { %v5469_v3 = vpop.f32.mrb[60].mxu1 }
 0xa43   :  { %v5471_v47 = vpop.f32.mrb[61].mxu1 }
 0xa44   :  { %v5473_v22 = vpop.f32.mrb[62].mxu1 }
 0xa45   :  { %v5475_v46 = vpop.f32.mrb[63].mxu1 }
 0xa4a   :  { %v5479_v0 = vpop.f32.mrb[64].mxu1 }
 0xa4b   :  { %v5481_v21 = vpop.f32.mrb[65].mxu1 }
 0xa4c   :  { %v13127_v4 = vpop.f32.mrb[66].mxu1 }
 0xa4d   :  { %v13129_v43 = vpop.f32.mrb[67].mxu1 }
 0xa52   :  { %v5489_v53 = vpop.f32.mrb[68].mxu1 }
 0xa53   :  { %v5580_v36 = vmax.f32 %v5469_v3, %v5489_v53  ;;  %v5491_v60 = vpop.f32.mrb[69].mxu1 }
 0xa54   :  { %v5581_v9 = vmax.f32 %v5471_v47, %v5491_v60  ;;  %v5493_v39 = vpop.f32.mrb[70].mxu1 }
 0xa55   :  { %v5582_v28 = vmax.f32 %v5473_v22, %v5493_v39  ;;  %v5495_v54 = vpop.f32.mrb[71].mxu1  ;;  %v8669_v22 = vld [vmem:[%s13917_s9] ss:$0 sm:$0xff] }
 0xa56   :  { %v5583_v61 = vmax.f32 %v5475_v46, %v5495_v54 }
 0xa5a   :  { %v5499_v14 = vpop.f32.mrb[72].mxu1 }
 0xa5b   :  { %v5584_v45 = vmax.f32 %v5479_v0, %v5499_v14  ;;  %v5501_v5 = vpop.f32.mrb[73].mxu1 }
 0xa5c   :  { %v5585_v12 = vmax.f32 %v5481_v21, %v5501_v5  ;;  %v5503_v63 = vpop.f32.mrb[74].mxu1 }
 0xa5d   :  { %v5586_v35 = vmax.f32 %v13127_v4, %v5503_v63  ;;  %v5505_v19 = vpop.f32.mrb[75].mxu1 }
 0xa5e   :  { %v5587_v34 = vmax.f32 %v13129_v43, %v5505_v19  ;;  %v10625_v19 = vld [vmem:[%s13914_s11 + $0x84] ss:$8 sps:$4 sm:$0xff]  }
 0xa62   :  { %v5509_v30 = vpop.f32.mrb[76].mxu1 }
 0xa63   :  { %v5511_v6 = vpop.f32.mrb[77].mxu1 }
 0xa64   :  { %v5513_v17 = vpop.f32.mrb[78].mxu1 }
 0xa65   :  { %v5515_v24 = vpop.f32.mrb[79].mxu1 }
 0xa6a   :  { %v5519_v57 = vpop.f32.mrb[80].mxu1 }
 0xa6b   :  { %v5521_v48 = vpop.f32.mrb[81].mxu1 }
 0xa6c   :  { %v5523_v16 = vpop.f32.mrb[82].mxu1 }
 0xa6d   :  { %v5525_v59 = vpop.f32.mrb[83].mxu1 }
 0xa72   :  { %v5529_v8 = vpop.f32.mrb[84].mxu1 }
 0xa73   :  { %v5588_v29 = vmax.f32 %v5509_v30, %v5529_v8  ;;  %v5531_v1 = vpop.f32.mrb[85].mxu1  ;;  %v10612_v30 = vld [vmem:[%s13913_s10 + $0x8] sm:$0xff]  }
 0xa74   :  { %v5589_v13 = vmax.f32 %v5511_v6, %v5531_v1  ;;  %v5533_v37 = vpop.f32.mrb[86].mxu1  ;;  %v10613_v6 = vld [vmem:[%s13913_s10 + $0x30] sm:$0xff]   ;;  %v10629_v8 = vld [vmem:[%s13914_s11 + $0xa0] ss:$8 sps:$4 sm:$0xff]  }
 0xa75   :  { %v5596_v42 = vmax.f32 %v5580_v36, %v5588_v29  ;;  %v5590_v7 = vmax.f32 %v5513_v17, %v5533_v37  ;;  %v5535_v51 = vpop.f32.mrb[87].mxu1  ;;  %v10623_v17 = vld [vmem:[%s13914_s11 + $0x80] ss:$8 sps:$4 sm:$0xff]   ;;  %v10634_v29 = vld [vmem:[%s13914_s11 + $0xb4] ss:$8 sps:$4 sm:$0xff]  }
 0xa76   :  { %v5597_v38 = vmax.f32 %v5581_v9, %v5589_v13  ;;  %v5591_v32 = vmax.f32 %v5515_v24, %v5535_v51  ;;  %v10628_v24 = vld [vmem:[%s13914_s11 + $0x94] ss:$8 sps:$4 sm:$0xff]   ;;  %v10632_v1 = vld [vmem:[%s13914_s11 + $0xb0] ss:$8 sps:$4 sm:$0xff]   ;;  %v10637_v13 = vld [vmem:[%s13914_s11 + $0xc4] ss:$8 sps:$4 sm:$0xff]  }
 0xa77   :  { %v5598_v27 = vmax.f32 %v5582_v28, %v5590_v7  ;;  %v10616_v37 = vld [vmem:[%s13913_s10 + $0x48] sm:$0xff]   ;;  %v10640_v51 = vld [vmem:[%s13914_s11 + $0xd4] ss:$8 sps:$4 sm:$0xff]  }
 0xa78   :  { %v5604_v20 = vmax.f32 %v5596_v42, %v5597_v38  ;;  %v5599_v2 = vmax.f32 %v5583_v61, %v5591_v32  ;;  %v10617_v42 = vld [vmem:[%s13913_s10 + $0x50] sm:$0xff]   ;;  %v10635_v7 = vld [vmem:[%s13914_s11 + $0xc0] ss:$8 sps:$4 sm:$0xff]   ;;  %v10643_v32 = vld [vmem:[%s13914_s11 + $0xe4] ss:$8 sps:$4 sm:$0xff]  }
 0xa79   :  { %v10638_v38 = vld [vmem:[%s13914_s11 + $0xd0] ss:$8 sps:$4 sm:$0xff]  }
 0xa7a   :  { %v5615_v11 = vadd.f32 %v8667_v55, %v5604_v20  ;;  %v5605_v26 = vmax.f32 %v5598_v27, %v5599_v2  ;;  %v5539_v49 = vpop.f32.mrb[88].mxu1  ;;  %v10619_v27 = vld [vmem:[%s13913_s10 + $0x60] sm:$0xff]   ;;  %v10620_v2 = vld [vmem:[%s13913_s10 + $0x68] sm:$0xff]  }
 0xa7b   :  { %v5592_v56 = vmax.f32 %v5519_v57, %v5539_v49  ;;  %v5541_v31 = vpop.f32.mrb[89].mxu1  ;;  %v10626_v57 = vld [vmem:[%s13914_s11 + $0x90] ss:$8 sps:$4 sm:$0xff]   ;;  %v10641_v20 = vld [vmem:[%s13914_s11 + $0xe0] ss:$8 sps:$4 sm:$0xff]  }
 0xa7c   :  { %vm5619_vm2 = vcmp.ge.f32.partialorder %v5615_v11, 0.0  ;;  %v5623_v10 = vmul.f32 0.01, %v5615_v11  ;;  %v5616_v50 = vadd.f32 %v8667_v55, %v5605_v26  ;;  %v5593_v44 = vmax.f32 %v5521_v48, %v5541_v31  ;;  %v5543_v18 = vpop.f32.mrb[90].mxu1  ;;  %v10631_v48 = vld [vmem:[%s13914_s11 + $0xa4] ss:$8 sps:$4 sm:$0xff]  }
 0xa7d   :  { %v5600_v23 = vmax.f32 %v5584_v45, %v5592_v56  ;;  %v5594_v52 = vmax.f32 %v5523_v16, %v5543_v18  ;;  %v5545_v33 = vpop.f32.mrb[91].mxu1  ;;  %v10614_v16 = vld [vmem:[%s13913_s10 + $0x38] sm:$0xff]   ;;  %v10649_v31 = vld [vmem:[%s13914_s11 + $0x4] ss:$8 sps:$4 sm:$0xff]  }
 0xa7e   :  { %v5627_v40 = vsel %vm5619_vm2, %v5615_v11, %v5623_v10  ;;  %vm5620_vm3 = vcmp.ge.f32.partialorder %v5616_v50, 0.0  ;;  %v5624_v15 = vmul.f32 0.01, %v5616_v50  ;;  %v5601_v62 = vmax.f32 %v5585_v12, %v5593_v44  ;;  %v10621_v11 = vld [vmem:[%s13913_s10 + $0x70] sm:$0xff]   ;;  %v10622_v26 = vld [vmem:[%s13913_s10 + $0x78] sm:$0xff]   ;;  %v10679_v10 = vld [vmem:[%s13913_s10 + $0x80] sm:$0xff]  }
 0xa7f   :  { %v5638_v58 = vmul.f32 %v8668_v41, %v5627_v40  ;;  %v5602_v3 = vmax.f32 %v5586_v35, %v5594_v52  ;;  %v5595_v47 = vmax.f32 %v5525_v59, %v5545_v33  ;;  %v10615_v59 = vld [vmem:[%s13913_s10 + $0x40] sm:$0xff]   ;;  %v10646_v49 = vld [vmem:[%s13914_s11 + $0xf4] ss:$8 sps:$4 sm:$0xff]   ;;  %v10644_v56 = vld [vmem:[%s13914_s11 + $0xf0] ss:$8 sps:$4 sm:$0xff]  }
 0xa80   :  { %v5628_v46 = vsel %vm5620_vm3, %v5616_v50, %v5624_v15  ;;  %v5606_v0 = vmax.f32 %v5600_v23, %v5601_v62  ;;  %v10647_v62 = vld [vmem:[%s13914_s11] ss:$8 sps:$4 sm:$0xff]  }
 0xa81   :  { %v5639_v21 = vmul.f32 %v8668_v41, %v5628_v46  ;;  %v5603_v4 = vmax.f32 %v5587_v34, %v5595_v47  ;;  %v5649_v53 = vadd.f32 %v8669_v22, %v5638_v58  ;;  %v10611_v34 = vld [vmem:[%s13913_s10 + $0x18] sm:$0xff]  }
 0xa82   :  { %v5617_v43 = vadd.f32 %v8667_v55, %v5606_v0  ;;  %v10650_v0 = vld [vmem:[%s13914_s11 + $0x10] ss:$8 sps:$4 sm:$0xff]  }
 0xa83   :  { %v5650_v36 = vadd.f32 %v8669_v22, %v5639_v21  ;;  %v5607_v60 = vmax.f32 %v5602_v3, %v5603_v4  ;;  %v10655_v21 = vld [vmem:[%s13914_s11 + $0x24] ss:$8 sps:$4 sm:$0xff]   ;;  %v10653_v4 = vld [vmem:[%s13914_s11 + $0x20] ss:$8 sps:$4 sm:$0xff]  }
 0xa84   :  { %vm5621_vm4 = vcmp.ge.f32.partialorder %v5617_v43, 0.0  ;;  %v5625_v9 = vmul.f32 0.01, %v5617_v43 }
 0xa85   :  { %v13142_v39 = vpack.c.bf16 %v5650_v36, %v5649_v53  ;;  %v5618_v28 = vadd.f32 %v8667_v55, %v5607_v60  ;;  %v10618_v55 = vld [vmem:[%s13913_s10 + $0x58] sm:$0xff]   ;;  %v10661_v36 = vld [vmem:[%s13914_s11 + $0x44] ss:$8 sps:$4 sm:$0xff]   ;;  %v10659_v60 = vld [vmem:[%s13914_s11 + $0x40] ss:$8 sps:$4 sm:$0xff]  }
 0xa86   :  { %v5629_v54 = vsel %vm5621_vm4, %v5617_v43, %v5625_v9  ;;  %v10658_v43 = vld [vmem:[%s13914_s11 + $0x34] ss:$8 sps:$4 sm:$0xff]   ;;  %v10656_v53 = vld [vmem:[%s13914_s11 + $0x30] ss:$8 sps:$4 sm:$0xff]  }
 0xa87   :  { %vm5622_vm5 = vcmp.ge.f32.partialorder %v5618_v28, 0.0  ;;  %v5626_v61 = vmul.f32 0.01, %v5618_v28  ;;  %9515 = vmatprep.subr.bf16.mxu1 %v13142_v39  ;;  %9523 = vmatprep.subr.bf16.mxu0 %v13142_v39  ;;  %v5640_v14 = vmul.f32 %v8668_v41, %v5629_v54  ;;  %v10664_v9 = vld [vmem:[%s13914_s11 + $0x54] ss:$8 sps:$4 sm:$0xff]  }
 0xa88   :  { %9516 = vmatpush3.bf16.msra.mxu1 %v13142_v39  ;;  %9524 = vmatpush3.bf16.msra.mxu0 %v13142_v39  ;;  %v10667_v54 = vld [vmem:[%s13914_s11 + $0x64] ss:$8 sps:$4 sm:$0xff]  }
 0xa89   :  { %v5630_v45 = vsel %vm5622_vm5, %v5618_v28, %v5626_v61  ;;  %v5651_v12 = vadd.f32 %v8669_v22, %v5640_v14  ;;  %v10662_v28 = vld [vmem:[%s13914_s11 + $0x50] ss:$8 sps:$4 sm:$0xff]   ;;  %v10665_v61 = vld [vmem:[%s13914_s11 + $0x60] ss:$8 sps:$4 sm:$0xff]   ;;  %v10670_v14 = vld [vmem:[%s13914_s11 + $0x74] ss:$8 sps:$4 sm:$0xff]  }
 0xa8a   :  { %v5641_v5 = vmul.f32 %v8668_v41, %v5630_v45  ;;  %v10680_v41 = vld [vmem:[%s13913_s10 + $0x88] sm:$0xff]   ;;  %v10668_v45 = vld [vmem:[%s13914_s11 + $0x70] ss:$8 sps:$4 sm:$0xff]  }
 0xa8c   :  { %v5652_v63 = vadd.f32 %v8669_v22, %v5641_v5  ;;  %v10652_v22 = vld [vmem:[%s13914_s11 + $0x14] ss:$8 sps:$4 sm:$0xff]   ;;  %v10675_v5 = vld [vmem:[%s13914_s11 + $0x104] ss:$8 sps:$4 sm:$0xff]  }
 0xa8e   :  { %v13148_v35 = vpack.c.bf16 %v5652_v63, %v5651_v12  ;;  %v10671_v12 = vld [vmem:[%s13913_s10 + $0x20] sm:$0xff]  }
 0xa8f   :  { %v10673_v63 = vld [vmem:[%s13914_s11 + $0x100] ss:$8 sps:$4 sm:$0xff]  }
 0xa90   :  { %9517 = vmatprep.subr.bf16.mxu1 %v13148_v35  ;;  %9525 = vmatprep.subr.bf16.mxu0 %v13148_v35 }
 0xa91   :  { %9518 = vmatpush3.bf16.msra.mxu1 %v13148_v35  ;;  %9526 = vmatpush3.bf16.msra.mxu0 %v13148_v35 }
 0xa92   :  { %9539 = vmatprep.subr.bf16.mxu1 %v13142_v39  ;;  %5911 = vmatprep.subr.bf16.mxu0 %v10625_v19  ;;  %v10676_v19 = vld [vmem:[%s13914_s11 + $0x110] ss:$8 sps:$4 sm:$0xff]  }
 0xa94   :  { %9528 = vmatmul.mubr.msk.bf16.vlgmr.msra.gmra.mrb[176].mxu0 %vm898_vm0, %v10611_v34  ;;  %9520 = vmatmul.mubr.msk.bf16.vlgmr.msra.gmra.mrb[156].mxu1 %vm898_vm0, %v10612_v30  ;;  %v10683_v34 = vld [vmem:[%s13914_s11 + $0x124] ss:$8 sps:$4 sm:$0xff]   ;;  %v10681_v30 = vld [vmem:[%s13914_s11 + $0x120] ss:$8 sps:$4 sm:$0xff]  }
 0xa95   :  { %9540 = vmatpush3.bf16.msra.mxu1 %v13142_v39  ;;  %9543 = vmatprep.mubr.msk.bf16.mxu1 %vm898_vm0, %v10613_v6  ;;  %v10686_v6 = vld [vmem:[%s13914_s11 + $0x134] ss:$8 sps:$4 sm:$0xff]  }
 0xa96   :  { %9541 = vmatprep.subr.bf16.mxu1 %v13148_v35  ;;  %5912 = vmatpush1.bf16.msra.mxu0 %v10623_v17  ;;  %v10684_v17 = vld [vmem:[%s13914_s11 + $0x130] ss:$8 sps:$4 sm:$0xff]  }
 0xa97   :  { %5913 = vmatprep.subr.bf16.mxu0 %v10628_v24  ;;  %5943 = vmatprep.mubr.bf16.mxu0 %v14094_v25  ;;  %v10689_v24 = vld [vmem:[%s13914_s11 + $0x144] ss:$8 sps:$4 sm:$0xff]  }
 0xa99   :  { %9542 = vmatpush3.bf16.msra.mxu1 %v13148_v35 }
 0xa9a   :  { %9547 = vmatprep.subr.bf16.mxu1 %v13142_v39  ;;  %5914 = vmatpush1.bf16.msra.mxu0 %v10626_v57  ;;  %v10687_v57 = vld [vmem:[%s13914_s11 + $0x140] ss:$8 sps:$4 sm:$0xff]  }
 0xa9b   :  { %5915 = vmatprep.subr.bf16.mxu0 %v10631_v48  ;;  %v10692_v48 = vld [vmem:[%s13914_s11 + $0x154] ss:$8 sps:$4 sm:$0xff]  }
 0xa9c   :  { %9544 = vmatmul.mubr.msk.bf16.vlgmr.msra.gmra.mrb[160].mxu1 %vm898_vm0, %v10614_v16  ;;  %v10690_v16 = vld [vmem:[%s13914_s11 + $0x150] ss:$8 sps:$4 sm:$0xff]  }
 0xa9d   :  { %9548 = vmatpush3.bf16.msra.mxu1 %v13142_v39  ;;  %9551 = vmatprep.mubr.msk.bf16.mxu1 %vm898_vm0, %v10615_v59  ;;  %v10695_v59 = vld [vmem:[%s13914_s11 + $0x164] ss:$8 sps:$4 sm:$0xff]  }
 0xa9e   :  { %9549 = vmatprep.subr.bf16.mxu1 %v13148_v35  ;;  %5916 = vmatpush1.bf16.msra.mxu0 %v10629_v8  ;;  %v10693_v8 = vld [vmem:[%s13914_s11 + $0x160] ss:$8 sps:$4 sm:$0xff]  }
 0xa9f   :  { %5917 = vmatprep.subr.bf16.mxu0 %v10634_v29  ;;  %v10698_v29 = vld [vmem:[%s13914_s11 + $0x174] ss:$8 sps:$4 sm:$0xff]  }
 0xaa1   :  { %9550 = vmatpush3.bf16.msra.mxu1 %v13148_v35 }
 0xaa2   :  { %9555 = vmatprep.subr.bf16.mxu1 %v13142_v39  ;;  %5918 = vmatpush1.bf16.msra.mxu0 %v10632_v1  ;;  %v10696_v1 = vld [vmem:[%s13914_s11 + $0x170] ss:$8 sps:$4 sm:$0xff]  }
 0xaa3   :  { %5919 = vmatprep.subr.bf16.mxu0 %v10637_v13  ;;  %v10701_v13 = vld [vmem:[%s13914_s11 + $0x184] ss:$8 sps:$4 sm:$0xff]  }
 0xaa4   :  { %9552 = vmatmul.mubr.msk.bf16.vlgmr.msra.gmra.mrb[164].mxu1 %vm898_vm0, %v10616_v37 }
 0xaa5   :  { %9556 = vmatpush3.bf16.msra.mxu1 %v13142_v39  ;;  %9559 = vmatprep.mubr.msk.bf16.mxu1 %vm898_vm0, %v10617_v42 }
 0xaa6   :  { %9557 = vmatprep.subr.bf16.mxu1 %v13148_v35  ;;  %5920 = vmatpush1.bf16.msra.mxu0 %v10635_v7 }
 0xaa7   :  { %5921 = vmatprep.subr.bf16.mxu0 %v10640_v51 }
 0xaa9   :  { %9558 = vmatpush3.bf16.msra.mxu1 %v13148_v35 }
 0xaaa   :  { %9563 = vmatprep.subr.bf16.mxu1 %v13142_v39  ;;  %5922 = vmatpush1.bf16.msra.mxu0 %v10638_v38 }
 0xaab   :  { %5923 = vmatprep.subr.bf16.mxu0 %v10643_v32 }
 0xaac   :  { %9560 = vmatmul.mubr.msk.bf16.vlgmr.msra.gmra.mrb[168].mxu1 %vm898_vm0, %v10618_v55 }
 0xaad   :  { %9564 = vmatpush3.bf16.msra.mxu1 %v13142_v39  ;;  %9567 = vmatprep.mubr.msk.bf16.mxu1 %vm898_vm0, %v10619_v27 }
 0xaae   :  { %9565 = vmatprep.subr.bf16.mxu1 %v13148_v35  ;;  %5924 = vmatpush1.bf16.msra.mxu0 %v10641_v20 }
 0xaaf   :  { %5925 = vmatprep.subr.bf16.mxu0 %v10646_v49 }
 0xab1   :  { %9566 = vmatpush3.bf16.msra.mxu1 %v13148_v35 }
 0xab2   :  { %9571 = vmatprep.subr.bf16.mxu1 %v13142_v39  ;;  %5926 = vmatpush1.bf16.msra.mxu0 %v10644_v56 }
 0xab3   :  { %6044 = vmatprep.subr.bf16.mxu0 %v10649_v31 }
 0xab4   :  { %9568 = vmatmul.mubr.msk.bf16.vlgmr.msra.gmra.mrb[172].mxu1 %vm898_vm0, %v10620_v2 }
 0xab5   :  { %9572 = vmatpush3.bf16.msra.mxu1 %v13142_v39  ;;  %9575 = vmatprep.mubr.msk.bf16.mxu1 %vm898_vm0, %v10621_v11 }
 0xab6   :  { %9573 = vmatprep.subr.bf16.mxu1 %v13148_v35 }
 0xab9   :  { %9574 = vmatpush3.bf16.msra.mxu1 %v13148_v35 }
 0xaba   :  { %9579 = vmatprep.subr.bf16.mxu1 %v13142_v39 }
 0xabc   :  { %9576 = vmatmul.mubr.msk.bf16.vlgmr.msra.gmra.mrb[176].mxu1 %vm898_vm0, %v10622_v26 }
 0xabd   :  { %9580 = vmatpush3.bf16.msra.mxu1 %v13142_v39  ;;  %9583 = vmatprep.mubr.msk.bf16.mxu1 %vm898_vm0, %v10679_v10 }
 0xabe   :  { %9581 = vmatprep.subr.bf16.mxu1 %v13148_v35 }
 0xac1   :  { %9582 = vmatpush3.bf16.msra.mxu1 %v13148_v35 }
 0xac4   :  { %9584 = vmatmul.mubr.msk.bf16.vlgmr.msra.gmra.mrb[180].mxu1 %vm898_vm0, %v10680_v41 }
 0xb67   :  { %v9529_v50 = vpop.f32.mrb[176].mxu0  ;;  %v9521_v44 = vpop.f32.mrb[156].mxu1 }
 0xb68   :  { %v5797_v18 = vpop.f32.mrb[177].mxu0  ;;  %v5709_v23 = vpop.f32.mrb[157].mxu1 }
 0xb69   :  { %v9530_v52 = vpop.f32.mrb[178].mxu0  ;;  %v9522_v33 = vpop.f32.mrb[158].mxu1 }
 0xb6a   :  { %v5813_v40 = vpack.c.bf16 %v9530_v52, %v9529_v50  ;;  %v5800_v15 = vpop.f32.mrb[179].mxu0  ;;  %v5725_v58 = vpack.c.bf16 %v9522_v33, %v9521_v44  ;;  %v5712_v3 = vpop.f32.mrb[159].mxu1 }
 0xb6b   :  { %v5812_v47 = vpack.c.bf16 %v5800_v15, %v5797_v18  ;;  %v5724_v46 = vpack.c.bf16 %v5712_v3, %v5709_v23 }
 0xb6d   :  { %5944 = vmatmul.mubr.bf16.vlgmr.msra.gmra.mrb[180].mxu0 %v5812_v47 }
 0xb6e   :  { %6045 = vmatpush1.bf16.msra.mxu0 %v10647_v62  ;;  %5953 = vmatprep.mubr.bf16.mxu0 %v14094_v25 }
 0xb6f   :  { %6046 = vmatprep.subr.bf16.mxu0 %v10652_v22  ;;  %v13398_v37 = vpop.f32.mrb[160].mxu1  ;;  %v10699_v22 = vld [vmem:[%s13914_s11 + $0x180] ss:$8 sps:$4 sm:$0xff]  }
 0xb70   :  { %v13400_v42 = vpop.f32.mrb[161].mxu1 }
 0xb71   :  { %v13402_v7 = vpop.f32.mrb[162].mxu1 }
 0xb72   :  { %6047 = vmatpush1.bf16.msra.mxu0 %v10650_v0  ;;  %v6398_v51 = vpack.c.bf16 %v13402_v7, %v13398_v37  ;;  %v13406_v38 = vpop.f32.mrb[163].mxu1  ;;  %v10704_v0 = vld [vmem:[%s13914_s11 + $0x194] ss:$8 sps:$4 sm:$0xff]   ;;  %v10743_v37 = vld [vmem:[%s13914_s11 + $0x264] ss:$8 sps:$4 sm:$0xff]  }
 0xb73   :  { %6048 = vmatprep.subr.bf16.mxu0 %v10655_v21  ;;  %v6397_v32 = vpack.c.bf16 %v13406_v38, %v13400_v42  ;;  %v10702_v21 = vld [vmem:[%s13914_s11 + $0x190] ss:$8 sps:$4 sm:$0xff]   ;;  %v10741_v42 = vld [vmem:[%s13914_s11 + $0x260] ss:$8 sps:$4 sm:$0xff]   ;;  %v10746_v7 = vld [vmem:[%s13914_s11 + $0x274] ss:$8 sps:$4 sm:$0xff]  }
 0xb75   :  { %5954 = vmatmul.mubr.bf16.gmra.mrb[184].mxu0 %v5813_v40 }
 0xb76   :  { %6049 = vmatpush1.bf16.msra.mxu0 %v10653_v4  ;;  %6076 = vmatprep.mubr.bf16.mxu0 %v14094_v25  ;;  %v10707_v4 = vld [vmem:[%s13914_s11 + $0x1a4] ss:$8 sps:$4 sm:$0xff]  }
 0xb77   :  { %6050 = vmatprep.subr.bf16.mxu0 %v10658_v43  ;;  %v13410_v55 = vpop.f32.mrb[164].mxu1  ;;  %v10705_v43 = vld [vmem:[%s13914_s11 + $0x1a0] ss:$8 sps:$4 sm:$0xff]  }
 0xb78   :  { %v13412_v27 = vpop.f32.mrb[165].mxu1 }
 0xb79   :  { %v13414_v20 = vpop.f32.mrb[166].mxu1 }
 0xb7a   :  { %6051 = vmatpush1.bf16.msra.mxu0 %v10656_v53  ;;  %v6628_v2 = vpack.c.bf16 %v13414_v20, %v13410_v55  ;;  %v13418_v11 = vpop.f32.mrb[167].mxu1  ;;  %v10710_v53 = vld [vmem:[%s13914_s11 + $0x1b4] ss:$8 sps:$4 sm:$0xff]   ;;  %v10762_v20 = vld [vmem:[%s13914_s11 + $0x2d0] ss:$8 sps:$4 sm:$0xff]  }
 0xb7b   :  { %6052 = vmatprep.subr.bf16.mxu0 %v10661_v36  ;;  %v6627_v26 = vpack.c.bf16 %v13418_v11, %v13412_v27  ;;  %v10708_v36 = vld [vmem:[%s13914_s11 + $0x1b0] ss:$8 sps:$4 sm:$0xff]   ;;  %v10758_v27 = vld [vmem:[%s13914_s11 + $0x2b4] ss:$8 sps:$4 sm:$0xff]  }
 0xb7c   :  { %v10756_v11 = vld [vmem:[%s13914_s11 + $0x2b0] ss:$8 sps:$4 sm:$0xff]   ;;  %v10764_v55 = vld [vmem:[%s13914_s11 + $0x2d4] ss:$8 sps:$4 sm:$0xff]  }
 0xb7e   :  { %6053 = vmatpush1.bf16.msra.mxu0 %v10659_v60  ;;  %v10713_v60 = vld [vmem:[%s13914_s11 + $0x1c4] ss:$8 sps:$4 sm:$0xff]  }
 0xb7f   :  { %6054 = vmatprep.subr.bf16.mxu0 %v10664_v9  ;;  %v13422_v49 = vpop.f32.mrb[168].mxu1  ;;  %v10711_v9 = vld [vmem:[%s13914_s11 + $0x1c0] ss:$8 sps:$4 sm:$0xff]  }
 0xb80   :  { %v13424_v56 = vpop.f32.mrb[169].mxu1 }
 0xb81   :  { %v13426_v31 = vpop.f32.mrb[170].mxu1 }
 0xb82   :  { %6055 = vmatpush1.bf16.msra.mxu0 %v10662_v28  ;;  %v6858_v10 = vpack.c.bf16 %v13426_v31, %v13422_v49  ;;  %v13430_v41 = vpop.f32.mrb[171].mxu1  ;;  %v10716_v28 = vld [vmem:[%s13914_s11 + $0x1d4] ss:$8 sps:$4 sm:$0xff]   ;;  %v10786_v31 = vld [vmem:[%s13914_s11 + $0x350] ss:$8 sps:$4 sm:$0xff]  }
 0xb83   :  { %6056 = vmatprep.subr.bf16.mxu0 %v10667_v54  ;;  %v6857_v50 = vpack.c.bf16 %v13430_v41, %v13424_v56  ;;  %v10714_v54 = vld [vmem:[%s13914_s11 + $0x1d0] ss:$8 sps:$4 sm:$0xff]   ;;  %v10782_v56 = vld [vmem:[%s13914_s11 + $0x334] ss:$8 sps:$4 sm:$0xff]  }
 0xb84   :  { %v10780_v41 = vld [vmem:[%s13914_s11 + $0x330] ss:$8 sps:$4 sm:$0xff]   ;;  %v10788_v49 = vld [vmem:[%s13914_s11 + $0x354] ss:$8 sps:$4 sm:$0xff]  }
 0xb86   :  { %6057 = vmatpush1.bf16.msra.mxu0 %v10665_v61  ;;  %v10719_v61 = vld [vmem:[%s13914_s11 + $0x1e4] ss:$8 sps:$4 sm:$0xff]  }
 0xb87   :  { %6058 = vmatprep.subr.bf16.mxu0 %v10670_v14  ;;  %v13434_v44 = vpop.f32.mrb[172].mxu1  ;;  %v10717_v14 = vld [vmem:[%s13914_s11 + $0x1e0] ss:$8 sps:$4 sm:$0xff]  }
 0xb88   :  { %v13436_v18 = vpop.f32.mrb[173].mxu1 }
 0xb89   :  { %v13438_v52 = vpop.f32.mrb[174].mxu1 }
 0xb8a   :  { %6059 = vmatpush1.bf16.msra.mxu0 %v10668_v45  ;;  %v7088_v40 = vpack.c.bf16 %v13438_v52, %v13434_v44  ;;  %v13442_v15 = vpop.f32.mrb[175].mxu1  ;;  %v10722_v45 = vld [vmem:[%s13914_s11 + $0x1f4] ss:$8 sps:$4 sm:$0xff]   ;;  %v10810_v52 = vld [vmem:[%s13914_s11 + $0x3d0] ss:$8 sps:$4 sm:$0xff]  }
 0xb8b   :  { %9531 = vmatprep.subr.bf16.mxu0 %v13142_v39  ;;  %v10812_v44 = vld [vmem:[%s13914_s11 + $0x3d4] ss:$8 sps:$4 sm:$0xff]  }
 0xb8d   :  { %6077 = vmatmul.mubr.bf16.vlgmr.msra.gmra.mrb[180].mxu0 %v5724_v46 }
 0xb8e   :  { %9532 = vmatpush3.bf16.msra.mxu0 %v13142_v39  ;;  %6086 = vmatprep.mubr.bf16.mxu0 %v14094_v25  ;;  %v10672_v39 = vld [vmem:[%s13913_s10 + $0x28] sm:$0xff]  }
 0xb8f   :  { %9533 = vmatprep.subr.bf16.mxu0 %v13148_v35 }
 0xb92   :  { %9534 = vmatpush3.bf16.msra.mxu0 %v13148_v35  ;;  %v10678_v35 = vld [vmem:[%s13914_s11 + $0x114] ss:$8 sps:$4 sm:$0xff]  }
 0xb93   :  { %6266 = vmatprep.subr.bf16.mxu0 %v10675_v5  ;;  %v13490_v5 = vpop.f32.mrb[176].mxu1 }
 0xb95   :  { %6087 = vmatmul.mubr.bf16.gmra.mrb[184].mxu0 %v5725_v58  ;;  %v7087_v58 = vpack.c.bf16 %v13442_v15, %v13436_v18  ;;  %v10806_v18 = vld [vmem:[%s13914_s11 + $0x3b4] ss:$8 sps:$4 sm:$0xff]   ;;  %v10804_v15 = vld [vmem:[%s13914_s11 + $0x3b0] ss:$8 sps:$4 sm:$0xff]  }
 0xb96   :  { %9535 = vmatprep.mubr.msk.bf16.mxu0 %vm898_vm0, %v10671_v12  ;;  %v10720_v12 = vld [vmem:[%s13914_s11 + $0x1f0] ss:$8 sps:$4 sm:$0xff]  }
 0xb9d   :  { %9536 = vmatmul.mubr.msk.bf16.vlgmr.msra.gmra.mrb[188].mxu0 %vm898_vm0, %v10672_v39  ;;  %v13495_v39 = vpop.f32.mrb[177].mxu1  ;;  %vm10845_vm0 = vmmov 0  }
 0xb9e   :  { %6267 = vmatpush1.bf16.msra.mxu0 %v10673_v63  ;;  %6298 = vmatprep.mubr.bf16.mxu0 %v14094_v25  ;;  %v10725_v63 = vld [vmem:[%s13914_s11 + $0x204] ss:$8 sps:$4 sm:$0xff]  }
 0xb9f   :  { %6268 = vmatprep.subr.bf16.mxu0 %v10678_v35  ;;  %v13500_v35 = vpop.f32.mrb[178].mxu1 }
 0xba2   :  { %6269 = vmatpush1.bf16.msra.mxu0 %v10676_v19  ;;  %v7318_v19 = vpack.c.bf16 %v13500_v35, %v13490_v5  ;;  %v10836_v5 = vld [vmem:[%s13914_s11 + $0x454] ss:$8 sps:$4 sm:$0xff]   ;;  %v10834_v35 = vld [vmem:[%s13914_s11 + $0x450] ss:$8 sps:$4 sm:$0xff]  }
 0xba3   :  { %6270 = vmatprep.subr.bf16.mxu0 %v10683_v34  ;;  %v13504_v34 = vpop.f32.mrb[179].mxu1 }
 0xba6   :  { %6271 = vmatpush1.bf16.msra.mxu0 %v10681_v30  ;;  %v7317_v30 = vpack.c.bf16 %v13504_v34, %v13495_v39  ;;  %v10830_v39 = vld [vmem:[%s13914_s11 + $0x434] ss:$8 sps:$4 sm:$0xff]   ;;  %v10828_v34 = vld [vmem:[%s13914_s11 + $0x430] ss:$8 sps:$4 sm:$0xff]  }
 0xba7   :  { %6272 = vmatprep.subr.bf16.mxu0 %v10686_v6  ;;  %v10723_v6 = vld [vmem:[%s13914_s11 + $0x200] ss:$8 sps:$4 sm:$0xff]  }
 0xbaa   :  { %6273 = vmatpush1.bf16.msra.mxu0 %v10684_v17  ;;  %v10728_v17 = vld [vmem:[%s13914_s11 + $0x214] ss:$8 sps:$4 sm:$0xff]  }
 0xbab   :  { %6274 = vmatprep.subr.bf16.mxu0 %v10689_v24  ;;  %v10726_v24 = vld [vmem:[%s13914_s11 + $0x210] ss:$8 sps:$4 sm:$0xff]  }
 0xbae   :  { %6275 = vmatpush1.bf16.msra.mxu0 %v10687_v57  ;;  %v10731_v57 = vld [vmem:[%s13914_s11 + $0x224] ss:$8 sps:$4 sm:$0xff]  }
 0xbaf   :  { %6276 = vmatprep.subr.bf16.mxu0 %v10692_v48  ;;  %v10729_v48 = vld [vmem:[%s13914_s11 + $0x220] ss:$8 sps:$4 sm:$0xff]  }
 0xbb2   :  { %6277 = vmatpush1.bf16.msra.mxu0 %v10690_v16  ;;  %v10734_v16 = vld [vmem:[%s13914_s11 + $0x234] ss:$8 sps:$4 sm:$0xff]  }
 0xbb3   :  { %6278 = vmatprep.subr.bf16.mxu0 %v10695_v59  ;;  %v10732_v59 = vld [vmem:[%s13914_s11 + $0x230] ss:$8 sps:$4 sm:$0xff]  }
 0xbb6   :  { %6279 = vmatpush1.bf16.msra.mxu0 %v10693_v8  ;;  %v10737_v8 = vld [vmem:[%s13914_s11 + $0x244] ss:$8 sps:$4 sm:$0xff]  }
 0xbb7   :  { %6280 = vmatprep.subr.bf16.mxu0 %v10698_v29  ;;  %v10735_v29 = vld [vmem:[%s13914_s11 + $0x240] ss:$8 sps:$4 sm:$0xff]  }
 0xbba   :  { %6281 = vmatpush1.bf16.msra.mxu0 %v10696_v1  ;;  %v10740_v1 = vld [vmem:[%s13914_s11 + $0x254] ss:$8 sps:$4 sm:$0xff]  }
 0xbbb   :  { %6496 = vmatprep.subr.bf16.mxu0 %v10701_v13  ;;  %v10738_v13 = vld [vmem:[%s13914_s11 + $0x250] ss:$8 sps:$4 sm:$0xff]  }
 0xc70   :  { %v9537_v23 = vpop.f32.mrb[188].mxu0 }
 0xc71   :  { %v6152_v33 = vpop.f32.mrb[189].mxu0 }
 0xc72   :  { %v9538_v62 = vpop.f32.mrb[190].mxu0 }
 0xc73   :  { %v6168_v3 = vpack.c.bf16 %v9538_v62, %v9537_v23  ;;  %v6155_v47 = vpop.f32.mrb[191].mxu0 }
 0xc74   :  { %v6167_v46 = vpack.c.bf16 %v6155_v47, %v6152_v33  ;;  %v10749_v33 = vld [vmem:[%s13914_s11 + $0x284] ss:$8 sps:$4 sm:$0xff]  }
 0xc76   :  { %6299 = vmatmul.mubr.bf16.vlgmr.msra.gmra.mrb[180].mxu0 %v6167_v46  ;;  %v10752_v46 = vld [vmem:[%s13914_s11 + $0x294] ss:$8 sps:$4 sm:$0xff]  }
 0xc77   :  { %6497 = vmatpush1.bf16.msra.mxu0 %v10699_v22  ;;  %6308 = vmatprep.mubr.bf16.mxu0 %v14094_v25  ;;  %v10747_v22 = vld [vmem:[%s13914_s11 + $0x280] ss:$8 sps:$4 sm:$0xff]  }
 0xc78   :  { %6498 = vmatprep.subr.bf16.mxu0 %v10704_v0  ;;  %v10750_v0 = vld [vmem:[%s13914_s11 + $0x290] ss:$8 sps:$4 sm:$0xff]  }
 0xc7b   :  { %6499 = vmatpush1.bf16.msra.mxu0 %v10702_v21  ;;  %v10755_v21 = vld [vmem:[%s13914_s11 + $0x2a4] ss:$8 sps:$4 sm:$0xff]  }
 0xc7c   :  { %6500 = vmatprep.subr.bf16.mxu0 %v10707_v4  ;;  %v10753_v4 = vld [vmem:[%s13914_s11 + $0x2a0] ss:$8 sps:$4 sm:$0xff]  }
 0xc7e   :  { %6309 = vmatmul.mubr.bf16.gmra.mrb[184].mxu0 %v6168_v3 }
 0xc7f   :  { %6501 = vmatpush1.bf16.msra.mxu0 %v10705_v43  ;;  %6528 = vmatprep.mubr.bf16.mxu0 %v14094_v25  ;;  %v10759_v43 = vld [vmem:[%s13914_s11 + $0x2c0] ss:$8 sps:$4 sm:$0xff]  }
 0xc80   :  { %6502 = vmatprep.subr.bf16.mxu0 %v10710_v53  ;;  %v10765_v53 = vld [vmem:[%s13914_s11 + $0x2e0] ss:$8 sps:$4 sm:$0xff]  }
 0xc83   :  { %6503 = vmatpush1.bf16.msra.mxu0 %v10708_v36  ;;  %v10770_v36 = vld [vmem:[%s13914_s11 + $0x2f4] ss:$8 sps:$4 sm:$0xff]  }
 0xc84   :  { %6504 = vmatprep.subr.bf16.mxu0 %v10713_v60  ;;  %v10768_v60 = vld [vmem:[%s13914_s11 + $0x2f0] ss:$8 sps:$4 sm:$0xff]  }
 0xc87   :  { %6505 = vmatpush1.bf16.msra.mxu0 %v10711_v9  ;;  %v10773_v9 = vld [vmem:[%s13914_s11 + $0x304] ss:$8 sps:$4 sm:$0xff]  }
 0xc88   :  { %6506 = vmatprep.subr.bf16.mxu0 %v10716_v28  ;;  %v10771_v28 = vld [vmem:[%s13914_s11 + $0x300] ss:$8 sps:$4 sm:$0xff]  }
 0xc8b   :  { %6507 = vmatpush1.bf16.msra.mxu0 %v10714_v54  ;;  %v10776_v54 = vld [vmem:[%s13914_s11 + $0x314] ss:$8 sps:$4 sm:$0xff]  }
 0xc8c   :  { %6508 = vmatprep.subr.bf16.mxu0 %v10719_v61  ;;  %v10774_v61 = vld [vmem:[%s13914_s11 + $0x310] ss:$8 sps:$4 sm:$0xff]  }
 0xc8f   :  { %6509 = vmatpush1.bf16.msra.mxu0 %v10717_v14  ;;  %v10779_v14 = vld [vmem:[%s13914_s11 + $0x324] ss:$8 sps:$4 sm:$0xff]  }
 0xc90   :  { %6510 = vmatprep.subr.bf16.mxu0 %v10722_v45  ;;  %v10777_v45 = vld [vmem:[%s13914_s11 + $0x320] ss:$8 sps:$4 sm:$0xff]  }
 0xc93   :  { %6511 = vmatpush1.bf16.msra.mxu0 %v10720_v12  ;;  %v10783_v12 = vld [vmem:[%s13914_s11 + $0x340] ss:$8 sps:$4 sm:$0xff]  }
 0xc94   :  { %6726 = vmatprep.subr.bf16.mxu0 %v10725_v63  ;;  %v10789_v63 = vld [vmem:[%s13914_s11 + $0x360] ss:$8 sps:$4 sm:$0xff]  }
 0xc96   :  { %6529 = vmatmul.mubr.bf16.vlgmr.msra.gmra.mrb[180].mxu0 %v6397_v32  ;;  %v10744_v32 = vld [vmem:[%s13914_s11 + $0x270] ss:$8 sps:$4 sm:$0xff]  }
 0xc97   :  { %6727 = vmatpush1.bf16.msra.mxu0 %v10723_v6  ;;  %6538 = vmatprep.mubr.bf16.mxu0 %v14094_v25  ;;  %v10794_v6 = vld [vmem:[%s13914_s11 + $0x374] ss:$8 sps:$4 sm:$0xff]  }
 0xc98   :  { %6728 = vmatprep.subr.bf16.mxu0 %v10728_v17  ;;  %v10792_v17 = vld [vmem:[%s13914_s11 + $0x370] ss:$8 sps:$4 sm:$0xff]  }
 0xc9b   :  { %6729 = vmatpush1.bf16.msra.mxu0 %v10726_v24  ;;  %v10797_v24 = vld [vmem:[%s13914_s11 + $0x384] ss:$8 sps:$4 sm:$0xff]  }
 0xc9c   :  { %6730 = vmatprep.subr.bf16.mxu0 %v10731_v57  ;;  %v10795_v57 = vld [vmem:[%s13914_s11 + $0x380] ss:$8 sps:$4 sm:$0xff]  }
 0xc9e   :  { %6539 = vmatmul.mubr.bf16.gmra.mrb[184].mxu0 %v6398_v51  ;;  %v13558_v51 = vpop.f32.mrb[180].mxu1 }
 0xc9f   :  { %6731 = vmatpush1.bf16.msra.mxu0 %v10729_v48  ;;  %6758 = vmatprep.mubr.bf16.mxu0 %v14094_v25  ;;  %v13560_v38 = vpop.f32.mrb[181].mxu1  ;;  %v10800_v48 = vld [vmem:[%s13914_s11 + $0x394] ss:$8 sps:$4 sm:$0xff]  }
 0xca0   :  { %6732 = vmatprep.subr.bf16.mxu0 %v10734_v16  ;;  %v13565_v23 = vpop.f32.mrb[182].mxu1  ;;  %v10798_v16 = vld [vmem:[%s13914_s11 + $0x390] ss:$8 sps:$4 sm:$0xff]  }
 0xca1   :  { %v7548_v62 = vpack.c.bf16 %v13565_v23, %v13558_v51  ;;  %v13572_v3 = vpop.f32.mrb[183].mxu1  ;;  %v10844_v51 = vmov 0.0  }
 0xca2   :  { %v7547_v47 = vpack.c.bf16 %v13572_v3, %v13560_v38  ;;  %9587 = vmatprep.subr.mxu1 %v10844_v51  ;;  %9589 = vmatprep.mubr.msk.f32.mxu1 %vm10845_vm0, %v10844_v51 }
 0xca3   :  { %6733 = vmatpush1.bf16.msra.mxu0 %v10732_v59  ;;  %v10803_v59 = vld [vmem:[%s13914_s11 + $0x3a4] ss:$8 sps:$4 sm:$0xff]  }
 0xca4   :  { %6734 = vmatprep.subr.bf16.mxu0 %v10737_v8  ;;  %v10801_v8 = vld [vmem:[%s13914_s11 + $0x3a0] ss:$8 sps:$4 sm:$0xff]  }
 0xca7   :  { %6735 = vmatpush1.bf16.msra.mxu0 %v10735_v29  ;;  %v10807_v29 = vld [vmem:[%s13914_s11 + $0x3c0] ss:$8 sps:$4 sm:$0xff]  }
 0xca8   :  { %6736 = vmatprep.subr.bf16.mxu0 %v10740_v1  ;;  %v10813_v1 = vld [vmem:[%s13914_s11 + $0x3e0] ss:$8 sps:$4 sm:$0xff]  }
 0xcab   :  { %6737 = vmatpush1.bf16.msra.mxu0 %v10738_v13  ;;  %v10818_v13 = vld [vmem:[%s13914_s11 + $0x3f4] ss:$8 sps:$4 sm:$0xff]  }
 0xcac   :  { %6738 = vmatprep.subr.bf16.mxu0 %v10743_v37  ;;  %v10816_v37 = vld [vmem:[%s13914_s11 + $0x3f0] ss:$8 sps:$4 sm:$0xff]  }
 0xcaf   :  { %6739 = vmatpush1.bf16.msra.mxu0 %v10741_v42  ;;  %v10821_v42 = vld [vmem:[%s13914_s11 + $0x404] ss:$8 sps:$4 sm:$0xff]  }
 0xcb0   :  { %6740 = vmatprep.subr.bf16.mxu0 %v10746_v7  ;;  %v10819_v7 = vld [vmem:[%s13914_s11 + $0x400] ss:$8 sps:$4 sm:$0xff]  }
 0xcb3   :  { %6741 = vmatpush1.bf16.msra.mxu0 %v10744_v32  ;;  %v10824_v32 = vld [vmem:[%s13914_s11 + $0x414] ss:$8 sps:$4 sm:$0xff]  }
 0xcb4   :  { %6956 = vmatprep.subr.bf16.mxu0 %v10749_v33  ;;  %v10822_v33 = vld [vmem:[%s13914_s11 + $0x410] ss:$8 sps:$4 sm:$0xff]  }
 0xcb6   :  { %6759 = vmatmul.mubr.bf16.vlgmr.msra.gmra.mrb[180].mxu0 %v6627_v26  ;;  %v10761_v26 = vld [vmem:[%s13914_s11 + $0x2c4] ss:$8 sps:$4 sm:$0xff]  }
 0xcb7   :  { %6957 = vmatpush1.bf16.msra.mxu0 %v10747_v22  ;;  %6768 = vmatprep.mubr.bf16.mxu0 %v14094_v25  ;;  %v10827_v22 = vld [vmem:[%s13914_s11 + $0x424] ss:$8 sps:$4 sm:$0xff]  }
 0xcb8   :  { %6958 = vmatprep.subr.bf16.mxu0 %v10752_v46  ;;  %v10825_v46 = vld [vmem:[%s13914_s11 + $0x420] ss:$8 sps:$4 sm:$0xff]  }
 0xcbb   :  { %6959 = vmatpush1.bf16.msra.mxu0 %v10750_v0  ;;  %v10831_v0 = vld [vmem:[%s13914_s11 + $0x440] ss:$8 sps:$4 sm:$0xff]  }
 0xcbc   :  { %6960 = vmatprep.subr.bf16.mxu0 %v10755_v21  ;;  %v10837_v21 = vld [vmem:[%s13914_s11 + $0x460] ss:$8 sps:$4 sm:$0xff]  }
 0xcbe   :  { %6769 = vmatmul.mubr.bf16.gmra.mrb[184].mxu0 %v6628_v2  ;;  %v10767_v2 = vld [vmem:[%s13914_s11 + $0x2e4] ss:$8 sps:$4 sm:$0xff]  }
 0xcbf   :  { %6961 = vmatpush1.bf16.msra.mxu0 %v10753_v4  ;;  %6988 = vmatprep.mubr.bf16.mxu0 %v14094_v25  ;;  %v10842_v4 = vld [vmem:[%s13914_s11 + $0x474] ss:$8 sps:$4 sm:$0xff]  }
 0xcc0   :  { %6962 = vmatprep.subr.bf16.mxu0 %v10758_v27  ;;  %v10840_v27 = vld [vmem:[%s13914_s11 + $0x470] ss:$8 sps:$4 sm:$0xff]  }
 0xcc3   :  { %6963 = vmatpush1.bf16.msra.mxu0 %v10756_v11 }
 0xcc4   :  { %6964 = vmatprep.subr.bf16.mxu0 %v10761_v26 }
 0xcc7   :  { %6965 = vmatpush1.bf16.msra.mxu0 %v10759_v43 }
 0xcc8   :  { %6966 = vmatprep.subr.bf16.mxu0 %v10764_v55 }
 0xccb   :  { %6967 = vmatpush1.bf16.msra.mxu0 %v10762_v20 }
 0xccc   :  { %6968 = vmatprep.subr.bf16.mxu0 %v10767_v2 }
 0xccf   :  { %6969 = vmatpush1.bf16.msra.mxu0 %v10765_v53 }
 0xcd0   :  { %6970 = vmatprep.subr.bf16.mxu0 %v10770_v36 }
 0xcd3   :  { %6971 = vmatpush1.bf16.msra.mxu0 %v10768_v60 }
 0xcd4   :  { %7186 = vmatprep.subr.bf16.mxu0 %v10773_v9 }
 0xcd6   :  { %6989 = vmatmul.mubr.bf16.vlgmr.msra.gmra.mrb[180].mxu0 %v6857_v50  ;;  %v10785_v50 = vld [vmem:[%s13914_s11 + $0x344] ss:$8 sps:$4 sm:$0xff]  }
 0xcd7   :  { %7187 = vmatpush1.bf16.msra.mxu0 %v10771_v28  ;;  %6998 = vmatprep.mubr.bf16.mxu0 %v14094_v25 }
 0xcd8   :  { %7188 = vmatprep.subr.bf16.mxu0 %v10776_v54 }
 0xcdb   :  { %7189 = vmatpush1.bf16.msra.mxu0 %v10774_v61  ;;  %v9011_v61 = vld [vmem:[%s13919_s13] ss:$0 sm:$0xff] }
 0xcdc   :  { %7190 = vmatprep.subr.bf16.mxu0 %v10779_v14 }
 0xcde   :  { %6999 = vmatmul.mubr.bf16.gmra.mrb[184].mxu0 %v6858_v10  ;;  %v10791_v10 = vld [vmem:[%s13914_s11 + $0x364] ss:$8 sps:$4 sm:$0xff]  }
 0xcdf   :  { %7191 = vmatpush1.bf16.msra.mxu0 %v10777_v45  ;;  %7218 = vmatprep.mubr.bf16.mxu0 %v14094_v25  ;;  %v9012_v45 = vld [vmem:[%s13920_s14] ss:$0 sm:$0xff] }
 0xce0   :  { %7192 = vmatprep.subr.bf16.mxu0 %v10782_v56 }
 0xce3   :  { %7193 = vmatpush1.bf16.msra.mxu0 %v10780_v41 }
 0xce4   :  { %7194 = vmatprep.subr.bf16.mxu0 %v10785_v50  ;;  %v7821_v50 = vld [vmem:[%s13921_s16] sm:$0xff] }
 0xce7   :  { %7195 = vmatpush1.bf16.msra.mxu0 %v10783_v12  ;;  %v7822_v12 = vld [vmem:[%s13921_s16 + $0x8] sm:$0xff] }
 0xce8   :  { %7196 = vmatprep.subr.bf16.mxu0 %v10788_v49 }
 0xceb   :  { %7197 = vmatpush1.bf16.msra.mxu0 %v10786_v31 }
 0xcec   :  { %7198 = vmatprep.subr.bf16.mxu0 %v10791_v10  ;;  %v7746_v10 = vld [vmem:[%s13922_s15] sm:$0x3] }
 0xcef   :  { %7199 = vmatpush1.bf16.msra.mxu0 %v10789_v63  ;;  %v9647_v63 = vpack.c.bf16 %v7822_v12, %v7821_v50 }
 0xcf0   :  { %7200 = vmatprep.subr.bf16.mxu0 %v10794_v6  ;;  %v7823_v6 = vld [vmem:[%s13921_s16 + $0x10] sm:$0xff] }
 0xcf3   :  { %7201 = vmatpush1.bf16.msra.mxu0 %v10792_v17  ;;  %v7824_v17 = vld [vmem:[%s13921_s16 + $0x18] sm:$0xff] }
 0xcf4   :  { %7416 = vmatprep.subr.bf16.mxu0 %v10797_v24  ;;  %v10847_v24 = vmov 0.0|0.0  }
 0xcf6   :  { %7219 = vmatmul.mubr.bf16.vlgmr.msra.gmra.mrb[180].mxu0 %v7087_v58  ;;  %v10809_v58 = vld [vmem:[%s13914_s11 + $0x3c4] ss:$8 sps:$4 sm:$0xff]  }
 0xcf7   :  { %7417 = vmatpush1.bf16.msra.mxu0 %v10795_v57  ;;  %7228 = vmatprep.mubr.bf16.mxu0 %v14094_v25  ;;  %v9650_v57 = vpack.c.bf16 %v7824_v17, %v7823_v6 }
 0xcf8   :  { %7418 = vmatprep.subr.bf16.mxu0 %v10800_v48  ;;  %v7825_v48 = vld [vmem:[%s13921_s16 + $0x20] sm:$0xff] }
 0xcfb   :  { %7419 = vmatpush1.bf16.msra.mxu0 %v10798_v16  ;;  %v7826_v16 = vld [vmem:[%s13921_s16 + $0x28] sm:$0xff] }
 0xcfc   :  { %7420 = vmatprep.subr.bf16.mxu0 %v10803_v59  ;;  %v9653_v59 = vpack.c.bf16 %v7826_v16, %v7825_v48 }
 0xcfe   :  { %7229 = vmatmul.mubr.bf16.gmra.mrb[184].mxu0 %v7088_v40  ;;  %v10815_v40 = vld [vmem:[%s13914_s11 + $0x3e4] ss:$8 sps:$4 sm:$0xff]  }
 0xcff   :  { %7421 = vmatpush1.bf16.msra.mxu0 %v10801_v8  ;;  %7448 = vmatprep.mubr.bf16.mxu0 %v14094_v25  ;;  %v7827_v8 = vld [vmem:[%s13921_s16 + $0x30] sm:$0xff] }
 0xd00   :  { %7422 = vmatprep.subr.bf16.mxu0 %v10806_v18  ;;  %v7828_v18 = vld [vmem:[%s13921_s16 + $0x38] sm:$0xff] }
 0xd03   :  { %7423 = vmatpush1.bf16.msra.mxu0 %v10804_v15  ;;  %v9656_v15 = vpack.c.bf16 %v7828_v18, %v7827_v8 }
 0xd04   :  { %7424 = vmatprep.subr.bf16.mxu0 %v10809_v58  ;;  %v7929_v58 = vld [vmem:[%s13923_s20] sm:$0xff] }
 0xd07   :  { %7425 = vmatpush1.bf16.msra.mxu0 %v10807_v29  ;;  %v7930_v29 = vld [vmem:[%s13923_s20 + $0x8] sm:$0xff] }
 0xd08   :  { %7426 = vmatprep.subr.bf16.mxu0 %v10812_v44  ;;  %v9659_v44 = vpack.c.bf16 %v7930_v29, %v7929_v58 }
 0xd0b   :  { %7427 = vmatpush1.bf16.msra.mxu0 %v10810_v52  ;;  %v7931_v52 = vld [vmem:[%s13923_s20 + $0x10] sm:$0xff] }
 0xd0c   :  { %7428 = vmatprep.subr.bf16.mxu0 %v10815_v40  ;;  %v7932_v40 = vld [vmem:[%s13923_s20 + $0x18] sm:$0xff] }
 0xd0f   :  { %7429 = vmatpush1.bf16.msra.mxu0 %v10813_v1 }
 0xd10   :  { %7430 = vmatprep.subr.bf16.mxu0 %v10818_v13 }
 0xd13   :  { %7431 = vmatpush1.bf16.msra.mxu0 %v10816_v37  ;;  %v9662_v37 = vpack.c.bf16 %v7932_v40, %v7931_v52 }
 0xd14   :  { %7646 = vmatprep.subr.bf16.mxu0 %v10821_v42  ;;  %v7933_v42 = vld [vmem:[%s13923_s20 + $0x20] sm:$0xff] }
 0xd16   :  { %7449 = vmatmul.mubr.bf16.vlgmr.msra.gmra.mrb[180].mxu0 %v7317_v30  ;;  %v10833_v30 = vld [vmem:[%s13914_s11 + $0x444] ss:$8 sps:$4 sm:$0xff]  }
 0xd17   :  { %7647 = vmatpush1.bf16.msra.mxu0 %v10819_v7  ;;  %7458 = vmatprep.mubr.bf16.mxu0 %v14094_v25  ;;  %v7934_v7 = vld [vmem:[%s13923_s20 + $0x28] sm:$0xff] }
 0xd18   :  { %7648 = vmatprep.subr.bf16.mxu0 %v10824_v32  ;;  %v9665_v32 = vpack.c.bf16 %v7934_v7, %v7933_v42 }
 0xd1b   :  { %7649 = vmatpush1.bf16.msra.mxu0 %v10822_v33  ;;  %v7935_v33 = vld [vmem:[%s13923_s20 + $0x30] sm:$0xff] }
 0xd1c   :  { %7650 = vmatprep.subr.bf16.mxu0 %v10827_v22  ;;  %v7936_v22 = vld [vmem:[%s13923_s20 + $0x38] sm:$0xff] }
 0xd1e   :  { %7459 = vmatmul.mubr.bf16.gmra.mrb[184].mxu0 %v7318_v19  ;;  %v10839_v19 = vld [vmem:[%s13914_s11 + $0x464] ss:$8 sps:$4 sm:$0xff]  }
 0xd1f   :  { %7651 = vmatpush1.bf16.msra.mxu0 %v10825_v46  ;;  %7678 = vmatprep.mubr.bf16.mxu0 %v14094_v25  ;;  %v9668_v46 = vpack.c.bf16 %v7936_v22, %v7935_v33 }
 0xd20   :  { %7652 = vmatprep.subr.bf16.mxu0 %v10830_v39  ;;  %v7937_v39 = vld [vmem:[%s13923_s20 + $0x40] sm:$0xff] }
 0xd23   :  { %7653 = vmatpush1.bf16.msra.mxu0 %v10828_v34  ;;  %v7938_v34 = vld [vmem:[%s13923_s20 + $0x48] sm:$0xff] }
 0xd24   :  { %7654 = vmatprep.subr.bf16.mxu0 %v10833_v30  ;;  %v9671_v30 = vpack.c.bf16 %v7938_v34, %v7937_v39 }
 0xd27   :  { %7655 = vmatpush1.bf16.msra.mxu0 %v10831_v0  ;;  %v7939_v0 = vld [vmem:[%s13923_s20 + $0x50] sm:$0xff] }
 0xd28   :  { %7656 = vmatprep.subr.bf16.mxu0 %v10836_v5  ;;  %v7940_v5 = vld [vmem:[%s13923_s20 + $0x58] sm:$0xff] }
 0xd2b   :  { %7657 = vmatpush1.bf16.msra.mxu0 %v10834_v35  ;;  %v9674_v35 = vpack.c.bf16 %v7940_v5, %v7939_v0 }
 0xd2c   :  { %7658 = vmatprep.subr.bf16.mxu0 %v10839_v19  ;;  %v7941_v19 = vld [vmem:[%s13923_s20 + $0x60] sm:$0xff] }
 0xd2f   :  { %7659 = vmatpush1.bf16.msra.mxu0 %v10837_v21  ;;  %v7942_v21 = vld [vmem:[%s13923_s20 + $0x68] sm:$0xff] }
 0xd30   :  { %7660 = vmatprep.subr.bf16.mxu0 %v10842_v4  ;;  %v9677_v4 = vpack.c.bf16 %v7942_v21, %v7941_v19 }
 0xd33   :  { %7661 = vmatpush1.bf16.msra.mxu0 %v10840_v27  ;;  %v7943_v27 = vld [vmem:[%s13923_s20 + $0x70] sm:$0xff] }
 0xd36   :  { %7679 = vmatmul.mubr.bf16.vlgmr.msra.gmra.mrb[180].mxu0 %v7547_v47 }
 0xd37   :  { %7688 = vmatprep.mubr.bf16.mxu0 %v14094_v25  ;;  %v9010_v25 = vld [vmem:[%s13918_s12] ss:$0 sm:$0xff]  ;;  %s10846_s12 = smov 64  }
 0xd3e   :  { %7689 = vmatmul.mubr.bf16.gmra.mrb[184].mxu0 %v7548_v62 }
 0xe09   :  { %v7680_v11 = vpop.f32.mrb[180].mxu0 }
 0xe0a   :  { %v7682_v26 = vpop.f32.mrb[181].mxu0 }
 0xe0b   :  { %v7684_v43 = vpop.f32.mrb[182].mxu0 }
 0xe0c   :  { %v7707_v55 = vmax.f32 %v7680_v11, %v7684_v43  ;;  %v7686_v20 = vpop.f32.mrb[183].mxu0  ;;  %v7944_v11 = vld [vmem:[%s13923_s20 + $0x78] sm:$0xff]  ;;  %v27_v43 = vstv %s13924_s21 }
 0xe0d   :  { %v7708_v2 = vmax.f32 %v7682_v26, %v7686_v20  ;;  %v9680_v26 = vpack.c.bf16 %v7944_v11, %v7943_v27  ;;  %28 = vst [vmem:[#allocation2] sm:$0x1] %v27_v43 }
 0xe11   :  { %v7690_v53 = vpop.f32.mrb[184].mxu0 }
 0xe12   :  { %v7692_v36 = vpop.f32.mrb[185].mxu0 }
 0xe13   :  { %v7694_v60 = vpop.f32.mrb[186].mxu0 }
 0xe14   :  { %v7709_v9 = vmax.f32 %v7690_v53, %v7694_v60  ;;  %v7696_v28 = vpop.f32.mrb[187].mxu0  ;;  %v9016_v60 = vld [vmem:[%s13926_s18] ss:$0 sm:$0xff] }
 0xe15   :  { %v7710_v54 = vmax.f32 %v7692_v36, %v7696_v28  ;;  %v9017_v28 = vld [vmem:[%s13927_s19] ss:$0 sm:$0xff] }
 0xe16   :  { %v7711_v38 = vmax.f32 %v7707_v55, %v7709_v9  ;;  %v9014_v55 = vld [vmem:[%s13925_s17] ss:$0 sm:$0xff] }
 0xe17   :  { %v7712_v3 = vmax.f32 %v7708_v2, %v7710_v54 }
 0xe19   :  { %v7713_v23 = vmax.f32 %v7711_v38, %v7712_v3  ;;  %v9018_v3 = vld [vmem:[#allocation2] ss:$0 sm:$0xff] }
 0xe1b   :  { %v7721_v62 = vadd.f32 %v9010_v25, %v7713_v23 }
 0xe1d   :  { %vm7722_vm6 = vcmp.ge.f32.partialorder %v7721_v62, 0.0  ;;  %v7723_v47 = vmul.f32 0.01, %v7721_v62 }
 0xe1f   :  { %v7724_v14 = vsel %vm7722_vm6, %v7721_v62, %v7723_v47 }
 0xe20   :  { %v7732_v56 = vmul.f32 %v9011_v61, %v7724_v14 }
 0xe22   :  { %v7740_v41 = vadd.f32 %v9012_v45, %v7732_v56 }
 0xe24   :  { %7742 = vrot.lane.b32.xlu0 %v7740_v41, %s10846_s12 }
 0xe96   :  { %v7743_v49 = vpop.permute.xlu0 %7742 }
 0xe97   :  { %v7745_v31 = vadd.f32 %v7743_v49, %v7740_v41 }
 0xe99   :  { %9588 = vmatpush3.msra.mxu1 %v7745_v31 }
 0xe9a   :  { %9590 = vmatmul.mubr.msk.f32.vlgmr.msra.gmra.mrb[184].mxu1 %vm7747_vm7, %v7746_v10  ;;  %9646 = vmatprep.subr.bf16.mxu1 %v10847_v24 }
 0xe9b   :  { %9648 = vmatpush3.bf16.msra.mxu1 %v9647_v63  ;;  %9608 = vmatprep.mubr.msk.f32.mxu1 %vm10845_vm0, %v10844_v51 }
 0xe9c   :  { %9649 = vmatprep.subr.bf16.mxu1 %v10847_v24 }
 0xe9f   :  { %9651 = vmatpush3.bf16.msra.mxu1 %v9650_v57 }
 0xea0   :  { %9652 = vmatprep.subr.bf16.mxu1 %v10847_v24 }
 0xea3   :  { %9654 = vmatpush3.bf16.msra.mxu1 %v9653_v59 }
 0xea4   :  { %9655 = vmatprep.subr.bf16.mxu1 %v10847_v24 }
 0xea7   :  { %9657 = vmatpush3.bf16.msra.mxu1 %v9656_v15 }
 0xea8   :  { %9658 = vmatprep.subr.bf16.mxu1 %v10847_v24 }
 0xf6d   :  { %v7817_v1 = vpop.f32.mrb[184].mxu1 }
 0xf6e   :  { %9609 = vmatmul.mubr.msk.f32.vlgmr.msra.gmra.mrb[186].mxu1 %vm7836_vm8, %v7817_v1  ;;  %v9591_v13 = vpop.f32.mrb[185].mxu1 }
 0xf6f   :  { %9660 = vmatpush3.bf16.msra.mxu1 %v9659_v44  ;;  %9643 = vmatprep.mubr.msk.f32.mxu1 %vm10845_vm0, %v10844_v51 }
 0xf70   :  { %9661 = vmatprep.subr.bf16.mxu1 %v10847_v24 }
 0xf73   :  { %9663 = vmatpush3.bf16.msra.mxu1 %v9662_v37 }
 0xf74   :  { %9664 = vmatprep.subr.bf16.mxu1 %v10847_v24 }
 0xf77   :  { %9666 = vmatpush3.bf16.msra.mxu1 %v9665_v32 }
 0xf78   :  { %9667 = vmatprep.subr.bf16.mxu1 %v10847_v24 }
 0xf7b   :  { %9669 = vmatpush3.bf16.msra.mxu1 %v9668_v46 }
 0xf7c   :  { %9670 = vmatprep.subr.bf16.mxu1 %v10847_v24 }
 0xf7f   :  { %9672 = vmatpush3.bf16.msra.mxu1 %v9671_v30 }
 0xf80   :  { %9673 = vmatprep.subr.bf16.mxu1 %v10847_v24 }
 0xf83   :  { %9675 = vmatpush3.bf16.msra.mxu1 %v9674_v35 }
 0xf84   :  { %9676 = vmatprep.subr.bf16.mxu1 %v10847_v24 }
 0xf87   :  { %9678 = vmatpush3.bf16.msra.mxu1 %v9677_v4 }
 0xf88   :  { %9679 = vmatprep.subr.bf16.mxu1 %v10847_v24 }
 0xf8b   :  { %9681 = vmatpush3.bf16.msra.mxu1 %v9680_v26 }
0x1041   :  { %v7906_v20 = vpop.f32.mrb[186].mxu1 }
0x1042   :  { %v7907_v2 = vadd.f32 %v9014_v55, %v7906_v20  ;;  %v9610_v53 = vpop.f32.mrb[187].mxu1 }
0x1044   :  { %vm7910_vm9 = vcmp.ge.f32.partialorder %v7907_v2, 0.0  ;;  %v7911_v36 = vmul.f32 0.01, %v7907_v2 }
0x1046   :  { %v7912_v9 = vsel %vm7910_vm9, %v7907_v2, %v7911_v36 }
0x1047   :  { %v7920_v54 = vmul.f32 %v9016_v60, %v7912_v9 }
0x1049   :  { %v7928_v38 = vadd.f32 %v9017_v28, %v7920_v54 }
0x104b   :  { %9644 = vmatmul.mubr.f32.vlgmr.msra.gmra.mrb[188].mxu1 %v7928_v38 }
0x111e   :  { %v8018_v25 = vpop.f32.mrb[188].mxu1 }
0x111f   :  { %v8019_v51 = vadd.f32 %v9018_v3, %v8018_v25  ;;  %v9645_v23 = vpop.f32.mrb[189].mxu1 }
0x1121   :  { %8023 = vst.msk [vmem:[%s13928_s22] sm:$0x3] %vm8022_vm10, %v8019_v51 }

</bundles_post_ra>
